<compile_context>
chip_gen: v7x
topology: tpu7x:2x2x1
jax: 0.10.0
libtpu: 0.0.40
codegen_flags: <defaults>
</compile_context>

<pallas_src>
import functools

import jax
import jax.numpy as jnp
import numpy as np
from jax.experimental import pallas as pl
from jax.experimental.pallas import tpu as pltpu


def _round_up(x, m):
  return (x + m - 1) // m * m


def _make_tap_masks(H2, W2, b_tile):
  """Static 0/1 validity masks for the 9 taps of a 3x3 'same' convolution.

  Built on the host (hoists iota / div / mod out of the kernel) and tiled
  b_tile times along the lane axis so every image in the batch-lane tile gets
  its own border zeroing.  Shape: (9, 1, b_tile*H2*W2), float32 in {0, 1}.
  """
  HW = H2 * W2
  yy, xx = np.divmod(np.arange(HW, dtype=np.int64), W2)
  masks = np.empty((9, HW), np.float32)
  for t in range(9):
    oy, ox = t // 3 - 1, t % 3 - 1
    m = np.ones(HW, dtype=bool)
    if oy == -1:
      m &= yy >= 1
    elif oy == 1:
      m &= yy < H2 - 1
    if ox == -1:
      m &= xx >= 1
    elif ox == 1:
      m &= xx < W2 - 1
    masks[t] = m
  return jnp.asarray(np.tile(masks[:, None, :], (1, 1, b_tile)))


def _make_fused_kernel(W2, Cp, b_tile, hw, n_blocks):
  """Fused body(4x ResidualBlockNoBN) + end_conv + LeakyReLU kernel.

  Refs (one batch tile of b_tile images per grid step, L = b_tile*hw):
    x_ref     : (1, Cp, L)            pixel-shuffled activations, lane-dense
    masks_ref : (9, 1, L)             static 0/1 border masks (grid-invariant)
    bw_ref    : (2*n_blocks, Cp, K)   packed body weights, bias in column 9*Cp
    ew_ref    : (Op, K)               packed end weight, bias in column 9*Cp
    o_ref     : (1, Op, L)            output
    patch_ref : (K, L)  VMEM scratch  im2col patch matrix (reused by all convs)
  """
  L = b_tile * hw

  def kernel(x_ref, masks_ref, bw_ref, ew_ref, o_ref, patch_ref):
    # Constant rows used for bias folding: row 9*Cp is all-ones, rows
    # 9*Cp+1 .. 9*Cp+7 are zero (sublane-alignment padding). Written once per
    # grid step; reused by all 9 convolutions.
    row = jax.lax.broadcasted_iota(jnp.int32, (8, L), 0)
    patch_ref[pl.ds(9 * Cp, 8), :] = (row == 0).astype(jnp.float32)

    def conv3x3(a, w):
      # a: (Cp, L) activation; w: (Cout_p, K) weight with bias at column 9*Cp.
      # im2col = 8 XLU lane-rolls + 0/1 mask multiplies, stored at static
      # 8-aligned sublane offsets of the persistent scratch, then ONE MXU
      # matmul (Cout_p, K) @ (K, L).  Bias comes via the constant ones row.
      for t in range(9):
        oy, ox = t // 3 - 1, t % 3 - 1
        k = oy * W2 + ox
        v = a if k == 0 else pltpu.roll(a, shift=(-k) % L, axis=1)
        if t != 4:                      # center tap needs no border mask
          v = v * masks_ref[t]          # (Cp, L) * (1, L)  (0/1 mask)
        patch_ref[pl.ds(t * Cp, Cp), :] = v
      return jnp.dot(w, patch_ref[...], preferred_element_type=jnp.float32)

    h = x_ref[0]                        # (Cp, L), f32

    # body: n_blocks x ResidualBlockNoBN  (identity + conv2(relu(conv1(x))))
    for i in range(n_blocks):
      u = jnp.maximum(conv3x3(h, bw_ref[2 * i]), 0.0)
      h = h + conv3x3(u, bw_ref[2 * i + 1])

    # end conv + LeakyReLU(negative_slope=0.01)
    out = conv3x3(h, ew_ref[...])
    o_ref[0] = jnp.where(out >= 0.0, out, 0.01 * out).astype(o_ref.dtype)

  return kernel


def _pack_conv(w_hwio, b, cin_p, cout_p):
  """(3,3,Cin,Cout) HWIO weight + (Cout,) bias -> (cout_p, 9*cin_p + 8).

  Column layout is (tap dy,dx major, cin minor), matching the patch scratch.
  The bias sits in column 9*cin_p (it multiplies the scratch's constant ones
  row); columns 9*cin_p+1..+7 are zero.  Padded channels get zero weights and
  zero bias so they stay exactly zero end-to-end.
  """
  kh, kw, cin, cout = w_hwio.shape
  wt = jnp.transpose(w_hwio, (3, 0, 1, 2))                     # (Cout,3,3,Cin)
  wt = jnp.pad(wt, ((0, cout_p - cout), (0, 0), (0, 0), (0, cin_p - cin)))
  wt = wt.reshape(cout_p, kh * kw * cin_p)
  bias_cols = jnp.zeros((cout_p, 8), jnp.float32)
  bias_cols = bias_cols.at[:cout, 0].set(b.astype(jnp.float32))
  return jnp.concatenate([wt.astype(jnp.float32), bias_cols], axis=1)


def pixel_shuffle_nchw(x, r=2):
  """nn.PixelShuffle(r): (N, C*r^2, H, W) -> (N, C, H*r, W*r)."""
  N, Cr2, H, W = x.shape
  C = Cr2 // (r * r)
  x = x.reshape(N, C, r, r, H, W)
  x = jnp.transpose(x, (0, 1, 4, 2, 5, 3))
  return x.reshape(N, C, H * r, W * r)


def feature_reconstruction_forward(x_nchw, params, out_feat, target_lanes=4096):
  N, Cr2, H, W = x_nchw.shape
  C = Cr2 // 4
  H2, W2 = 2 * H, 2 * W
  HW = H2 * W2
  Cp = _round_up(C, 8)
  Op = _round_up(out_feat, 8)
  K = 9 * Cp + 8
  n_blocks = len(params["body"])
  n_convs = 2 * n_blocks

  # --- batch-lane fusion: pack b_tile images side-by-side on the lane axis ---
  b_tile = max(1, min(N, target_lanes // max(HW, 1)))
  n_pad = _round_up(N, b_tile)
  num_tiles = n_pad // b_tile
  L = b_tile * HW

  # PixelShuffle + lane-dense packing + channel/batch padding (host-side
  # layout glue; padded channels/images remain exactly zero through the net).
  # TODO(synk): fold the pixel-shuffle lane interleave into the kernel.
  h = pixel_shuffle_nchw(x_nchw, r=2).reshape(N, C, HW).astype(jnp.float32)
  h = jnp.pad(h, ((0, n_pad - N), (0, Cp - C), (0, 0)))
  h = h.reshape(num_tiles, b_tile, Cp, HW).transpose(0, 2, 1, 3)
  h = h.reshape(num_tiles, Cp, L)

  masks = _make_tap_masks(H2, W2, b_tile)               # (9, 1, L) f32
  assert masks.shape == (9, 1, L)                       # per-image replication

  # Pack all conv weights once (biases folded in); they stay VMEM-resident.
  body_w = []
  for blk in params["body"]:
    body_w.append(_pack_conv(blk["w1"], blk["b1"], Cp, Cp))
    body_w.append(_pack_conv(blk["w2"], blk["b2"], Cp, Cp))
  bw = jnp.stack(body_w)                                # (2*n_blocks, Cp, K)
  ew = _pack_conv(params["end_w"], params["end_b"], Cp, Op)      # (Op, K)

  kernel = _make_fused_kernel(W2, Cp, b_tile, HW, n_blocks)

  out = pl.pallas_call(
      kernel,
      grid=(num_tiles,),
      in_specs=[
          pl.BlockSpec((1, Cp, L), lambda n: (n, 0, 0)),         # activations
          pl.BlockSpec((9, 1, L), lambda n: (0, 0, 0)),          # border masks
          pl.BlockSpec((n_convs, Cp, K), lambda n: (0, 0, 0)),   # body weights
          pl.BlockSpec((Op, K), lambda n: (0, 0)),               # end weight
      ],
      out_specs=pl.BlockSpec((1, Op, L), lambda n: (n, 0, 0)),
      out_shape=jax.ShapeDtypeStruct((num_tiles, Op, L), jnp.float32),
      scratch_shapes=[pltpu.VMEM((K, L), jnp.float32)],          # im2col patch
      compiler_params=pltpu.CompilerParams(
          dimension_semantics=("parallel",),
          vmem_limit_bytes=64 * 1024 * 1024),
  )(h, masks, bw, ew)

  # Unpack: drop batch/channel padding, restore NCHW spatial layout.
  out = out.reshape(num_tiles, Op, b_tile, HW).transpose(0, 2, 1, 3)
  out = out.reshape(n_pad, Op, HW)[:N, :out_feat]
  return out.reshape(N, out_feat, H2, W2)


def init_params(key, num_feat, out_feat):
  """Deterministic synthetic weights matching the module's parameter shapes."""
  C = num_feat // 4
  keys = jax.random.split(key, 4 * 4 + 2)
  params = {"body": []}
  k = 0
  for _ in range(4):  # make_layer(ResidualBlockNoBN, 4, num_feat=C)
    blk = {
        "w1": 0.1 * jax.random.normal(keys[k + 0], (3, 3, C, C), jnp.float32),
        "b1": 0.1 * jax.random.normal(keys[k + 1], (C,), jnp.float32),
        "w2": 0.1 * jax.random.normal(keys[k + 2], (3, 3, C, C), jnp.float32),
        "b2": 0.1 * jax.random.normal(keys[k + 3], (C,), jnp.float32),
    }
    params["body"].append(blk)
    k += 4
  params["end_w"] = 0.1 * jax.random.normal(keys[k], (3, 3, C, out_feat),
                                            jnp.float32)
  params["end_b"] = 0.1 * jax.random.normal(keys[k + 1], (out_feat,),
                                            jnp.float32)
  return params


# ----------------------------- pure-JAX reference -----------------------------
def _ref_conv(x_nchw, w_hwio, b):
  out = jax.lax.conv_general_dilated(
      x_nchw, w_hwio, window_strides=(1, 1), padding=((1, 1), (1, 1)),
      dimension_numbers=("NCHW", "HWIO", "NCHW"),
      precision=jax.lax.Precision.HIGHEST)
  return out + b.reshape(1, -1, 1, 1)


def reference_forward(x_nchw, params):
  h = pixel_shuffle_nchw(x_nchw, r=2)
  for blk in params["body"]:
    t = jnp.maximum(_ref_conv(h, blk["w1"], blk["b1"]), 0.0)
    h = h + _ref_conv(t, blk["w2"], blk["b2"])
  out = _ref_conv(h, params["end_w"], params["end_b"])
  return jnp.where(out >= 0.0, out, 0.01 * out)


if __name__ == "__main__":
  num_feat = 16   # num_feat // 4 = 4 channels after pixel shuffle
  out_feat = 3
  N, H, W = 2, 8, 8

  key = jax.random.PRNGKey(0)
  kx, kp = jax.random.split(key)
  x = jax.random.normal(kx, (N, num_feat, H, W), jnp.float32)
  params = init_params(kp, num_feat, out_feat)

  fwd = jax.jit(functools.partial(feature_reconstruction_forward,
                                  params=params, out_feat=out_feat))
  out = fwd(x)
  jax.block_until_ready(out)
  assert out.shape == (N, out_feat, 2 * H, 2 * W), out.shape

  ref = reference_forward(x, params)
  np.testing.assert_allclose(np.asarray(out), np.asarray(ref),
                             atol=2e-3, rtol=2e-3)
  print("KERNEL_OK")
</pallas_src>

<mosaic_0001>
module attributes {stable_mosaic.version = 11 : i64} {
  func.func @kernel(%arg0: i32, %arg1: memref<1x8x512xf32, #tpu.memory_space<vmem>>, %arg2: memref<9x1x512xf32, #tpu.memory_space<vmem>>, %arg3: memref<8x8x80xf32, #tpu.memory_space<vmem>>, %arg4: memref<8x80xf32, #tpu.memory_space<vmem>>, %arg5: memref<1x8x512xf32, #tpu.memory_space<vmem>>, %arg6: memref<80x512xf32, #tpu.memory_space<vmem>>) attributes {dimension_semantics = [#tpu.dimension_semantics<parallel>], iteration_bounds = array<i64: 1>, scalar_prefetch = 0 : i64, scratch_operands = 1 : i64, tpu.core_type = #tpu.core_type<tc>, window_params = [{transform_indices = @transform_0, window_bounds = array<i64: 1, 8, 512>}, {pipeline_mode = #tpu.pipeline_mode<synchronous>, transform_indices = @transform_1, window_bounds = array<i64: 9, 1, 512>}, {pipeline_mode = #tpu.pipeline_mode<synchronous>, transform_indices = @transform_2, window_bounds = array<i64: 8, 8, 80>}, {pipeline_mode = #tpu.pipeline_mode<synchronous>, transform_indices = @transform_3, window_bounds = array<i64: 8, 80>}, {transform_indices = @transform_4, window_bounds = array<i64: 1, 8, 512>}]} {
    %0 = tpu.iota {dimensions = array<i32: 0>} : vector<8x512xi32>
    %c0_i32 = arith.constant 0 : i32
    %1 = vector.broadcast %c0_i32 : i32 to vector<8x512xi32>
    %2 = arith.cmpi eq, %0, %1 : vector<8x512xi32>
    %3 = arith.extui %2 : vector<8x512xi1> to vector<8x512xi32>
    %4 = arith.sitofp %3 : vector<8x512xi32> to vector<8x512xf32>
    %c72 = arith.constant 72 : index
    %c0 = arith.constant 0 : index
    %5 = vector.load %arg6[%c72, %c0] : memref<80x512xf32, #tpu.memory_space<vmem>>, vector<8x512xf32>
    tpu.vector_store %arg6[%c72, %c0], %4 {strides = array<i32>} : memref<80x512xf32, #tpu.memory_space<vmem>>, vector<8x512xf32>,
    %c0_0 = arith.constant 0 : index
    %c0_1 = arith.constant 0 : index
    %c0_2 = arith.constant 0 : index
    %6 = vector.load %arg1[%c0_0, %c0_1, %c0_2] : memref<1x8x512xf32, #tpu.memory_space<vmem>>, vector<1x8x512xf32>
    %7 = vector.shape_cast %6 : vector<1x8x512xf32> to vector<8x512xf32>
    %c0_3 = arith.constant 0 : index
    %c0_4 = arith.constant 0 : index
    %c0_5 = arith.constant 0 : index
    %8 = vector.load %arg3[%c0_3, %c0_4, %c0_5] : memref<8x8x80xf32, #tpu.memory_space<vmem>>, vector<1x8x80xf32>
    %9 = vector.shape_cast %8 : vector<1x8x80xf32> to vector<8x80xf32>
    %c17_i32 = arith.constant 17 : i32
    %10 = tpu.dynamic_rotate %7 by %c17_i32 dim 1 : vector<8x512xf32>, i32 -> vector<8x512xf32>
    %c0_6 = arith.constant 0 : index
    %c0_7 = arith.constant 0 : index
    %c0_8 = arith.constant 0 : index
    %11 = vector.load %arg2[%c0_6, %c0_7, %c0_8] : memref<9x1x512xf32, #tpu.memory_space<vmem>>, vector<1x1x512xf32>
    %12 = vector.shape_cast %11 : vector<1x1x512xf32> to vector<1x512xf32>
    %13 = vector.broadcast %12 : vector<1x512xf32> to vector<8x512xf32>
    %14 = arith.mulf %10, %13 : vector<8x512xf32>
    %c0_9 = arith.constant 0 : index
    %c0_10 = arith.constant 0 : index
    %15 = vector.load %arg6[%c0_9, %c0_10] : memref<80x512xf32, #tpu.memory_space<vmem>>, vector<8x512xf32>
    tpu.vector_store %arg6[%c0_9, %c0_10], %14 {strides = array<i32>} : memref<80x512xf32, #tpu.memory_space<vmem>>, vector<8x512xf32>,
    %c16_i32 = arith.constant 16 : i32
    %16 = tpu.dynamic_rotate %7 by %c16_i32 dim 1 : vector<8x512xf32>, i32 -> vector<8x512xf32>
    %c1 = arith.constant 1 : index
    %c0_11 = arith.constant 0 : index
    %c0_12 = arith.constant 0 : index
    %17 = vector.load %arg2[%c1, %c0_11, %c0_12] : memref<9x1x512xf32, #tpu.memory_space<vmem>>, vector<1x1x512xf32>
    %18 = vector.shape_cast %17 : vector<1x1x512xf32> to vector<1x512xf32>
    %19 = vector.broadcast %18 : vector<1x512xf32> to vector<8x512xf32>
    %20 = arith.mulf %16, %19 : vector<8x512xf32>
    %c8 = arith.constant 8 : index
    %c0_13 = arith.constant 0 : index
    %21 = vector.load %arg6[%c8, %c0_13] : memref<80x512xf32, #tpu.memory_space<vmem>>, vector<8x512xf32>
    tpu.vector_store %arg6[%c8, %c0_13], %20 {strides = array<i32>} : memref<80x512xf32, #tpu.memory_space<vmem>>, vector<8x512xf32>,
    %c15_i32 = arith.constant 15 : i32
    %22 = tpu.dynamic_rotate %7 by %c15_i32 dim 1 : vector<8x512xf32>, i32 -> vector<8x512xf32>
    %c2 = arith.constant 2 : index
    %c0_14 = arith.constant 0 : index
    %c0_15 = arith.constant 0 : index
    %23 = vector.load %arg2[%c2, %c0_14, %c0_15] : memref<9x1x512xf32, #tpu.memory_space<vmem>>, vector<1x1x512xf32>
    %24 = vector.shape_cast %23 : vector<1x1x512xf32> to vector<1x512xf32>
    %25 = vector.broadcast %24 : vector<1x512xf32> to vector<8x512xf32>
    %26 = arith.mulf %22, %25 : vector<8x512xf32>
    %c16 = arith.constant 16 : index
    %c0_16 = arith.constant 0 : index
    %27 = vector.load %arg6[%c16, %c0_16] : memref<80x512xf32, #tpu.memory_space<vmem>>, vector<8x512xf32>
    tpu.vector_store %arg6[%c16, %c0_16], %26 {strides = array<i32>} : memref<80x512xf32, #tpu.memory_space<vmem>>, vector<8x512xf32>,
    %c1_i32 = arith.constant 1 : i32
    %28 = tpu.dynamic_rotate %7 by %c1_i32 dim 1 : vector<8x512xf32>, i32 -> vector<8x512xf32>
    %c3 = arith.constant 3 : index
    %c0_17 = arith.constant 0 : index
    %c0_18 = arith.constant 0 : index
    %29 = vector.load %arg2[%c3, %c0_17, %c0_18] : memref<9x1x512xf32, #tpu.memory_space<vmem>>, vector<1x1x512xf32>
    %30 = vector.shape_cast %29 : vector<1x1x512xf32> to vector<1x512xf32>
    %31 = vector.broadcast %30 : vector<1x512xf32> to vector<8x512xf32>
    %32 = arith.mulf %28, %31 : vector<8x512xf32>
    %c24 = arith.constant 24 : index
    %c0_19 = arith.constant 0 : index
    %33 = vector.load %arg6[%c24, %c0_19] : memref<80x512xf32, #tpu.memory_space<vmem>>, vector<8x512xf32>
    tpu.vector_store %arg6[%c24, %c0_19], %32 {strides = array<i32>} : memref<80x512xf32, #tpu.memory_space<vmem>>, vector<8x512xf32>,
    %c32 = arith.constant 32 : index
    %c0_20 = arith.constant 0 : index
    %34 = vector.load %arg6[%c32, %c0_20] : memref<80x512xf32, #tpu.memory_space<vmem>>, vector<8x512xf32>
    tpu.vector_store %arg6[%c32, %c0_20], %7 {strides = array<i32>} : memref<80x512xf32, #tpu.memory_space<vmem>>, vector<8x512xf32>,
    %c511_i32 = arith.constant 511 : i32
    %35 = tpu.dynamic_rotate %7 by %c511_i32 dim 1 : vector<8x512xf32>, i32 -> vector<8x512xf32>
    %c5 = arith.constant 5 : index
    %c0_21 = arith.constant 0 : index
    %c0_22 = arith.constant 0 : index
    %36 = vector.load %arg2[%c5, %c0_21, %c0_22] : memref<9x1x512xf32, #tpu.memory_space<vmem>>, vector<1x1x512xf32>
    %37 = vector.shape_cast %36 : vector<1x1x512xf32> to vector<1x512xf32>
    %38 = vector.broadcast %37 : vector<1x512xf32> to vector<8x512xf32>
    %39 = arith.mulf %35, %38 : vector<8x512xf32>
    %c40 = arith.constant 40 : index
    %c0_23 = arith.constant 0 : index
    %40 = vector.load %arg6[%c40, %c0_23] : memref<80x512xf32, #tpu.memory_space<vmem>>, vector<8x512xf32>
    tpu.vector_store %arg6[%c40, %c0_23], %39 {strides = array<i32>} : memref<80x512xf32, #tpu.memory_space<vmem>>, vector<8x512xf32>,
    %c497_i32 = arith.constant 497 : i32
    %41 = tpu.dynamic_rotate %7 by %c497_i32 dim 1 : vector<8x512xf32>, i32 -> vector<8x512xf32>
    %c6 = arith.constant 6 : index
    %c0_24 = arith.constant 0 : index
    %c0_25 = arith.constant 0 : index
    %42 = vector.load %arg2[%c6, %c0_24, %c0_25] : memref<9x1x512xf32, #tpu.memory_space<vmem>>, vector<1x1x512xf32>
    %43 = vector.shape_cast %42 : vector<1x1x512xf32> to vector<1x512xf32>
    %44 = vector.broadcast %43 : vector<1x512xf32> to vector<8x512xf32>
    %45 = arith.mulf %41, %44 : vector<8x512xf32>
    %c48 = arith.constant 48 : index
    %c0_26 = arith.constant 0 : index
    %46 = vector.load %arg6[%c48, %c0_26] : memref<80x512xf32, #tpu.memory_space<vmem>>, vector<8x512xf32>
    tpu.vector_store %arg6[%c48, %c0_26], %45 {strides = array<i32>} : memref<80x512xf32, #tpu.memory_space<vmem>>, vector<8x512xf32>,
    %c496_i32 = arith.constant 496 : i32
    %47 = tpu.dynamic_rotate %7 by %c496_i32 dim 1 : vector<8x512xf32>, i32 -> vector<8x512xf32>
    %c7 = arith.constant 7 : index
    %c0_27 = arith.constant 0 : index
    %c0_28 = arith.constant 0 : index
    %48 = vector.load %arg2[%c7, %c0_27, %c0_28] : memref<9x1x512xf32, #tpu.memory_space<vmem>>, vector<1x1x512xf32>
    %49 = vector.shape_cast %48 : vector<1x1x512xf32> to vector<1x512xf32>
    %50 = vector.broadcast %49 : vector<1x512xf32> to vector<8x512xf32>
    %51 = arith.mulf %47, %50 : vector<8x512xf32>
    %c56 = arith.constant 56 : index
    %c0_29 = arith.constant 0 : index
    %52 = vector.load %arg6[%c56, %c0_29] : memref<80x512xf32, #tpu.memory_space<vmem>>, vector<8x512xf32>
    tpu.vector_store %arg6[%c56, %c0_29], %51 {strides = array<i32>} : memref<80x512xf32, #tpu.memory_space<vmem>>, vector<8x512xf32>,
    %c495_i32 = arith.constant 495 : i32
    %53 = tpu.dynamic_rotate %7 by %c495_i32 dim 1 : vector<8x512xf32>, i32 -> vector<8x512xf32>
    %c8_30 = arith.constant 8 : index
    %c0_31 = arith.constant 0 : index
    %c0_32 = arith.constant 0 : index
    %54 = vector.load %arg2[%c8_30, %c0_31, %c0_32] : memref<9x1x512xf32, #tpu.memory_space<vmem>>, vector<1x1x512xf32>
    %55 = vector.shape_cast %54 : vector<1x1x512xf32> to vector<1x512xf32>
    %56 = vector.broadcast %55 : vector<1x512xf32> to vector<8x512xf32>
    %57 = arith.mulf %53, %56 : vector<8x512xf32>
    %c64 = arith.constant 64 : index
    %c0_33 = arith.constant 0 : index
    %58 = vector.load %arg6[%c64, %c0_33] : memref<80x512xf32, #tpu.memory_space<vmem>>, vector<8x512xf32>
    tpu.vector_store %arg6[%c64, %c0_33], %57 {strides = array<i32>} : memref<80x512xf32, #tpu.memory_space<vmem>>, vector<8x512xf32>,
    %c0_34 = arith.constant 0 : index
    %c0_35 = arith.constant 0 : index
    %59 = vector.load %arg6[%c0_34, %c0_35] : memref<80x512xf32, #tpu.memory_space<vmem>>, vector<80x512xf32>
    %cst = arith.constant dense<0.000000e+00> : vector<8x512xf32>
    %60 = tpu.matmul %9, %59, %cst {dimension_numbers = #tpu.dot_dimension_numbers<[1], [0], [0], [1], [0, 0, 1, 1], [], []>} : vector<8x80xf32>, vector<80x512xf32>, vector<8x512xf32> -> vector<8x512xf32>
    %cst_36 = arith.constant 0.000000e+00 : f32
    %61 = vector.broadcast %cst_36 : f32 to vector<8x512xf32>
    %62 = arith.maximumf %60, %61 : vector<8x512xf32>
    %c1_37 = arith.constant 1 : index
    %c0_38 = arith.constant 0 : index
    %c0_39 = arith.constant 0 : index
    %63 = vector.load %arg3[%c1_37, %c0_38, %c0_39] : memref<8x8x80xf32, #tpu.memory_space<vmem>>, vector<1x8x80xf32>
    %64 = vector.shape_cast %63 : vector<1x8x80xf32> to vector<8x80xf32>
    %c17_i32_40 = arith.constant 17 : i32
    %65 = tpu.dynamic_rotate %62 by %c17_i32_40 dim 1 : vector<8x512xf32>, i32 -> vector<8x512xf32>
    %c0_41 = arith.constant 0 : index
    %c0_42 = arith.constant 0 : index
    %c0_43 = arith.constant 0 : index
    %66 = vector.load %arg2[%c0_41, %c0_42, %c0_43] : memref<9x1x512xf32, #tpu.memory_space<vmem>>, vector<1x1x512xf32>
    %67 = vector.shape_cast %66 : vector<1x1x512xf32> to vector<1x512xf32>
    %68 = vector.broadcast %67 : vector<1x512xf32> to vector<8x512xf32>
    %69 = arith.mulf %65, %68 : vector<8x512xf32>
    %c0_44 = arith.constant 0 : index
    %c0_45 = arith.constant 0 : index
    %70 = vector.load %arg6[%c0_44, %c0_45] : memref<80x512xf32, #tpu.memory_space<vmem>>, vector<8x512xf32>
    tpu.vector_store %arg6[%c0_44, %c0_45], %69 {strides = array<i32>} : memref<80x512xf32, #tpu.memory_space<vmem>>, vector<8x512xf32>,
    %c16_i32_46 = arith.constant 16 : i32
    %71 = tpu.dynamic_rotate %62 by %c16_i32_46 dim 1 : vector<8x512xf32>, i32 -> vector<8x512xf32>
    %c1_47 = arith.constant 1 : index
    %c0_48 = arith.constant 0 : index
    %c0_49 = arith.constant 0 : index
    %72 = vector.load %arg2[%c1_47, %c0_48, %c0_49] : memref<9x1x512xf32, #tpu.memory_space<vmem>>, vector<1x1x512xf32>
    %73 = vector.shape_cast %72 : vector<1x1x512xf32> to vector<1x512xf32>
    %74 = vector.broadcast %73 : vector<1x512xf32> to vector<8x512xf32>
    %75 = arith.mulf %71, %74 : vector<8x512xf32>
    %c8_50 = arith.constant 8 : index
    %c0_51 = arith.constant 0 : index
    %76 = vector.load %arg6[%c8_50, %c0_51] : memref<80x512xf32, #tpu.memory_space<vmem>>, vector<8x512xf32>
    tpu.vector_store %arg6[%c8_50, %c0_51], %75 {strides = array<i32>} : memref<80x512xf32, #tpu.memory_space<vmem>>, vector<8x512xf32>,
    %c15_i32_52 = arith.constant 15 : i32
    %77 = tpu.dynamic_rotate %62 by %c15_i32_52 dim 1 : vector<8x512xf32>, i32 -> vector<8x512xf32>
    %c2_53 = arith.constant 2 : index
    %c0_54 = arith.constant 0 : index
    %c0_55 = arith.constant 0 : index
    %78 = vector.load %arg2[%c2_53, %c0_54, %c0_55] : memref<9x1x512xf32, #tpu.memory_space<vmem>>, vector<1x1x512xf32>
    %79 = vector.shape_cast %78 : vector<1x1x512xf32> to vector<1x512xf32>
    %80 = vector.broadcast %79 : vector<1x512xf32> to vector<8x512xf32>
    %81 = arith.mulf %77, %80 : vector<8x512xf32>
    %c16_56 = arith.constant 16 : index
    %c0_57 = arith.constant 0 : index
    %82 = vector.load %arg6[%c16_56, %c0_57] : memref<80x512xf32, #tpu.memory_space<vmem>>, vector<8x512xf32>
    tpu.vector_store %arg6[%c16_56, %c0_57], %81 {strides = array<i32>} : memref<80x512xf32, #tpu.memory_space<vmem>>, vector<8x512xf32>,
    %c1_i32_58 = arith.constant 1 : i32
    %83 = tpu.dynamic_rotate %62 by %c1_i32_58 dim 1 : vector<8x512xf32>, i32 -> vector<8x512xf32>
    %c3_59 = arith.constant 3 : index
    %c0_60 = arith.constant 0 : index
    %c0_61 = arith.constant 0 : index
    %84 = vector.load %arg2[%c3_59, %c0_60, %c0_61] : memref<9x1x512xf32, #tpu.memory_space<vmem>>, vector<1x1x512xf32>
    %85 = vector.shape_cast %84 : vector<1x1x512xf32> to vector<1x512xf32>
    %86 = vector.broadcast %85 : vector<1x512xf32> to vector<8x512xf32>
    %87 = arith.mulf %83, %86 : vector<8x512xf32>
    %c24_62 = arith.constant 24 : index
    %c0_63 = arith.constant 0 : index
    %88 = vector.load %arg6[%c24_62, %c0_63] : memref<80x512xf32, #tpu.memory_space<vmem>>, vector<8x512xf32>
    tpu.vector_store %arg6[%c24_62, %c0_63], %87 {strides = array<i32>} : memref<80x512xf32, #tpu.memory_space<vmem>>, vector<8x512xf32>,
    %c32_64 = arith.constant 32 : index
    %c0_65 = arith.constant 0 : index
    %89 = vector.load %arg6[%c32_64, %c0_65] : memref<80x512xf32, #tpu.memory_space<vmem>>, vector<8x512xf32>
    tpu.vector_store %arg6[%c32_64, %c0_65], %62 {strides = array<i32>} : memref<80x512xf32, #tpu.memory_space<vmem>>, vector<8x512xf32>,
    %c511_i32_66 = arith.constant 511 : i32
    %90 = tpu.dynamic_rotate %62 by %c511_i32_66 dim 1 : vector<8x512xf32>, i32 -> vector<8x512xf32>
    %c5_67 = arith.constant 5 : index
    %c0_68 = arith.constant 0 : index
    %c0_69 = arith.constant 0 : index
    %91 = vector.load %arg2[%c5_67, %c0_68, %c0_69] : memref<9x1x512xf32, #tpu.memory_space<vmem>>, vector<1x1x512xf32>
    %92 = vector.shape_cast %91 : vector<1x1x512xf32> to vector<1x512xf32>
    %93 = vector.broadcast %92 : vector<1x512xf32> to vector<8x512xf32>
    %94 = arith.mulf %90, %93 : vector<8x512xf32>
    %c40_70 = arith.constant 40 : index
    %c0_71 = arith.constant 0 : index
    %95 = vector.load %arg6[%c40_70, %c0_71] : memref<80x512xf32, #tpu.memory_space<vmem>>, vector<8x512xf32>
    tpu.vector_store %arg6[%c40_70, %c0_71], %94 {strides = array<i32>} : memref<80x512xf32, #tpu.memory_space<vmem>>, vector<8x512xf32>,
    %c497_i32_72 = arith.constant 497 : i32
    %96 = tpu.dynamic_rotate %62 by %c497_i32_72 dim 1 : vector<8x512xf32>, i32 -> vector<8x512xf32>
    %c6_73 = arith.constant 6 : index
    %c0_74 = arith.constant 0 : index
    %c0_75 = arith.constant 0 : index
    %97 = vector.load %arg2[%c6_73, %c0_74, %c0_75] : memref<9x1x512xf32, #tpu.memory_space<vmem>>, vector<1x1x512xf32>
    %98 = vector.shape_cast %97 : vector<1x1x512xf32> to vector<1x512xf32>
    %99 = vector.broadcast %98 : vector<1x512xf32> to vector<8x512xf32>
    %100 = arith.mulf %96, %99 : vector<8x512xf32>
    %c48_76 = arith.constant 48 : index
    %c0_77 = arith.constant 0 : index
    %101 = vector.load %arg6[%c48_76, %c0_77] : memref<80x512xf32, #tpu.memory_space<vmem>>, vector<8x512xf32>
    tpu.vector_store %arg6[%c48_76, %c0_77], %100 {strides = array<i32>} : memref<80x512xf32, #tpu.memory_space<vmem>>, vector<8x512xf32>,
    %c496_i32_78 = arith.constant 496 : i32
    %102 = tpu.dynamic_rotate %62 by %c496_i32_78 dim 1 : vector<8x512xf32>, i32 -> vector<8x512xf32>
    %c7_79 = arith.constant 7 : index
    %c0_80 = arith.constant 0 : index
    %c0_81 = arith.constant 0 : index
    %103 = vector.load %arg2[%c7_79, %c0_80, %c0_81] : memref<9x1x512xf32, #tpu.memory_space<vmem>>, vector<1x1x512xf32>
    %104 = vector.shape_cast %103 : vector<1x1x512xf32> to vector<1x512xf32>
    %105 = vector.broadcast %104 : vector<1x512xf32> to vector<8x512xf32>
    %106 = arith.mulf %102, %105 : vector<8x512xf32>
    %c56_82 = arith.constant 56 : index
    %c0_83 = arith.constant 0 : index
    %107 = vector.load %arg6[%c56_82, %c0_83] : memref<80x512xf32, #tpu.memory_space<vmem>>, vector<8x512xf32>
    tpu.vector_store %arg6[%c56_82, %c0_83], %106 {strides = array<i32>} : memref<80x512xf32, #tpu.memory_space<vmem>>, vector<8x512xf32>,
    %c495_i32_84 = arith.constant 495 : i32
    %108 = tpu.dynamic_rotate %62 by %c495_i32_84 dim 1 : vector<8x512xf32>, i32 -> vector<8x512xf32>
    %c8_85 = arith.constant 8 : index
    %c0_86 = arith.constant 0 : index
    %c0_87 = arith.constant 0 : index
    %109 = vector.load %arg2[%c8_85, %c0_86, %c0_87] : memref<9x1x512xf32, #tpu.memory_space<vmem>>, vector<1x1x512xf32>
    %110 = vector.shape_cast %109 : vector<1x1x512xf32> to vector<1x512xf32>
    %111 = vector.broadcast %110 : vector<1x512xf32> to vector<8x512xf32>
    %112 = arith.mulf %108, %111 : vector<8x512xf32>
    %c64_88 = arith.constant 64 : index
    %c0_89 = arith.constant 0 : index
    %113 = vector.load %arg6[%c64_88, %c0_89] : memref<80x512xf32, #tpu.memory_space<vmem>>, vector<8x512xf32>
    tpu.vector_store %arg6[%c64_88, %c0_89], %112 {strides = array<i32>} : memref<80x512xf32, #tpu.memory_space<vmem>>, vector<8x512xf32>,
    %c0_90 = arith.constant 0 : index
    %c0_91 = arith.constant 0 : index
    %114 = vector.load %arg6[%c0_90, %c0_91] : memref<80x512xf32, #tpu.memory_space<vmem>>, vector<80x512xf32>
    %cst_92 = arith.constant dense<0.000000e+00> : vector<8x512xf32>
    %115 = tpu.matmul %64, %114, %cst_92 {dimension_numbers = #tpu.dot_dimension_numbers<[1], [0], [0], [1], [0, 0, 1, 1], [], []>} : vector<8x80xf32>, vector<80x512xf32>, vector<8x512xf32> -> vector<8x512xf32>
    %116 = arith.addf %7, %115 : vector<8x512xf32>
    %c2_93 = arith.constant 2 : index
    %c0_94 = arith.constant 0 : index
    %c0_95 = arith.constant 0 : index
    %117 = vector.load %arg3[%c2_93, %c0_94, %c0_95] : memref<8x8x80xf32, #tpu.memory_space<vmem>>, vector<1x8x80xf32>
    %118 = vector.shape_cast %117 : vector<1x8x80xf32> to vector<8x80xf32>
    %c17_i32_96 = arith.constant 17 : i32
    %119 = tpu.dynamic_rotate %116 by %c17_i32_96 dim 1 : vector<8x512xf32>, i32 -> vector<8x512xf32>
    %c0_97 = arith.constant 0 : index
    %c0_98 = arith.constant 0 : index
    %c0_99 = arith.constant 0 : index
    %120 = vector.load %arg2[%c0_97, %c0_98, %c0_99] : memref<9x1x512xf32, #tpu.memory_space<vmem>>, vector<1x1x512xf32>
    %121 = vector.shape_cast %120 : vector<1x1x512xf32> to vector<1x512xf32>
    %122 = vector.broadcast %121 : vector<1x512xf32> to vector<8x512xf32>
    %123 = arith.mulf %119, %122 : vector<8x512xf32>
    %c0_100 = arith.constant 0 : index
    %c0_101 = arith.constant 0 : index
    %124 = vector.load %arg6[%c0_100, %c0_101] : memref<80x512xf32, #tpu.memory_space<vmem>>, vector<8x512xf32>
    tpu.vector_store %arg6[%c0_100, %c0_101], %123 {strides = array<i32>} : memref<80x512xf32, #tpu.memory_space<vmem>>, vector<8x512xf32>,
    %c16_i32_102 = arith.constant 16 : i32
    %125 = tpu.dynamic_rotate %116 by %c16_i32_102 dim 1 : vector<8x512xf32>, i32 -> vector<8x512xf32>
    %c1_103 = arith.constant 1 : index
    %c0_104 = arith.constant 0 : index
    %c0_105 = arith.constant 0 : index
    %126 = vector.load %arg2[%c1_103, %c0_104, %c0_105] : memref<9x1x512xf32, #tpu.memory_space<vmem>>, vector<1x1x512xf32>
    %127 = vector.shape_cast %126 : vector<1x1x512xf32> to vector<1x512xf32>
    %128 = vector.broadcast %127 : vector<1x512xf32> to vector<8x512xf32>
    %129 = arith.mulf %125, %128 : vector<8x512xf32>
    %c8_106 = arith.constant 8 : index
    %c0_107 = arith.constant 0 : index
    %130 = vector.load %arg6[%c8_106, %c0_107] : memref<80x512xf32, #tpu.memory_space<vmem>>, vector<8x512xf32>
    tpu.vector_store %arg6[%c8_106, %c0_107], %129 {strides = array<i32>} : memref<80x512xf32, #tpu.memory_space<vmem>>, vector<8x512xf32>,
    %c15_i32_108 = arith.constant 15 : i32
    %131 = tpu.dynamic_rotate %116 by %c15_i32_108 dim 1 : vector<8x512xf32>, i32 -> vector<8x512xf32>
    %c2_109 = arith.constant 2 : index
    %c0_110 = arith.constant 0 : index
    %c0_111 = arith.constant 0 : index
    %132 = vector.load %arg2[%c2_109, %c0_110, %c0_111] : memref<9x1x512xf32, #tpu.memory_space<vmem>>, vector<1x1x512xf32>
    %133 = vector.shape_cast %132 : vector<1x1x512xf32> to vector<1x512xf32>
    %134 = vector.broadcast %133 : vector<1x512xf32> to vector<8x512xf32>
    %135 = arith.mulf %131, %134 : vector<8x512xf32>
    %c16_112 = arith.constant 16 : index
    %c0_113 = arith.constant 0 : index
    %136 = vector.load %arg6[%c16_112, %c0_113] : memref<80x512xf32, #tpu.memory_space<vmem>>, vector<8x512xf32>
    tpu.vector_store %arg6[%c16_112, %c0_113], %135 {strides = array<i32>} : memref<80x512xf32, #tpu.memory_space<vmem>>, vector<8x512xf32>,
    %c1_i32_114 = arith.constant 1 : i32
    %137 = tpu.dynamic_rotate %116 by %c1_i32_114 dim 1 : vector<8x512xf32>, i32 -> vector<8x512xf32>
    %c3_115 = arith.constant 3 : index
    %c0_116 = arith.constant 0 : index
    %c0_117 = arith.constant 0 : index
    %138 = vector.load %arg2[%c3_115, %c0_116, %c0_117] : memref<9x1x512xf32, #tpu.memory_space<vmem>>, vector<1x1x512xf32>
    %139 = vector.shape_cast %138 : vector<1x1x512xf32> to vector<1x512xf32>
    %140 = vector.broadcast %139 : vector<1x512xf32> to vector<8x512xf32>
    %141 = arith.mulf %137, %140 : vector<8x512xf32>
    %c24_118 = arith.constant 24 : index
    %c0_119 = arith.constant 0 : index
    %142 = vector.load %arg6[%c24_118, %c0_119] : memref<80x512xf32, #tpu.memory_space<vmem>>, vector<8x512xf32>
    tpu.vector_store %arg6[%c24_118, %c0_119], %141 {strides = array<i32>} : memref<80x512xf32, #tpu.memory_space<vmem>>, vector<8x512xf32>,
    %c32_120 = arith.constant 32 : index
    %c0_121 = arith.constant 0 : index
    %143 = vector.load %arg6[%c32_120, %c0_121] : memref<80x512xf32, #tpu.memory_space<vmem>>, vector<8x512xf32>
    tpu.vector_store %arg6[%c32_120, %c0_121], %116 {strides = array<i32>} : memref<80x512xf32, #tpu.memory_space<vmem>>, vector<8x512xf32>,
    %c511_i32_122 = arith.constant 511 : i32
    %144 = tpu.dynamic_rotate %116 by %c511_i32_122 dim 1 : vector<8x512xf32>, i32 -> vector<8x512xf32>
    %c5_123 = arith.constant 5 : index
    %c0_124 = arith.constant 0 : index
    %c0_125 = arith.constant 0 : index
    %145 = vector.load %arg2[%c5_123, %c0_124, %c0_125] : memref<9x1x512xf32, #tpu.memory_space<vmem>>, vector<1x1x512xf32>
    %146 = vector.shape_cast %145 : vector<1x1x512xf32> to vector<1x512xf32>
    %147 = vector.broadcast %146 : vector<1x512xf32> to vector<8x512xf32>
    %148 = arith.mulf %144, %147 : vector<8x512xf32>
    %c40_126 = arith.constant 40 : index
    %c0_127 = arith.constant 0 : index
    %149 = vector.load %arg6[%c40_126, %c0_127] : memref<80x512xf32, #tpu.memory_space<vmem>>, vector<8x512xf32>
    tpu.vector_store %arg6[%c40_126, %c0_127], %148 {strides = array<i32>} : memref<80x512xf32, #tpu.memory_space<vmem>>, vector<8x512xf32>,
    %c497_i32_128 = arith.constant 497 : i32
    %150 = tpu.dynamic_rotate %116 by %c497_i32_128 dim 1 : vector<8x512xf32>, i32 -> vector<8x512xf32>
    %c6_129 = arith.constant 6 : index
    %c0_130 = arith.constant 0 : index
    %c0_131 = arith.constant 0 : index
    %151 = vector.load %arg2[%c6_129, %c0_130, %c0_131] : memref<9x1x512xf32, #tpu.memory_space<vmem>>, vector<1x1x512xf32>
    %152 = vector.shape_cast %151 : vector<1x1x512xf32> to vector<1x512xf32>
    %153 = vector.broadcast %152 : vector<1x512xf32> to vector<8x512xf32>
    %154 = arith.mulf %150, %153 : vector<8x512xf32>
    %c48_132 = arith.constant 48 : index
    %c0_133 = arith.constant 0 : index
    %155 = vector.load %arg6[%c48_132, %c0_133] : memref<80x512xf32, #tpu.memory_space<vmem>>, vector<8x512xf32>
    tpu.vector_store %arg6[%c48_132, %c0_133], %154 {strides = array<i32>} : memref<80x512xf32, #tpu.memory_space<vmem>>, vector<8x512xf32>,
    %c496_i32_134 = arith.constant 496 : i32
    %156 = tpu.dynamic_rotate %116 by %c496_i32_134 dim 1 : vector<8x512xf32>, i32 -> vector<8x512xf32>
    %c7_135 = arith.constant 7 : index
    %c0_136 = arith.constant 0 : index
    %c0_137 = arith.constant 0 : index
    %157 = vector.load %arg2[%c7_135, %c0_136, %c0_137] : memref<9x1x512xf32, #tpu.memory_space<vmem>>, vector<1x1x512xf32>
    %158 = vector.shape_cast %157 : vector<1x1x512xf32> to vector<1x512xf32>
    %159 = vector.broadcast %158 : vector<1x512xf32> to vector<8x512xf32>
    %160 = arith.mulf %156, %159 : vector<8x512xf32>
    %c56_138 = arith.constant 56 : index
    %c0_139 = arith.constant 0 : index
    %161 = vector.load %arg6[%c56_138, %c0_139] : memref<80x512xf32, #tpu.memory_space<vmem>>, vector<8x512xf32>
    tpu.vector_store %arg6[%c56_138, %c0_139], %160 {strides = array<i32>} : memref<80x512xf32, #tpu.memory_space<vmem>>, vector<8x512xf32>,
    %c495_i32_140 = arith.constant 495 : i32
    %162 = tpu.dynamic_rotate %116 by %c495_i32_140 dim 1 : vector<8x512xf32>, i32 -> vector<8x512xf32>
    %c8_141 = arith.constant 8 : index
    %c0_142 = arith.constant 0 : index
    %c0_143 = arith.constant 0 : index
    %163 = vector.load %arg2[%c8_141, %c0_142, %c0_143] : memref<9x1x512xf32, #tpu.memory_space<vmem>>, vector<1x1x512xf32>
    %164 = vector.shape_cast %163 : vector<1x1x512xf32> to vector<1x512xf32>
    %165 = vector.broadcast %164 : vector<1x512xf32> to vector<8x512xf32>
    %166 = arith.mulf %162, %165 : vector<8x512xf32>
    %c64_144 = arith.constant 64 : index
    %c0_145 = arith.constant 0 : index
    %167 = vector.load %arg6[%c64_144, %c0_145] : memref<80x512xf32, #tpu.memory_space<vmem>>, vector<8x512xf32>
    tpu.vector_store %arg6[%c64_144, %c0_145], %166 {strides = array<i32>} : memref<80x512xf32, #tpu.memory_space<vmem>>, vector<8x512xf32>,
    %c0_146 = arith.constant 0 : index
    %c0_147 = arith.constant 0 : index
    %168 = vector.load %arg6[%c0_146, %c0_147] : memref<80x512xf32, #tpu.memory_space<vmem>>, vector<80x512xf32>
    %cst_148 = arith.constant dense<0.000000e+00> : vector<8x512xf32>
    %169 = tpu.matmul %118, %168, %cst_148 {dimension_numbers = #tpu.dot_dimension_numbers<[1], [0], [0], [1], [0, 0, 1, 1], [], []>} : vector<8x80xf32>, vector<80x512xf32>, vector<8x512xf32> -> vector<8x512xf32>
    %cst_149 = arith.constant 0.000000e+00 : f32
    %170 = vector.broadcast %cst_149 : f32 to vector<8x512xf32>
    %171 = arith.maximumf %169, %170 : vector<8x512xf32>
    %c3_150 = arith.constant 3 : index
    %c0_151 = arith.constant 0 : index
    %c0_152 = arith.constant 0 : index
    %172 = vector.load %arg3[%c3_150, %c0_151, %c0_152] : memref<8x8x80xf32, #tpu.memory_space<vmem>>, vector<1x8x80xf32>
    %173 = vector.shape_cast %172 : vector<1x8x80xf32> to vector<8x80xf32>
    %c17_i32_153 = arith.constant 17 : i32
    %174 = tpu.dynamic_rotate %171 by %c17_i32_153 dim 1 : vector<8x512xf32>, i32 -> vector<8x512xf32>
    %c0_154 = arith.constant 0 : index
    %c0_155 = arith.constant 0 : index
    %c0_156 = arith.constant 0 : index
    %175 = vector.load %arg2[%c0_154, %c0_155, %c0_156] : memref<9x1x512xf32, #tpu.memory_space<vmem>>, vector<1x1x512xf32>
    %176 = vector.shape_cast %175 : vector<1x1x512xf32> to vector<1x512xf32>
    %177 = vector.broadcast %176 : vector<1x512xf32> to vector<8x512xf32>
    %178 = arith.mulf %174, %177 : vector<8x512xf32>
    %c0_157 = arith.constant 0 : index
    %c0_158 = arith.constant 0 : index
    %179 = vector.load %arg6[%c0_157, %c0_158] : memref<80x512xf32, #tpu.memory_space<vmem>>, vector<8x512xf32>
    tpu.vector_store %arg6[%c0_157, %c0_158], %178 {strides = array<i32>} : memref<80x512xf32, #tpu.memory_space<vmem>>, vector<8x512xf32>,
    %c16_i32_159 = arith.constant 16 : i32
    %180 = tpu.dynamic_rotate %171 by %c16_i32_159 dim 1 : vector<8x512xf32>, i32 -> vector<8x512xf32>
    %c1_160 = arith.constant 1 : index
    %c0_161 = arith.constant 0 : index
    %c0_162 = arith.constant 0 : index
    %181 = vector.load %arg2[%c1_160, %c0_161, %c0_162] : memref<9x1x512xf32, #tpu.memory_space<vmem>>, vector<1x1x512xf32>
    %182 = vector.shape_cast %181 : vector<1x1x512xf32> to vector<1x512xf32>
    %183 = vector.broadcast %182 : vector<1x512xf32> to vector<8x512xf32>
    %184 = arith.mulf %180, %183 : vector<8x512xf32>
    %c8_163 = arith.constant 8 : index
    %c0_164 = arith.constant 0 : index
    %185 = vector.load %arg6[%c8_163, %c0_164] : memref<80x512xf32, #tpu.memory_space<vmem>>, vector<8x512xf32>
    tpu.vector_store %arg6[%c8_163, %c0_164], %184 {strides = array<i32>} : memref<80x512xf32, #tpu.memory_space<vmem>>, vector<8x512xf32>,
    %c15_i32_165 = arith.constant 15 : i32
    %186 = tpu.dynamic_rotate %171 by %c15_i32_165 dim 1 : vector<8x512xf32>, i32 -> vector<8x512xf32>
    %c2_166 = arith.constant 2 : index
    %c0_167 = arith.constant 0 : index
    %c0_168 = arith.constant 0 : index
    %187 = vector.load %arg2[%c2_166, %c0_167, %c0_168] : memref<9x1x512xf32, #tpu.memory_space<vmem>>, vector<1x1x512xf32>
    %188 = vector.shape_cast %187 : vector<1x1x512xf32> to vector<1x512xf32>
    %189 = vector.broadcast %188 : vector<1x512xf32> to vector<8x512xf32>
    %190 = arith.mulf %186, %189 : vector<8x512xf32>
    %c16_169 = arith.constant 16 : index
    %c0_170 = arith.constant 0 : index
    %191 = vector.load %arg6[%c16_169, %c0_170] : memref<80x512xf32, #tpu.memory_space<vmem>>, vector<8x512xf32>
    tpu.vector_store %arg6[%c16_169, %c0_170], %190 {strides = array<i32>} : memref<80x512xf32, #tpu.memory_space<vmem>>, vector<8x512xf32>,
    %c1_i32_171 = arith.constant 1 : i32
    %192 = tpu.dynamic_rotate %171 by %c1_i32_171 dim 1 : vector<8x512xf32>, i32 -> vector<8x512xf32>
    %c3_172 = arith.constant 3 : index
    %c0_173 = arith.constant 0 : index
    %c0_174 = arith.constant 0 : index
    %193 = vector.load %arg2[%c3_172, %c0_173, %c0_174] : memref<9x1x512xf32, #tpu.memory_space<vmem>>, vector<1x1x512xf32>
    %194 = vector.shape_cast %193 : vector<1x1x512xf32> to vector<1x512xf32>
    %195 = vector.broadcast %194 : vector<1x512xf32> to vector<8x512xf32>
    %196 = arith.mulf %192, %195 : vector<8x512xf32>
    %c24_175 = arith.constant 24 : index
    %c0_176 = arith.constant 0 : index
    %197 = vector.load %arg6[%c24_175, %c0_176] : memref<80x512xf32, #tpu.memory_space<vmem>>, vector<8x512xf32>
    tpu.vector_store %arg6[%c24_175, %c0_176], %196 {strides = array<i32>} : memref<80x512xf32, #tpu.memory_space<vmem>>, vector<8x512xf32>,
    %c32_177 = arith.constant 32 : index
    %c0_178 = arith.constant 0 : index
    %198 = vector.load %arg6[%c32_177, %c0_178] : memref<80x512xf32, #tpu.memory_space<vmem>>, vector<8x512xf32>
    tpu.vector_store %arg6[%c32_177, %c0_178], %171 {strides = array<i32>} : memref<80x512xf32, #tpu.memory_space<vmem>>, vector<8x512xf32>,
    %c511_i32_179 = arith.constant 511 : i32
    %199 = tpu.dynamic_rotate %171 by %c511_i32_179 dim 1 : vector<8x512xf32>, i32 -> vector<8x512xf32>
    %c5_180 = arith.constant 5 : index
    %c0_181 = arith.constant 0 : index
    %c0_182 = arith.constant 0 : index
    %200 = vector.load %arg2[%c5_180, %c0_181, %c0_182] : memref<9x1x512xf32, #tpu.memory_space<vmem>>, vector<1x1x512xf32>
    %201 = vector.shape_cast %200 : vector<1x1x512xf32> to vector<1x512xf32>
    %202 = vector.broadcast %201 : vector<1x512xf32> to vector<8x512xf32>
    %203 = arith.mulf %199, %202 : vector<8x512xf32>
    %c40_183 = arith.constant 40 : index
    %c0_184 = arith.constant 0 : index
    %204 = vector.load %arg6[%c40_183, %c0_184] : memref<80x512xf32, #tpu.memory_space<vmem>>, vector<8x512xf32>
    tpu.vector_store %arg6[%c40_183, %c0_184], %203 {strides = array<i32>} : memref<80x512xf32, #tpu.memory_space<vmem>>, vector<8x512xf32>,
    %c497_i32_185 = arith.constant 497 : i32
    %205 = tpu.dynamic_rotate %171 by %c497_i32_185 dim 1 : vector<8x512xf32>, i32 -> vector<8x512xf32>
    %c6_186 = arith.constant 6 : index
    %c0_187 = arith.constant 0 : index
    %c0_188 = arith.constant 0 : index
    %206 = vector.load %arg2[%c6_186, %c0_187, %c0_188] : memref<9x1x512xf32, #tpu.memory_space<vmem>>, vector<1x1x512xf32>
    %207 = vector.shape_cast %206 : vector<1x1x512xf32> to vector<1x512xf32>
    %208 = vector.broadcast %207 : vector<1x512xf32> to vector<8x512xf32>
    %209 = arith.mulf %205, %208 : vector<8x512xf32>
    %c48_189 = arith.constant 48 : index
    %c0_190 = arith.constant 0 : index
    %210 = vector.load %arg6[%c48_189, %c0_190] : memref<80x512xf32, #tpu.memory_space<vmem>>, vector<8x512xf32>
    tpu.vector_store %arg6[%c48_189, %c0_190], %209 {strides = array<i32>} : memref<80x512xf32, #tpu.memory_space<vmem>>, vector<8x512xf32>,
    %c496_i32_191 = arith.constant 496 : i32
    %211 = tpu.dynamic_rotate %171 by %c496_i32_191 dim 1 : vector<8x512xf32>, i32 -> vector<8x512xf32>
    %c7_192 = arith.constant 7 : index
    %c0_193 = arith.constant 0 : index
    %c0_194 = arith.constant 0 : index
    %212 = vector.load %arg2[%c7_192, %c0_193, %c0_194] : memref<9x1x512xf32, #tpu.memory_space<vmem>>, vector<1x1x512xf32>
    %213 = vector.shape_cast %212 : vector<1x1x512xf32> to vector<1x512xf32>
    %214 = vector.broadcast %213 : vector<1x512xf32> to vector<8x512xf32>
    %215 = arith.mulf %211, %214 : vector<8x512xf32>
    %c56_195 = arith.constant 56 : index
    %c0_196 = arith.constant 0 : index
    %216 = vector.load %arg6[%c56_195, %c0_196] : memref<80x512xf32, #tpu.memory_space<vmem>>, vector<8x512xf32>
    tpu.vector_store %arg6[%c56_195, %c0_196], %215 {strides = array<i32>} : memref<80x512xf32, #tpu.memory_space<vmem>>, vector<8x512xf32>,
    %c495_i32_197 = arith.constant 495 : i32
    %217 = tpu.dynamic_rotate %171 by %c495_i32_197 dim 1 : vector<8x512xf32>, i32 -> vector<8x512xf32>
    %c8_198 = arith.constant 8 : index
    %c0_199 = arith.constant 0 : index
    %c0_200 = arith.constant 0 : index
    %218 = vector.load %arg2[%c8_198, %c0_199, %c0_200] : memref<9x1x512xf32, #tpu.memory_space<vmem>>, vector<1x1x512xf32>
    %219 = vector.shape_cast %218 : vector<1x1x512xf32> to vector<1x512xf32>
    %220 = vector.broadcast %219 : vector<1x512xf32> to vector<8x512xf32>
    %221 = arith.mulf %217, %220 : vector<8x512xf32>
    %c64_201 = arith.constant 64 : index
    %c0_202 = arith.constant 0 : index
    %222 = vector.load %arg6[%c64_201, %c0_202] : memref<80x512xf32, #tpu.memory_space<vmem>>, vector<8x512xf32>
    tpu.vector_store %arg6[%c64_201, %c0_202], %221 {strides = array<i32>} : memref<80x512xf32, #tpu.memory_space<vmem>>, vector<8x512xf32>,
    %c0_203 = arith.constant 0 : index
    %c0_204 = arith.constant 0 : index
    %223 = vector.load %arg6[%c0_203, %c0_204] : memref<80x512xf32, #tpu.memory_space<vmem>>, vector<80x512xf32>
    %cst_205 = arith.constant dense<0.000000e+00> : vector<8x512xf32>
    %224 = tpu.matmul %173, %223, %cst_205 {dimension_numbers = #tpu.dot_dimension_numbers<[1], [0], [0], [1], [0, 0, 1, 1], [], []>} : vector<8x80xf32>, vector<80x512xf32>, vector<8x512xf32> -> vector<8x512xf32>
    %225 = arith.addf %116, %224 : vector<8x512xf32>
    %c4 = arith.constant 4 : index
    %c0_206 = arith.constant 0 : index
    %c0_207 = arith.constant 0 : index
    %226 = vector.load %arg3[%c4, %c0_206, %c0_207] : memref<8x8x80xf32, #tpu.memory_space<vmem>>, vector<1x8x80xf32>
    %227 = vector.shape_cast %226 : vector<1x8x80xf32> to vector<8x80xf32>
    %c17_i32_208 = arith.constant 17 : i32
    %228 = tpu.dynamic_rotate %225 by %c17_i32_208 dim 1 : vector<8x512xf32>, i32 -> vector<8x512xf32>
    %c0_209 = arith.constant 0 : index
    %c0_210 = arith.constant 0 : index
    %c0_211 = arith.constant 0 : index
    %229 = vector.load %arg2[%c0_209, %c0_210, %c0_211] : memref<9x1x512xf32, #tpu.memory_space<vmem>>, vector<1x1x512xf32>
    %230 = vector.shape_cast %229 : vector<1x1x512xf32> to vector<1x512xf32>
    %231 = vector.broadcast %230 : vector<1x512xf32> to vector<8x512xf32>
    %232 = arith.mulf %228, %231 : vector<8x512xf32>
    %c0_212 = arith.constant 0 : index
    %c0_213 = arith.constant 0 : index
    %233 = vector.load %arg6[%c0_212, %c0_213] : memref<80x512xf32, #tpu.memory_space<vmem>>, vector<8x512xf32>
    tpu.vector_store %arg6[%c0_212, %c0_213], %232 {strides = array<i32>} : memref<80x512xf32, #tpu.memory_space<vmem>>, vector<8x512xf32>,
    %c16_i32_214 = arith.constant 16 : i32
    %234 = tpu.dynamic_rotate %225 by %c16_i32_214 dim 1 : vector<8x512xf32>, i32 -> vector<8x512xf32>
    %c1_215 = arith.constant 1 : index
    %c0_216 = arith.constant 0 : index
    %c0_217 = arith.constant 0 : index
    %235 = vector.load %arg2[%c1_215, %c0_216, %c0_217] : memref<9x1x512xf32, #tpu.memory_space<vmem>>, vector<1x1x512xf32>
    %236 = vector.shape_cast %235 : vector<1x1x512xf32> to vector<1x512xf32>
    %237 = vector.broadcast %236 : vector<1x512xf32> to vector<8x512xf32>
    %238 = arith.mulf %234, %237 : vector<8x512xf32>
    %c8_218 = arith.constant 8 : index
    %c0_219 = arith.constant 0 : index
    %239 = vector.load %arg6[%c8_218, %c0_219] : memref<80x512xf32, #tpu.memory_space<vmem>>, vector<8x512xf32>
    tpu.vector_store %arg6[%c8_218, %c0_219], %238 {strides = array<i32>} : memref<80x512xf32, #tpu.memory_space<vmem>>, vector<8x512xf32>,
    %c15_i32_220 = arith.constant 15 : i32
    %240 = tpu.dynamic_rotate %225 by %c15_i32_220 dim 1 : vector<8x512xf32>, i32 -> vector<8x512xf32>
    %c2_221 = arith.constant 2 : index
    %c0_222 = arith.constant 0 : index
    %c0_223 = arith.constant 0 : index
    %241 = vector.load %arg2[%c2_221, %c0_222, %c0_223] : memref<9x1x512xf32, #tpu.memory_space<vmem>>, vector<1x1x512xf32>
    %242 = vector.shape_cast %241 : vector<1x1x512xf32> to vector<1x512xf32>
    %243 = vector.broadcast %242 : vector<1x512xf32> to vector<8x512xf32>
    %244 = arith.mulf %240, %243 : vector<8x512xf32>
    %c16_224 = arith.constant 16 : index
    %c0_225 = arith.constant 0 : index
    %245 = vector.load %arg6[%c16_224, %c0_225] : memref<80x512xf32, #tpu.memory_space<vmem>>, vector<8x512xf32>
    tpu.vector_store %arg6[%c16_224, %c0_225], %244 {strides = array<i32>} : memref<80x512xf32, #tpu.memory_space<vmem>>, vector<8x512xf32>,
    %c1_i32_226 = arith.constant 1 : i32
    %246 = tpu.dynamic_rotate %225 by %c1_i32_226 dim 1 : vector<8x512xf32>, i32 -> vector<8x512xf32>
    %c3_227 = arith.constant 3 : index
    %c0_228 = arith.constant 0 : index
    %c0_229 = arith.constant 0 : index
    %247 = vector.load %arg2[%c3_227, %c0_228, %c0_229] : memref<9x1x512xf32, #tpu.memory_space<vmem>>, vector<1x1x512xf32>
    %248 = vector.shape_cast %247 : vector<1x1x512xf32> to vector<1x512xf32>
    %249 = vector.broadcast %248 : vector<1x512xf32> to vector<8x512xf32>
    %250 = arith.mulf %246, %249 : vector<8x512xf32>
    %c24_230 = arith.constant 24 : index
    %c0_231 = arith.constant 0 : index
    %251 = vector.load %arg6[%c24_230, %c0_231] : memref<80x512xf32, #tpu.memory_space<vmem>>, vector<8x512xf32>
    tpu.vector_store %arg6[%c24_230, %c0_231], %250 {strides = array<i32>} : memref<80x512xf32, #tpu.memory_space<vmem>>, vector<8x512xf32>,
    %c32_232 = arith.constant 32 : index
    %c0_233 = arith.constant 0 : index
    %252 = vector.load %arg6[%c32_232, %c0_233] : memref<80x512xf32, #tpu.memory_space<vmem>>, vector<8x512xf32>
    tpu.vector_store %arg6[%c32_232, %c0_233], %225 {strides = array<i32>} : memref<80x512xf32, #tpu.memory_space<vmem>>, vector<8x512xf32>,
    %c511_i32_234 = arith.constant 511 : i32
    %253 = tpu.dynamic_rotate %225 by %c511_i32_234 dim 1 : vector<8x512xf32>, i32 -> vector<8x512xf32>
    %c5_235 = arith.constant 5 : index
    %c0_236 = arith.constant 0 : index
    %c0_237 = arith.constant 0 : index
    %254 = vector.load %arg2[%c5_235, %c0_236, %c0_237] : memref<9x1x512xf32, #tpu.memory_space<vmem>>, vector<1x1x512xf32>
    %255 = vector.shape_cast %254 : vector<1x1x512xf32> to vector<1x512xf32>
    %256 = vector.broadcast %255 : vector<1x512xf32> to vector<8x512xf32>
    %257 = arith.mulf %253, %256 : vector<8x512xf32>
    %c40_238 = arith.constant 40 : index
    %c0_239 = arith.constant 0 : index
    %258 = vector.load %arg6[%c40_238, %c0_239] : memref<80x512xf32, #tpu.memory_space<vmem>>, vector<8x512xf32>
    tpu.vector_store %arg6[%c40_238, %c0_239], %257 {strides = array<i32>} : memref<80x512xf32, #tpu.memory_space<vmem>>, vector<8x512xf32>,
    %c497_i32_240 = arith.constant 497 : i32
    %259 = tpu.dynamic_rotate %225 by %c497_i32_240 dim 1 : vector<8x512xf32>, i32 -> vector<8x512xf32>
    %c6_241 = arith.constant 6 : index
    %c0_242 = arith.constant 0 : index
    %c0_243 = arith.constant 0 : index
    %260 = vector.load %arg2[%c6_241, %c0_242, %c0_243] : memref<9x1x512xf32, #tpu.memory_space<vmem>>, vector<1x1x512xf32>
    %261 = vector.shape_cast %260 : vector<1x1x512xf32> to vector<1x512xf32>
    %262 = vector.broadcast %261 : vector<1x512xf32> to vector<8x512xf32>
    %263 = arith.mulf %259, %262 : vector<8x512xf32>
    %c48_244 = arith.constant 48 : index
    %c0_245 = arith.constant 0 : index
    %264 = vector.load %arg6[%c48_244, %c0_245] : memref<80x512xf32, #tpu.memory_space<vmem>>, vector<8x512xf32>
    tpu.vector_store %arg6[%c48_244, %c0_245], %263 {strides = array<i32>} : memref<80x512xf32, #tpu.memory_space<vmem>>, vector<8x512xf32>,
    %c496_i32_246 = arith.constant 496 : i32
    %265 = tpu.dynamic_rotate %225 by %c496_i32_246 dim 1 : vector<8x512xf32>, i32 -> vector<8x512xf32>
    %c7_247 = arith.constant 7 : index
    %c0_248 = arith.constant 0 : index
    %c0_249 = arith.constant 0 : index
    %266 = vector.load %arg2[%c7_247, %c0_248, %c0_249] : memref<9x1x512xf32, #tpu.memory_space<vmem>>, vector<1x1x512xf32>
    %267 = vector.shape_cast %266 : vector<1x1x512xf32> to vector<1x512xf32>
    %268 = vector.broadcast %267 : vector<1x512xf32> to vector<8x512xf32>
    %269 = arith.mulf %265, %268 : vector<8x512xf32>
    %c56_250 = arith.constant 56 : index
    %c0_251 = arith.constant 0 : index
    %270 = vector.load %arg6[%c56_250, %c0_251] : memref<80x512xf32, #tpu.memory_space<vmem>>, vector<8x512xf32>
    tpu.vector_store %arg6[%c56_250, %c0_251], %269 {strides = array<i32>} : memref<80x512xf32, #tpu.memory_space<vmem>>, vector<8x512xf32>,
    %c495_i32_252 = arith.constant 495 : i32
    %271 = tpu.dynamic_rotate %225 by %c495_i32_252 dim 1 : vector<8x512xf32>, i32 -> vector<8x512xf32>
    %c8_253 = arith.constant 8 : index
    %c0_254 = arith.constant 0 : index
    %c0_255 = arith.constant 0 : index
    %272 = vector.load %arg2[%c8_253, %c0_254, %c0_255] : memref<9x1x512xf32, #tpu.memory_space<vmem>>, vector<1x1x512xf32>
    %273 = vector.shape_cast %272 : vector<1x1x512xf32> to vector<1x512xf32>
    %274 = vector.broadcast %273 : vector<1x512xf32> to vector<8x512xf32>
    %275 = arith.mulf %271, %274 : vector<8x512xf32>
    %c64_256 = arith.constant 64 : index
    %c0_257 = arith.constant 0 : index
    %276 = vector.load %arg6[%c64_256, %c0_257] : memref<80x512xf32, #tpu.memory_space<vmem>>, vector<8x512xf32>
    tpu.vector_store %arg6[%c64_256, %c0_257], %275 {strides = array<i32>} : memref<80x512xf32, #tpu.memory_space<vmem>>, vector<8x512xf32>,
    %c0_258 = arith.constant 0 : index
    %c0_259 = arith.constant 0 : index
    %277 = vector.load %arg6[%c0_258, %c0_259] : memref<80x512xf32, #tpu.memory_space<vmem>>, vector<80x512xf32>
    %cst_260 = arith.constant dense<0.000000e+00> : vector<8x512xf32>
    %278 = tpu.matmul %227, %277, %cst_260 {dimension_numbers = #tpu.dot_dimension_numbers<[1], [0], [0], [1], [0, 0, 1, 1], [], []>} : vector<8x80xf32>, vector<80x512xf32>, vector<8x512xf32> -> vector<8x512xf32>
    %cst_261 = arith.constant 0.000000e+00 : f32
    %279 = vector.broadcast %cst_261 : f32 to vector<8x512xf32>
    %280 = arith.maximumf %278, %279 : vector<8x512xf32>
    %c5_262 = arith.constant 5 : index
    %c0_263 = arith.constant 0 : index
    %c0_264 = arith.constant 0 : index
    %281 = vector.load %arg3[%c5_262, %c0_263, %c0_264] : memref<8x8x80xf32, #tpu.memory_space<vmem>>, vector<1x8x80xf32>
    %282 = vector.shape_cast %281 : vector<1x8x80xf32> to vector<8x80xf32>
    %c17_i32_265 = arith.constant 17 : i32
    %283 = tpu.dynamic_rotate %280 by %c17_i32_265 dim 1 : vector<8x512xf32>, i32 -> vector<8x512xf32>
    %c0_266 = arith.constant 0 : index
    %c0_267 = arith.constant 0 : index
    %c0_268 = arith.constant 0 : index
    %284 = vector.load %arg2[%c0_266, %c0_267, %c0_268] : memref<9x1x512xf32, #tpu.memory_space<vmem>>, vector<1x1x512xf32>
    %285 = vector.shape_cast %284 : vector<1x1x512xf32> to vector<1x512xf32>
    %286 = vector.broadcast %285 : vector<1x512xf32> to vector<8x512xf32>
    %287 = arith.mulf %283, %286 : vector<8x512xf32>
    %c0_269 = arith.constant 0 : index
    %c0_270 = arith.constant 0 : index
    %288 = vector.load %arg6[%c0_269, %c0_270] : memref<80x512xf32, #tpu.memory_space<vmem>>, vector<8x512xf32>
    tpu.vector_store %arg6[%c0_269, %c0_270], %287 {strides = array<i32>} : memref<80x512xf32, #tpu.memory_space<vmem>>, vector<8x512xf32>,
    %c16_i32_271 = arith.constant 16 : i32
    %289 = tpu.dynamic_rotate %280 by %c16_i32_271 dim 1 : vector<8x512xf32>, i32 -> vector<8x512xf32>
    %c1_272 = arith.constant 1 : index
    %c0_273 = arith.constant 0 : index
    %c0_274 = arith.constant 0 : index
    %290 = vector.load %arg2[%c1_272, %c0_273, %c0_274] : memref<9x1x512xf32, #tpu.memory_space<vmem>>, vector<1x1x512xf32>
    %291 = vector.shape_cast %290 : vector<1x1x512xf32> to vector<1x512xf32>
    %292 = vector.broadcast %291 : vector<1x512xf32> to vector<8x512xf32>
    %293 = arith.mulf %289, %292 : vector<8x512xf32>
    %c8_275 = arith.constant 8 : index
    %c0_276 = arith.constant 0 : index
    %294 = vector.load %arg6[%c8_275, %c0_276] : memref<80x512xf32, #tpu.memory_space<vmem>>, vector<8x512xf32>
    tpu.vector_store %arg6[%c8_275, %c0_276], %293 {strides = array<i32>} : memref<80x512xf32, #tpu.memory_space<vmem>>, vector<8x512xf32>,
    %c15_i32_277 = arith.constant 15 : i32
    %295 = tpu.dynamic_rotate %280 by %c15_i32_277 dim 1 : vector<8x512xf32>, i32 -> vector<8x512xf32>
    %c2_278 = arith.constant 2 : index
    %c0_279 = arith.constant 0 : index
    %c0_280 = arith.constant 0 : index
    %296 = vector.load %arg2[%c2_278, %c0_279, %c0_280] : memref<9x1x512xf32, #tpu.memory_space<vmem>>, vector<1x1x512xf32>
    %297 = vector.shape_cast %296 : vector<1x1x512xf32> to vector<1x512xf32>
    %298 = vector.broadcast %297 : vector<1x512xf32> to vector<8x512xf32>
    %299 = arith.mulf %295, %298 : vector<8x512xf32>
    %c16_281 = arith.constant 16 : index
    %c0_282 = arith.constant 0 : index
    %300 = vector.load %arg6[%c16_281, %c0_282] : memref<80x512xf32, #tpu.memory_space<vmem>>, vector<8x512xf32>
    tpu.vector_store %arg6[%c16_281, %c0_282], %299 {strides = array<i32>} : memref<80x512xf32, #tpu.memory_space<vmem>>, vector<8x512xf32>,
    %c1_i32_283 = arith.constant 1 : i32
    %301 = tpu.dynamic_rotate %280 by %c1_i32_283 dim 1 : vector<8x512xf32>, i32 -> vector<8x512xf32>
    %c3_284 = arith.constant 3 : index
    %c0_285 = arith.constant 0 : index
    %c0_286 = arith.constant 0 : index
    %302 = vector.load %arg2[%c3_284, %c0_285, %c0_286] : memref<9x1x512xf32, #tpu.memory_space<vmem>>, vector<1x1x512xf32>
    %303 = vector.shape_cast %302 : vector<1x1x512xf32> to vector<1x512xf32>
    %304 = vector.broadcast %303 : vector<1x512xf32> to vector<8x512xf32>
    %305 = arith.mulf %301, %304 : vector<8x512xf32>
    %c24_287 = arith.constant 24 : index
    %c0_288 = arith.constant 0 : index
    %306 = vector.load %arg6[%c24_287, %c0_288] : memref<80x512xf32, #tpu.memory_space<vmem>>, vector<8x512xf32>
    tpu.vector_store %arg6[%c24_287, %c0_288], %305 {strides = array<i32>} : memref<80x512xf32, #tpu.memory_space<vmem>>, vector<8x512xf32>,
    %c32_289 = arith.constant 32 : index
    %c0_290 = arith.constant 0 : index
    %307 = vector.load %arg6[%c32_289, %c0_290] : memref<80x512xf32, #tpu.memory_space<vmem>>, vector<8x512xf32>
    tpu.vector_store %arg6[%c32_289, %c0_290], %280 {strides = array<i32>} : memref<80x512xf32, #tpu.memory_space<vmem>>, vector<8x512xf32>,
    %c511_i32_291 = arith.constant 511 : i32
    %308 = tpu.dynamic_rotate %280 by %c511_i32_291 dim 1 : vector<8x512xf32>, i32 -> vector<8x512xf32>
    %c5_292 = arith.constant 5 : index
    %c0_293 = arith.constant 0 : index
    %c0_294 = arith.constant 0 : index
    %309 = vector.load %arg2[%c5_292, %c0_293, %c0_294] : memref<9x1x512xf32, #tpu.memory_space<vmem>>, vector<1x1x512xf32>
    %310 = vector.shape_cast %309 : vector<1x1x512xf32> to vector<1x512xf32>
    %311 = vector.broadcast %310 : vector<1x512xf32> to vector<8x512xf32>
    %312 = arith.mulf %308, %311 : vector<8x512xf32>
    %c40_295 = arith.constant 40 : index
    %c0_296 = arith.constant 0 : index
    %313 = vector.load %arg6[%c40_295, %c0_296] : memref<80x512xf32, #tpu.memory_space<vmem>>, vector<8x512xf32>
    tpu.vector_store %arg6[%c40_295, %c0_296], %312 {strides = array<i32>} : memref<80x512xf32, #tpu.memory_space<vmem>>, vector<8x512xf32>,
    %c497_i32_297 = arith.constant 497 : i32
    %314 = tpu.dynamic_rotate %280 by %c497_i32_297 dim 1 : vector<8x512xf32>, i32 -> vector<8x512xf32>
    %c6_298 = arith.constant 6 : index
    %c0_299 = arith.constant 0 : index
    %c0_300 = arith.constant 0 : index
    %315 = vector.load %arg2[%c6_298, %c0_299, %c0_300] : memref<9x1x512xf32, #tpu.memory_space<vmem>>, vector<1x1x512xf32>
    %316 = vector.shape_cast %315 : vector<1x1x512xf32> to vector<1x512xf32>
    %317 = vector.broadcast %316 : vector<1x512xf32> to vector<8x512xf32>
    %318 = arith.mulf %314, %317 : vector<8x512xf32>
    %c48_301 = arith.constant 48 : index
    %c0_302 = arith.constant 0 : index
    %319 = vector.load %arg6[%c48_301, %c0_302] : memref<80x512xf32, #tpu.memory_space<vmem>>, vector<8x512xf32>
    tpu.vector_store %arg6[%c48_301, %c0_302], %318 {strides = array<i32>} : memref<80x512xf32, #tpu.memory_space<vmem>>, vector<8x512xf32>,
    %c496_i32_303 = arith.constant 496 : i32
    %320 = tpu.dynamic_rotate %280 by %c496_i32_303 dim 1 : vector<8x512xf32>, i32 -> vector<8x512xf32>
    %c7_304 = arith.constant 7 : index
    %c0_305 = arith.constant 0 : index
    %c0_306 = arith.constant 0 : index
    %321 = vector.load %arg2[%c7_304, %c0_305, %c0_306] : memref<9x1x512xf32, #tpu.memory_space<vmem>>, vector<1x1x512xf32>
    %322 = vector.shape_cast %321 : vector<1x1x512xf32> to vector<1x512xf32>
    %323 = vector.broadcast %322 : vector<1x512xf32> to vector<8x512xf32>
    %324 = arith.mulf %320, %323 : vector<8x512xf32>
    %c56_307 = arith.constant 56 : index
    %c0_308 = arith.constant 0 : index
    %325 = vector.load %arg6[%c56_307, %c0_308] : memref<80x512xf32, #tpu.memory_space<vmem>>, vector<8x512xf32>
    tpu.vector_store %arg6[%c56_307, %c0_308], %324 {strides = array<i32>} : memref<80x512xf32, #tpu.memory_space<vmem>>, vector<8x512xf32>,
    %c495_i32_309 = arith.constant 495 : i32
    %326 = tpu.dynamic_rotate %280 by %c495_i32_309 dim 1 : vector<8x512xf32>, i32 -> vector<8x512xf32>
    %c8_310 = arith.constant 8 : index
    %c0_311 = arith.constant 0 : index
    %c0_312 = arith.constant 0 : index
    %327 = vector.load %arg2[%c8_310, %c0_311, %c0_312] : memref<9x1x512xf32, #tpu.memory_space<vmem>>, vector<1x1x512xf32>
    %328 = vector.shape_cast %327 : vector<1x1x512xf32> to vector<1x512xf32>
    %329 = vector.broadcast %328 : vector<1x512xf32> to vector<8x512xf32>
    %330 = arith.mulf %326, %329 : vector<8x512xf32>
    %c64_313 = arith.constant 64 : index
    %c0_314 = arith.constant 0 : index
    %331 = vector.load %arg6[%c64_313, %c0_314] : memref<80x512xf32, #tpu.memory_space<vmem>>, vector<8x512xf32>
    tpu.vector_store %arg6[%c64_313, %c0_314], %330 {strides = array<i32>} : memref<80x512xf32, #tpu.memory_space<vmem>>, vector<8x512xf32>,
    %c0_315 = arith.constant 0 : index
    %c0_316 = arith.constant 0 : index
    %332 = vector.load %arg6[%c0_315, %c0_316] : memref<80x512xf32, #tpu.memory_space<vmem>>, vector<80x512xf32>
    %cst_317 = arith.constant dense<0.000000e+00> : vector<8x512xf32>
    %333 = tpu.matmul %282, %332, %cst_317 {dimension_numbers = #tpu.dot_dimension_numbers<[1], [0], [0], [1], [0, 0, 1, 1], [], []>} : vector<8x80xf32>, vector<80x512xf32>, vector<8x512xf32> -> vector<8x512xf32>
    %334 = arith.addf %225, %333 : vector<8x512xf32>
    %c6_318 = arith.constant 6 : index
    %c0_319 = arith.constant 0 : index
    %c0_320 = arith.constant 0 : index
    %335 = vector.load %arg3[%c6_318, %c0_319, %c0_320] : memref<8x8x80xf32, #tpu.memory_space<vmem>>, vector<1x8x80xf32>
    %336 = vector.shape_cast %335 : vector<1x8x80xf32> to vector<8x80xf32>
    %c17_i32_321 = arith.constant 17 : i32
    %337 = tpu.dynamic_rotate %334 by %c17_i32_321 dim 1 : vector<8x512xf32>, i32 -> vector<8x512xf32>
    %c0_322 = arith.constant 0 : index
    %c0_323 = arith.constant 0 : index
    %c0_324 = arith.constant 0 : index
    %338 = vector.load %arg2[%c0_322, %c0_323, %c0_324] : memref<9x1x512xf32, #tpu.memory_space<vmem>>, vector<1x1x512xf32>
    %339 = vector.shape_cast %338 : vector<1x1x512xf32> to vector<1x512xf32>
    %340 = vector.broadcast %339 : vector<1x512xf32> to vector<8x512xf32>
    %341 = arith.mulf %337, %340 : vector<8x512xf32>
    %c0_325 = arith.constant 0 : index
    %c0_326 = arith.constant 0 : index
    %342 = vector.load %arg6[%c0_325, %c0_326] : memref<80x512xf32, #tpu.memory_space<vmem>>, vector<8x512xf32>
    tpu.vector_store %arg6[%c0_325, %c0_326], %341 {strides = array<i32>} : memref<80x512xf32, #tpu.memory_space<vmem>>, vector<8x512xf32>,
    %c16_i32_327 = arith.constant 16 : i32
    %343 = tpu.dynamic_rotate %334 by %c16_i32_327 dim 1 : vector<8x512xf32>, i32 -> vector<8x512xf32>
    %c1_328 = arith.constant 1 : index
    %c0_329 = arith.constant 0 : index
    %c0_330 = arith.constant 0 : index
    %344 = vector.load %arg2[%c1_328, %c0_329, %c0_330] : memref<9x1x512xf32, #tpu.memory_space<vmem>>, vector<1x1x512xf32>
    %345 = vector.shape_cast %344 : vector<1x1x512xf32> to vector<1x512xf32>
    %346 = vector.broadcast %345 : vector<1x512xf32> to vector<8x512xf32>
    %347 = arith.mulf %343, %346 : vector<8x512xf32>
    %c8_331 = arith.constant 8 : index
    %c0_332 = arith.constant 0 : index
    %348 = vector.load %arg6[%c8_331, %c0_332] : memref<80x512xf32, #tpu.memory_space<vmem>>, vector<8x512xf32>
    tpu.vector_store %arg6[%c8_331, %c0_332], %347 {strides = array<i32>} : memref<80x512xf32, #tpu.memory_space<vmem>>, vector<8x512xf32>,
    %c15_i32_333 = arith.constant 15 : i32
    %349 = tpu.dynamic_rotate %334 by %c15_i32_333 dim 1 : vector<8x512xf32>, i32 -> vector<8x512xf32>
    %c2_334 = arith.constant 2 : index
    %c0_335 = arith.constant 0 : index
    %c0_336 = arith.constant 0 : index
    %350 = vector.load %arg2[%c2_334, %c0_335, %c0_336] : memref<9x1x512xf32, #tpu.memory_space<vmem>>, vector<1x1x512xf32>
    %351 = vector.shape_cast %350 : vector<1x1x512xf32> to vector<1x512xf32>
    %352 = vector.broadcast %351 : vector<1x512xf32> to vector<8x512xf32>
    %353 = arith.mulf %349, %352 : vector<8x512xf32>
    %c16_337 = arith.constant 16 : index
    %c0_338 = arith.constant 0 : index
    %354 = vector.load %arg6[%c16_337, %c0_338] : memref<80x512xf32, #tpu.memory_space<vmem>>, vector<8x512xf32>
    tpu.vector_store %arg6[%c16_337, %c0_338], %353 {strides = array<i32>} : memref<80x512xf32, #tpu.memory_space<vmem>>, vector<8x512xf32>,
    %c1_i32_339 = arith.constant 1 : i32
    %355 = tpu.dynamic_rotate %334 by %c1_i32_339 dim 1 : vector<8x512xf32>, i32 -> vector<8x512xf32>
    %c3_340 = arith.constant 3 : index
    %c0_341 = arith.constant 0 : index
    %c0_342 = arith.constant 0 : index
    %356 = vector.load %arg2[%c3_340, %c0_341, %c0_342] : memref<9x1x512xf32, #tpu.memory_space<vmem>>, vector<1x1x512xf32>
    %357 = vector.shape_cast %356 : vector<1x1x512xf32> to vector<1x512xf32>
    %358 = vector.broadcast %357 : vector<1x512xf32> to vector<8x512xf32>
    %359 = arith.mulf %355, %358 : vector<8x512xf32>
    %c24_343 = arith.constant 24 : index
    %c0_344 = arith.constant 0 : index
    %360 = vector.load %arg6[%c24_343, %c0_344] : memref<80x512xf32, #tpu.memory_space<vmem>>, vector<8x512xf32>
    tpu.vector_store %arg6[%c24_343, %c0_344], %359 {strides = array<i32>} : memref<80x512xf32, #tpu.memory_space<vmem>>, vector<8x512xf32>,
    %c32_345 = arith.constant 32 : index
    %c0_346 = arith.constant 0 : index
    %361 = vector.load %arg6[%c32_345, %c0_346] : memref<80x512xf32, #tpu.memory_space<vmem>>, vector<8x512xf32>
    tpu.vector_store %arg6[%c32_345, %c0_346], %334 {strides = array<i32>} : memref<80x512xf32, #tpu.memory_space<vmem>>, vector<8x512xf32>,
    %c511_i32_347 = arith.constant 511 : i32
    %362 = tpu.dynamic_rotate %334 by %c511_i32_347 dim 1 : vector<8x512xf32>, i32 -> vector<8x512xf32>
    %c5_348 = arith.constant 5 : index
    %c0_349 = arith.constant 0 : index
    %c0_350 = arith.constant 0 : index
    %363 = vector.load %arg2[%c5_348, %c0_349, %c0_350] : memref<9x1x512xf32, #tpu.memory_space<vmem>>, vector<1x1x512xf32>
    %364 = vector.shape_cast %363 : vector<1x1x512xf32> to vector<1x512xf32>
    %365 = vector.broadcast %364 : vector<1x512xf32> to vector<8x512xf32>
    %366 = arith.mulf %362, %365 : vector<8x512xf32>
    %c40_351 = arith.constant 40 : index
    %c0_352 = arith.constant 0 : index
    %367 = vector.load %arg6[%c40_351, %c0_352] : memref<80x512xf32, #tpu.memory_space<vmem>>, vector<8x512xf32>
    tpu.vector_store %arg6[%c40_351, %c0_352], %366 {strides = array<i32>} : memref<80x512xf32, #tpu.memory_space<vmem>>, vector<8x512xf32>,
    %c497_i32_353 = arith.constant 497 : i32
    %368 = tpu.dynamic_rotate %334 by %c497_i32_353 dim 1 : vector<8x512xf32>, i32 -> vector<8x512xf32>
    %c6_354 = arith.constant 6 : index
    %c0_355 = arith.constant 0 : index
    %c0_356 = arith.constant 0 : index
    %369 = vector.load %arg2[%c6_354, %c0_355, %c0_356] : memref<9x1x512xf32, #tpu.memory_space<vmem>>, vector<1x1x512xf32>
    %370 = vector.shape_cast %369 : vector<1x1x512xf32> to vector<1x512xf32>
    %371 = vector.broadcast %370 : vector<1x512xf32> to vector<8x512xf32>
    %372 = arith.mulf %368, %371 : vector<8x512xf32>
    %c48_357 = arith.constant 48 : index
    %c0_358 = arith.constant 0 : index
    %373 = vector.load %arg6[%c48_357, %c0_358] : memref<80x512xf32, #tpu.memory_space<vmem>>, vector<8x512xf32>
    tpu.vector_store %arg6[%c48_357, %c0_358], %372 {strides = array<i32>} : memref<80x512xf32, #tpu.memory_space<vmem>>, vector<8x512xf32>,
    %c496_i32_359 = arith.constant 496 : i32
    %374 = tpu.dynamic_rotate %334 by %c496_i32_359 dim 1 : vector<8x512xf32>, i32 -> vector<8x512xf32>
    %c7_360 = arith.constant 7 : index
    %c0_361 = arith.constant 0 : index
    %c0_362 = arith.constant 0 : index
    %375 = vector.load %arg2[%c7_360, %c0_361, %c0_362] : memref<9x1x512xf32, #tpu.memory_space<vmem>>, vector<1x1x512xf32>
    %376 = vector.shape_cast %375 : vector<1x1x512xf32> to vector<1x512xf32>
    %377 = vector.broadcast %376 : vector<1x512xf32> to vector<8x512xf32>
    %378 = arith.mulf %374, %377 : vector<8x512xf32>
    %c56_363 = arith.constant 56 : index
    %c0_364 = arith.constant 0 : index
    %379 = vector.load %arg6[%c56_363, %c0_364] : memref<80x512xf32, #tpu.memory_space<vmem>>, vector<8x512xf32>
    tpu.vector_store %arg6[%c56_363, %c0_364], %378 {strides = array<i32>} : memref<80x512xf32, #tpu.memory_space<vmem>>, vector<8x512xf32>,
    %c495_i32_365 = arith.constant 495 : i32
    %380 = tpu.dynamic_rotate %334 by %c495_i32_365 dim 1 : vector<8x512xf32>, i32 -> vector<8x512xf32>
    %c8_366 = arith.constant 8 : index
    %c0_367 = arith.constant 0 : index
    %c0_368 = arith.constant 0 : index
    %381 = vector.load %arg2[%c8_366, %c0_367, %c0_368] : memref<9x1x512xf32, #tpu.memory_space<vmem>>, vector<1x1x512xf32>
    %382 = vector.shape_cast %381 : vector<1x1x512xf32> to vector<1x512xf32>
    %383 = vector.broadcast %382 : vector<1x512xf32> to vector<8x512xf32>
    %384 = arith.mulf %380, %383 : vector<8x512xf32>
    %c64_369 = arith.constant 64 : index
    %c0_370 = arith.constant 0 : index
    %385 = vector.load %arg6[%c64_369, %c0_370] : memref<80x512xf32, #tpu.memory_space<vmem>>, vector<8x512xf32>
    tpu.vector_store %arg6[%c64_369, %c0_370], %384 {strides = array<i32>} : memref<80x512xf32, #tpu.memory_space<vmem>>, vector<8x512xf32>,
    %c0_371 = arith.constant 0 : index
    %c0_372 = arith.constant 0 : index
    %386 = vector.load %arg6[%c0_371, %c0_372] : memref<80x512xf32, #tpu.memory_space<vmem>>, vector<80x512xf32>
    %cst_373 = arith.constant dense<0.000000e+00> : vector<8x512xf32>
    %387 = tpu.matmul %336, %386, %cst_373 {dimension_numbers = #tpu.dot_dimension_numbers<[1], [0], [0], [1], [0, 0, 1, 1], [], []>} : vector<8x80xf32>, vector<80x512xf32>, vector<8x512xf32> -> vector<8x512xf32>
    %cst_374 = arith.constant 0.000000e+00 : f32
    %388 = vector.broadcast %cst_374 : f32 to vector<8x512xf32>
    %389 = arith.maximumf %387, %388 : vector<8x512xf32>
    %c7_375 = arith.constant 7 : index
    %c0_376 = arith.constant 0 : index
    %c0_377 = arith.constant 0 : index
    %390 = vector.load %arg3[%c7_375, %c0_376, %c0_377] : memref<8x8x80xf32, #tpu.memory_space<vmem>>, vector<1x8x80xf32>
    %391 = vector.shape_cast %390 : vector<1x8x80xf32> to vector<8x80xf32>
    %c17_i32_378 = arith.constant 17 : i32
    %392 = tpu.dynamic_rotate %389 by %c17_i32_378 dim 1 : vector<8x512xf32>, i32 -> vector<8x512xf32>
    %c0_379 = arith.constant 0 : index
    %c0_380 = arith.constant 0 : index
    %c0_381 = arith.constant 0 : index
    %393 = vector.load %arg2[%c0_379, %c0_380, %c0_381] : memref<9x1x512xf32, #tpu.memory_space<vmem>>, vector<1x1x512xf32>
    %394 = vector.shape_cast %393 : vector<1x1x512xf32> to vector<1x512xf32>
    %395 = vector.broadcast %394 : vector<1x512xf32> to vector<8x512xf32>
    %396 = arith.mulf %392, %395 : vector<8x512xf32>
    %c0_382 = arith.constant 0 : index
    %c0_383 = arith.constant 0 : index
    %397 = vector.load %arg6[%c0_382, %c0_383] : memref<80x512xf32, #tpu.memory_space<vmem>>, vector<8x512xf32>
    tpu.vector_store %arg6[%c0_382, %c0_383], %396 {strides = array<i32>} : memref<80x512xf32, #tpu.memory_space<vmem>>, vector<8x512xf32>,
    %c16_i32_384 = arith.constant 16 : i32
    %398 = tpu.dynamic_rotate %389 by %c16_i32_384 dim 1 : vector<8x512xf32>, i32 -> vector<8x512xf32>
    %c1_385 = arith.constant 1 : index
    %c0_386 = arith.constant 0 : index
    %c0_387 = arith.constant 0 : index
    %399 = vector.load %arg2[%c1_385, %c0_386, %c0_387] : memref<9x1x512xf32, #tpu.memory_space<vmem>>, vector<1x1x512xf32>
    %400 = vector.shape_cast %399 : vector<1x1x512xf32> to vector<1x512xf32>
    %401 = vector.broadcast %400 : vector<1x512xf32> to vector<8x512xf32>
    %402 = arith.mulf %398, %401 : vector<8x512xf32>
    %c8_388 = arith.constant 8 : index
    %c0_389 = arith.constant 0 : index
    %403 = vector.load %arg6[%c8_388, %c0_389] : memref<80x512xf32, #tpu.memory_space<vmem>>, vector<8x512xf32>
    tpu.vector_store %arg6[%c8_388, %c0_389], %402 {strides = array<i32>} : memref<80x512xf32, #tpu.memory_space<vmem>>, vector<8x512xf32>,
    %c15_i32_390 = arith.constant 15 : i32
    %404 = tpu.dynamic_rotate %389 by %c15_i32_390 dim 1 : vector<8x512xf32>, i32 -> vector<8x512xf32>
    %c2_391 = arith.constant 2 : index
    %c0_392 = arith.constant 0 : index
    %c0_393 = arith.constant 0 : index
    %405 = vector.load %arg2[%c2_391, %c0_392, %c0_393] : memref<9x1x512xf32, #tpu.memory_space<vmem>>, vector<1x1x512xf32>
    %406 = vector.shape_cast %405 : vector<1x1x512xf32> to vector<1x512xf32>
    %407 = vector.broadcast %406 : vector<1x512xf32> to vector<8x512xf32>
    %408 = arith.mulf %404, %407 : vector<8x512xf32>
    %c16_394 = arith.constant 16 : index
    %c0_395 = arith.constant 0 : index
    %409 = vector.load %arg6[%c16_394, %c0_395] : memref<80x512xf32, #tpu.memory_space<vmem>>, vector<8x512xf32>
    tpu.vector_store %arg6[%c16_394, %c0_395], %408 {strides = array<i32>} : memref<80x512xf32, #tpu.memory_space<vmem>>, vector<8x512xf32>,
    %c1_i32_396 = arith.constant 1 : i32
    %410 = tpu.dynamic_rotate %389 by %c1_i32_396 dim 1 : vector<8x512xf32>, i32 -> vector<8x512xf32>
    %c3_397 = arith.constant 3 : index
    %c0_398 = arith.constant 0 : index
    %c0_399 = arith.constant 0 : index
    %411 = vector.load %arg2[%c3_397, %c0_398, %c0_399] : memref<9x1x512xf32, #tpu.memory_space<vmem>>, vector<1x1x512xf32>
    %412 = vector.shape_cast %411 : vector<1x1x512xf32> to vector<1x512xf32>
    %413 = vector.broadcast %412 : vector<1x512xf32> to vector<8x512xf32>
    %414 = arith.mulf %410, %413 : vector<8x512xf32>
    %c24_400 = arith.constant 24 : index
    %c0_401 = arith.constant 0 : index
    %415 = vector.load %arg6[%c24_400, %c0_401] : memref<80x512xf32, #tpu.memory_space<vmem>>, vector<8x512xf32>
    tpu.vector_store %arg6[%c24_400, %c0_401], %414 {strides = array<i32>} : memref<80x512xf32, #tpu.memory_space<vmem>>, vector<8x512xf32>,
    %c32_402 = arith.constant 32 : index
    %c0_403 = arith.constant 0 : index
    %416 = vector.load %arg6[%c32_402, %c0_403] : memref<80x512xf32, #tpu.memory_space<vmem>>, vector<8x512xf32>
    tpu.vector_store %arg6[%c32_402, %c0_403], %389 {strides = array<i32>} : memref<80x512xf32, #tpu.memory_space<vmem>>, vector<8x512xf32>,
    %c511_i32_404 = arith.constant 511 : i32
    %417 = tpu.dynamic_rotate %389 by %c511_i32_404 dim 1 : vector<8x512xf32>, i32 -> vector<8x512xf32>
    %c5_405 = arith.constant 5 : index
    %c0_406 = arith.constant 0 : index
    %c0_407 = arith.constant 0 : index
    %418 = vector.load %arg2[%c5_405, %c0_406, %c0_407] : memref<9x1x512xf32, #tpu.memory_space<vmem>>, vector<1x1x512xf32>
    %419 = vector.shape_cast %418 : vector<1x1x512xf32> to vector<1x512xf32>
    %420 = vector.broadcast %419 : vector<1x512xf32> to vector<8x512xf32>
    %421 = arith.mulf %417, %420 : vector<8x512xf32>
    %c40_408 = arith.constant 40 : index
    %c0_409 = arith.constant 0 : index
    %422 = vector.load %arg6[%c40_408, %c0_409] : memref<80x512xf32, #tpu.memory_space<vmem>>, vector<8x512xf32>
    tpu.vector_store %arg6[%c40_408, %c0_409], %421 {strides = array<i32>} : memref<80x512xf32, #tpu.memory_space<vmem>>, vector<8x512xf32>,
    %c497_i32_410 = arith.constant 497 : i32
    %423 = tpu.dynamic_rotate %389 by %c497_i32_410 dim 1 : vector<8x512xf32>, i32 -> vector<8x512xf32>
    %c6_411 = arith.constant 6 : index
    %c0_412 = arith.constant 0 : index
    %c0_413 = arith.constant 0 : index
    %424 = vector.load %arg2[%c6_411, %c0_412, %c0_413] : memref<9x1x512xf32, #tpu.memory_space<vmem>>, vector<1x1x512xf32>
    %425 = vector.shape_cast %424 : vector<1x1x512xf32> to vector<1x512xf32>
    %426 = vector.broadcast %425 : vector<1x512xf32> to vector<8x512xf32>
    %427 = arith.mulf %423, %426 : vector<8x512xf32>
    %c48_414 = arith.constant 48 : index
    %c0_415 = arith.constant 0 : index
    %428 = vector.load %arg6[%c48_414, %c0_415] : memref<80x512xf32, #tpu.memory_space<vmem>>, vector<8x512xf32>
    tpu.vector_store %arg6[%c48_414, %c0_415], %427 {strides = array<i32>} : memref<80x512xf32, #tpu.memory_space<vmem>>, vector<8x512xf32>,
    %c496_i32_416 = arith.constant 496 : i32
    %429 = tpu.dynamic_rotate %389 by %c496_i32_416 dim 1 : vector<8x512xf32>, i32 -> vector<8x512xf32>
    %c7_417 = arith.constant 7 : index
    %c0_418 = arith.constant 0 : index
    %c0_419 = arith.constant 0 : index
    %430 = vector.load %arg2[%c7_417, %c0_418, %c0_419] : memref<9x1x512xf32, #tpu.memory_space<vmem>>, vector<1x1x512xf32>
    %431 = vector.shape_cast %430 : vector<1x1x512xf32> to vector<1x512xf32>
    %432 = vector.broadcast %431 : vector<1x512xf32> to vector<8x512xf32>
    %433 = arith.mulf %429, %432 : vector<8x512xf32>
    %c56_420 = arith.constant 56 : index
    %c0_421 = arith.constant 0 : index
    %434 = vector.load %arg6[%c56_420, %c0_421] : memref<80x512xf32, #tpu.memory_space<vmem>>, vector<8x512xf32>
    tpu.vector_store %arg6[%c56_420, %c0_421], %433 {strides = array<i32>} : memref<80x512xf32, #tpu.memory_space<vmem>>, vector<8x512xf32>,
    %c495_i32_422 = arith.constant 495 : i32
    %435 = tpu.dynamic_rotate %389 by %c495_i32_422 dim 1 : vector<8x512xf32>, i32 -> vector<8x512xf32>
    %c8_423 = arith.constant 8 : index
    %c0_424 = arith.constant 0 : index
    %c0_425 = arith.constant 0 : index
    %436 = vector.load %arg2[%c8_423, %c0_424, %c0_425] : memref<9x1x512xf32, #tpu.memory_space<vmem>>, vector<1x1x512xf32>
    %437 = vector.shape_cast %436 : vector<1x1x512xf32> to vector<1x512xf32>
    %438 = vector.broadcast %437 : vector<1x512xf32> to vector<8x512xf32>
    %439 = arith.mulf %435, %438 : vector<8x512xf32>
    %c64_426 = arith.constant 64 : index
    %c0_427 = arith.constant 0 : index
    %440 = vector.load %arg6[%c64_426, %c0_427] : memref<80x512xf32, #tpu.memory_space<vmem>>, vector<8x512xf32>
    tpu.vector_store %arg6[%c64_426, %c0_427], %439 {strides = array<i32>} : memref<80x512xf32, #tpu.memory_space<vmem>>, vector<8x512xf32>,
    %c0_428 = arith.constant 0 : index
    %c0_429 = arith.constant 0 : index
    %441 = vector.load %arg6[%c0_428, %c0_429] : memref<80x512xf32, #tpu.memory_space<vmem>>, vector<80x512xf32>
    %cst_430 = arith.constant dense<0.000000e+00> : vector<8x512xf32>
    %442 = tpu.matmul %391, %441, %cst_430 {dimension_numbers = #tpu.dot_dimension_numbers<[1], [0], [0], [1], [0, 0, 1, 1], [], []>} : vector<8x80xf32>, vector<80x512xf32>, vector<8x512xf32> -> vector<8x512xf32>
    %443 = arith.addf %334, %442 : vector<8x512xf32>
    %c0_431 = arith.constant 0 : index
    %c0_432 = arith.constant 0 : index
    %444 = vector.load %arg4[%c0_431, %c0_432] : memref<8x80xf32, #tpu.memory_space<vmem>>, vector<8x80xf32>
    %c17_i32_433 = arith.constant 17 : i32
    %445 = tpu.dynamic_rotate %443 by %c17_i32_433 dim 1 : vector<8x512xf32>, i32 -> vector<8x512xf32>
    %c0_434 = arith.constant 0 : index
    %c0_435 = arith.constant 0 : index
    %c0_436 = arith.constant 0 : index
    %446 = vector.load %arg2[%c0_434, %c0_435, %c0_436] : memref<9x1x512xf32, #tpu.memory_space<vmem>>, vector<1x1x512xf32>
    %447 = vector.shape_cast %446 : vector<1x1x512xf32> to vector<1x512xf32>
    %448 = vector.broadcast %447 : vector<1x512xf32> to vector<8x512xf32>
    %449 = arith.mulf %445, %448 : vector<8x512xf32>
    %c0_437 = arith.constant 0 : index
    %c0_438 = arith.constant 0 : index
    %450 = vector.load %arg6[%c0_437, %c0_438] : memref<80x512xf32, #tpu.memory_space<vmem>>, vector<8x512xf32>
    tpu.vector_store %arg6[%c0_437, %c0_438], %449 {strides = array<i32>} : memref<80x512xf32, #tpu.memory_space<vmem>>, vector<8x512xf32>,
    %c16_i32_439 = arith.constant 16 : i32
    %451 = tpu.dynamic_rotate %443 by %c16_i32_439 dim 1 : vector<8x512xf32>, i32 -> vector<8x512xf32>
    %c1_440 = arith.constant 1 : index
    %c0_441 = arith.constant 0 : index
    %c0_442 = arith.constant 0 : index
    %452 = vector.load %arg2[%c1_440, %c0_441, %c0_442] : memref<9x1x512xf32, #tpu.memory_space<vmem>>, vector<1x1x512xf32>
    %453 = vector.shape_cast %452 : vector<1x1x512xf32> to vector<1x512xf32>
    %454 = vector.broadcast %453 : vector<1x512xf32> to vector<8x512xf32>
    %455 = arith.mulf %451, %454 : vector<8x512xf32>
    %c8_443 = arith.constant 8 : index
    %c0_444 = arith.constant 0 : index
    %456 = vector.load %arg6[%c8_443, %c0_444] : memref<80x512xf32, #tpu.memory_space<vmem>>, vector<8x512xf32>
    tpu.vector_store %arg6[%c8_443, %c0_444], %455 {strides = array<i32>} : memref<80x512xf32, #tpu.memory_space<vmem>>, vector<8x512xf32>,
    %c15_i32_445 = arith.constant 15 : i32
    %457 = tpu.dynamic_rotate %443 by %c15_i32_445 dim 1 : vector<8x512xf32>, i32 -> vector<8x512xf32>
    %c2_446 = arith.constant 2 : index
    %c0_447 = arith.constant 0 : index
    %c0_448 = arith.constant 0 : index
    %458 = vector.load %arg2[%c2_446, %c0_447, %c0_448] : memref<9x1x512xf32, #tpu.memory_space<vmem>>, vector<1x1x512xf32>
    %459 = vector.shape_cast %458 : vector<1x1x512xf32> to vector<1x512xf32>
    %460 = vector.broadcast %459 : vector<1x512xf32> to vector<8x512xf32>
    %461 = arith.mulf %457, %460 : vector<8x512xf32>
    %c16_449 = arith.constant 16 : index
    %c0_450 = arith.constant 0 : index
    %462 = vector.load %arg6[%c16_449, %c0_450] : memref<80x512xf32, #tpu.memory_space<vmem>>, vector<8x512xf32>
    tpu.vector_store %arg6[%c16_449, %c0_450], %461 {strides = array<i32>} : memref<80x512xf32, #tpu.memory_space<vmem>>, vector<8x512xf32>,
    %c1_i32_451 = arith.constant 1 : i32
    %463 = tpu.dynamic_rotate %443 by %c1_i32_451 dim 1 : vector<8x512xf32>, i32 -> vector<8x512xf32>
    %c3_452 = arith.constant 3 : index
    %c0_453 = arith.constant 0 : index
    %c0_454 = arith.constant 0 : index
    %464 = vector.load %arg2[%c3_452, %c0_453, %c0_454] : memref<9x1x512xf32, #tpu.memory_space<vmem>>, vector<1x1x512xf32>
    %465 = vector.shape_cast %464 : vector<1x1x512xf32> to vector<1x512xf32>
    %466 = vector.broadcast %465 : vector<1x512xf32> to vector<8x512xf32>
    %467 = arith.mulf %463, %466 : vector<8x512xf32>
    %c24_455 = arith.constant 24 : index
    %c0_456 = arith.constant 0 : index
    %468 = vector.load %arg6[%c24_455, %c0_456] : memref<80x512xf32, #tpu.memory_space<vmem>>, vector<8x512xf32>
    tpu.vector_store %arg6[%c24_455, %c0_456], %467 {strides = array<i32>} : memref<80x512xf32, #tpu.memory_space<vmem>>, vector<8x512xf32>,
    %c32_457 = arith.constant 32 : index
    %c0_458 = arith.constant 0 : index
    %469 = vector.load %arg6[%c32_457, %c0_458] : memref<80x512xf32, #tpu.memory_space<vmem>>, vector<8x512xf32>
    tpu.vector_store %arg6[%c32_457, %c0_458], %443 {strides = array<i32>} : memref<80x512xf32, #tpu.memory_space<vmem>>, vector<8x512xf32>,
    %c511_i32_459 = arith.constant 511 : i32
    %470 = tpu.dynamic_rotate %443 by %c511_i32_459 dim 1 : vector<8x512xf32>, i32 -> vector<8x512xf32>
    %c5_460 = arith.constant 5 : index
    %c0_461 = arith.constant 0 : index
    %c0_462 = arith.constant 0 : index
    %471 = vector.load %arg2[%c5_460, %c0_461, %c0_462] : memref<9x1x512xf32, #tpu.memory_space<vmem>>, vector<1x1x512xf32>
    %472 = vector.shape_cast %471 : vector<1x1x512xf32> to vector<1x512xf32>
    %473 = vector.broadcast %472 : vector<1x512xf32> to vector<8x512xf32>
    %474 = arith.mulf %470, %473 : vector<8x512xf32>
    %c40_463 = arith.constant 40 : index
    %c0_464 = arith.constant 0 : index
    %475 = vector.load %arg6[%c40_463, %c0_464] : memref<80x512xf32, #tpu.memory_space<vmem>>, vector<8x512xf32>
    tpu.vector_store %arg6[%c40_463, %c0_464], %474 {strides = array<i32>} : memref<80x512xf32, #tpu.memory_space<vmem>>, vector<8x512xf32>,
    %c497_i32_465 = arith.constant 497 : i32
    %476 = tpu.dynamic_rotate %443 by %c497_i32_465 dim 1 : vector<8x512xf32>, i32 -> vector<8x512xf32>
    %c6_466 = arith.constant 6 : index
    %c0_467 = arith.constant 0 : index
    %c0_468 = arith.constant 0 : index
    %477 = vector.load %arg2[%c6_466, %c0_467, %c0_468] : memref<9x1x512xf32, #tpu.memory_space<vmem>>, vector<1x1x512xf32>
    %478 = vector.shape_cast %477 : vector<1x1x512xf32> to vector<1x512xf32>
    %479 = vector.broadcast %478 : vector<1x512xf32> to vector<8x512xf32>
    %480 = arith.mulf %476, %479 : vector<8x512xf32>
    %c48_469 = arith.constant 48 : index
    %c0_470 = arith.constant 0 : index
    %481 = vector.load %arg6[%c48_469, %c0_470] : memref<80x512xf32, #tpu.memory_space<vmem>>, vector<8x512xf32>
    tpu.vector_store %arg6[%c48_469, %c0_470], %480 {strides = array<i32>} : memref<80x512xf32, #tpu.memory_space<vmem>>, vector<8x512xf32>,
    %c496_i32_471 = arith.constant 496 : i32
    %482 = tpu.dynamic_rotate %443 by %c496_i32_471 dim 1 : vector<8x512xf32>, i32 -> vector<8x512xf32>
    %c7_472 = arith.constant 7 : index
    %c0_473 = arith.constant 0 : index
    %c0_474 = arith.constant 0 : index
    %483 = vector.load %arg2[%c7_472, %c0_473, %c0_474] : memref<9x1x512xf32, #tpu.memory_space<vmem>>, vector<1x1x512xf32>
    %484 = vector.shape_cast %483 : vector<1x1x512xf32> to vector<1x512xf32>
    %485 = vector.broadcast %484 : vector<1x512xf32> to vector<8x512xf32>
    %486 = arith.mulf %482, %485 : vector<8x512xf32>
    %c56_475 = arith.constant 56 : index
    %c0_476 = arith.constant 0 : index
    %487 = vector.load %arg6[%c56_475, %c0_476] : memref<80x512xf32, #tpu.memory_space<vmem>>, vector<8x512xf32>
    tpu.vector_store %arg6[%c56_475, %c0_476], %486 {strides = array<i32>} : memref<80x512xf32, #tpu.memory_space<vmem>>, vector<8x512xf32>,
    %c495_i32_477 = arith.constant 495 : i32
    %488 = tpu.dynamic_rotate %443 by %c495_i32_477 dim 1 : vector<8x512xf32>, i32 -> vector<8x512xf32>
    %c8_478 = arith.constant 8 : index
    %c0_479 = arith.constant 0 : index
    %c0_480 = arith.constant 0 : index
    %489 = vector.load %arg2[%c8_478, %c0_479, %c0_480] : memref<9x1x512xf32, #tpu.memory_space<vmem>>, vector<1x1x512xf32>
    %490 = vector.shape_cast %489 : vector<1x1x512xf32> to vector<1x512xf32>
    %491 = vector.broadcast %490 : vector<1x512xf32> to vector<8x512xf32>
    %492 = arith.mulf %488, %491 : vector<8x512xf32>
    %c64_481 = arith.constant 64 : index
    %c0_482 = arith.constant 0 : index
    %493 = vector.load %arg6[%c64_481, %c0_482] : memref<80x512xf32, #tpu.memory_space<vmem>>, vector<8x512xf32>
    tpu.vector_store %arg6[%c64_481, %c0_482], %492 {strides = array<i32>} : memref<80x512xf32, #tpu.memory_space<vmem>>, vector<8x512xf32>,
    %c0_483 = arith.constant 0 : index
    %c0_484 = arith.constant 0 : index
    %494 = vector.load %arg6[%c0_483, %c0_484] : memref<80x512xf32, #tpu.memory_space<vmem>>, vector<80x512xf32>
    %cst_485 = arith.constant dense<0.000000e+00> : vector<8x512xf32>
    %495 = tpu.matmul %444, %494, %cst_485 {dimension_numbers = #tpu.dot_dimension_numbers<[1], [0], [0], [1], [0, 0, 1, 1], [], []>} : vector<8x80xf32>, vector<80x512xf32>, vector<8x512xf32> -> vector<8x512xf32>
    %cst_486 = arith.constant 0.000000e+00 : f32
    %496 = vector.broadcast %cst_486 : f32 to vector<8x512xf32>
    %497 = arith.cmpf oge, %495, %496 : vector<8x512xf32>
    %cst_487 = arith.constant 0.00999999977 : f32
    %498 = vector.broadcast %cst_487 : f32 to vector<8x512xf32>
    %499 = arith.mulf %498, %495 : vector<8x512xf32>
    %500 = arith.select %497, %495, %499 : vector<8x512xi1>, vector<8x512xf32>
    %c0_488 = arith.constant 0 : index
    %c0_489 = arith.constant 0 : index
    %c0_490 = arith.constant 0 : index
    %501 = vector.load %arg5[%c0_488, %c0_489, %c0_490] : memref<1x8x512xf32, #tpu.memory_space<vmem>>, vector<1x8x512xf32>
    %502 = vector.shape_cast %501 : vector<1x8x512xf32> to vector<8x512xf32>
    %503 = vector.shape_cast %500 : vector<8x512xf32> to vector<1x8x512xf32>
    tpu.vector_store %arg5[%c0_488, %c0_489, %c0_490], %503 {strides = array<i32>} : memref<1x8x512xf32, #tpu.memory_space<vmem>>, vector<1x8x512xf32>,
    return
  }
  func.func @transform_0(%arg0: i32) -> (i32, i32, i32) {
    %c0_i32 = arith.constant 0 : i32
    %c0_i32_0 = arith.constant 0 : i32
    %c0_i32_1 = arith.constant 0 : i32
    return %arg0, %c0_i32, %c0_i32_0 : i32, i32, i32
  }
  func.func @transform_1(%arg0: i32) -> (i32, i32, i32) {
    %c0_i32 = arith.constant 0 : i32
    %c0_i32_0 = arith.constant 0 : i32
    %c0_i32_1 = arith.constant 0 : i32
    %c0_i32_2 = arith.constant 0 : i32
    return %c0_i32, %c0_i32_0, %c0_i32_1 : i32, i32, i32
  }
  func.func @transform_2(%arg0: i32) -> (i32, i32, i32) {
    %c0_i32 = arith.constant 0 : i32
    %c0_i32_0 = arith.constant 0 : i32
    %c0_i32_1 = arith.constant 0 : i32
    %c0_i32_2 = arith.constant 0 : i32
    return %c0_i32, %c0_i32_0, %c0_i32_1 : i32, i32, i32
  }
  func.func @transform_3(%arg0: i32) -> (i32, i32) {
    %c0_i32 = arith.constant 0 : i32
    %c0_i32_0 = arith.constant 0 : i32
    %c0_i32_1 = arith.constant 0 : i32
    return %c0_i32, %c0_i32_0 : i32, i32
  }
  func.func @transform_4(%arg0: i32) -> (i32, i32, i32) {
    %c0_i32 = arith.constant 0 : i32
    %c0_i32_0 = arith.constant 0 : i32
    %c0_i32_1 = arith.constant 0 : i32
    return %arg0, %c0_i32, %c0_i32_0 : i32, i32, i32
  }
}

</mosaic_0001>

<bundles_post_ra>
// kernel: feature_reconstruction_forward.1
= control target key start
LH: loop header
LB: loop body
LE: loop exit
PB: predicated region body
PF: predicated region fallthrough
CT: control target
= control target key end

     0   :  { %9 = vsyncpa [#allocation4], 0  ;;  %s7337_s0 = inlined_call_operand.hbm [shape: f32[1,8,512], index: 0, kind: input, shape index: {}]   ;;  %s7338_s1 = inlined_call_operand.hbm [shape: f32[9,1,512], index: 1, kind: input, shape index: {}]   ;;  %s7339_s2 = inlined_call_operand.hbm [shape: f32[8,8,80], index: 2, kind: input, shape index: {}]   ;;  %s7340_s3 = inlined_call_operand.hbm [shape: f32[8,80], index: 3, kind: input, shape index: {}]   ;;  %s7341_s4 = inlined_call_operand.hbm [shape: f32[1,8,512], index: 4, kind: output, shape index: {}]  }
   0x1   :  { %10 = vsyncpa [#allocation7], 0 }
   0x2   :  { %11 = vsyncpa [#allocation10], 0 }
   0x3   :  { %12 = vsyncpa [#allocation5], 0  ;;  %s5495_s15 = smov [#allocation6]   ;;  %s5377_s19 = scalar_lea.hbm %s7338_s1, 576 }
   0x4   :  { %s28_s16 = sshll.u32 %s5495_s15, 4  ;;  %p5378_p0 = scmp.ne.s32.totalorder %s7338_s1, %s5377_s19  ;;  %s29_s16 = int_to_ptr.vmem [resolvable:$true] %s28_s16 }
   0x5   :  { %p5381_p1 = scmp.lt.u32.totalorder %s5377_s19, %s7338_s1 }
   0x7   :  { %p5383_p2 = pnand %p5381_p1, %p5378_p0 }
   0x9   :  { %5386 = shalt.err (!%p5383_p2)
}
   0xa   :  { %s5387_s24 = scalar_lea.vmem %s29_s16, 576  ;;  %p5392_p4 = scmp.lt.s32.totalorder %s29_s16, %s29_s16 }
   0xb   :  { %p5388_p3 = scmp.ne.s32.totalorder %s29_s16, %s5387_s24  ;;  %p5393_p5 = scmp.lt.s32.totalorder %s5387_s24, %s5387_s24 }
   0xd   :  { %p5394_p6 = por %p5393_p5, %p5392_p4 }
   0xf   :  { %p5395_p7 = pnand %p5394_p6, %p5388_p3 }
  0x11   :  { %5398 = shalt.err (!%p5395_p7)
}
  0x12   :  { %s5496_s25 = smov 64   ;;  %s5497_s26 = smov 4  }
  0x13   :  { %34 = dma.hbm_to_vmem [thread:$0]  %s7338_s1, 576, %s29_s16, [#allocation7], %s5496_s25, %s5496_s25, %s5497_s26  }
  0x14   :  { %s5498_s29 = smov [#allocation3]   ;;  %s5499_s5 = smov [#allocation8]  }
  0x15   :  { %s19_s30 = sshll.u32 %s5498_s29, 4  ;;  %s40_s6 = sshll.u32 %s5499_s5, 4  ;;  %s20_s30 = int_to_ptr.vmem [resolvable:$true] %s19_s30  ;;  %s41_s6 = int_to_ptr.vmem [resolvable:$true] %s40_s6 }
  0x16   :  { %s5399_s9 = scalar_lea.hbm %s7337_s0, 512 }
  0x17   :  { %p5400_p8 = scmp.ne.s32.totalorder %s7337_s0, %s5399_s9  ;;  %p5403_p9 = scmp.lt.u32.totalorder %s5399_s9, %s7337_s0 }
  0x19   :  { %p5405_p10 = pnand %p5403_p9, %p5400_p8 }
  0x1b   :  { %5408 = shalt.err (!%p5405_p10)
}
  0x1c   :  { %s5409_s1 = scalar_lea.vmem %s20_s30, 512  ;;  %p5414_p12 = scmp.lt.s32.totalorder %s20_s30, %s20_s30 }
  0x1d   :  { %p5410_p11 = scmp.ne.s32.totalorder %s20_s30, %s5409_s1  ;;  %p5415_p13 = scmp.lt.s32.totalorder %s5409_s1, %s5409_s1 }
  0x1f   :  { %p5416_p0 = por %p5415_p13, %p5414_p12 }
  0x21   :  { %p5417_p1 = pnand %p5416_p0, %p5410_p11 }
  0x23   :  { %5420 = shalt.err (!%p5417_p1)
}
  0x24   :  { %22 = dma.hbm_to_vmem [thread:$0]  %s7337_s0, 512, %s20_s30, [#allocation4]  }
  0x25   :  { %s5421_s18 = scalar_lea.hbm %s7339_s2, 1024 }
  0x26   :  { %p5422_p2 = scmp.ne.s32.totalorder %s7339_s2, %s5421_s18  ;;  %p5425_p3 = scmp.lt.u32.totalorder %s5421_s18, %s7339_s2 }
  0x28   :  { %p5427_p4 = pnand %p5425_p3, %p5422_p2 }
  0x2a   :  { %5430 = shalt.err (!%p5427_p4)
}
  0x2b   :  { %s5431_s23 = scalar_lea.vmem %s41_s6, 1024  ;;  %p5436_p6 = scmp.lt.s32.totalorder %s41_s6, %s41_s6 }
  0x2c   :  { %p5432_p5 = scmp.ne.s32.totalorder %s41_s6, %s5431_s23  ;;  %p5437_p7 = scmp.lt.s32.totalorder %s5431_s23, %s5431_s23 }
  0x2e   :  { %p5438_p8 = por %p5437_p7, %p5436_p6 }
  0x30   :  { %p5439_p9 = pnand %p5438_p8, %p5432_p5 }
  0x32   :  { %5442 = shalt.err (!%p5439_p9)
}
  0x33   :  { %s5500_s0 = smov 128   ;;  %s5501_s24 = smov 8  }
  0x34   :  { %46 = dma.hbm_to_vmem [thread:$0]  %s7339_s2, 1024, %s41_s6, [#allocation7], %s5500_s0, %s5500_s0, %s5501_s24  }
  0x35   :  { %s5502_s27 = smov [#allocation9]   ;;  %s5443_s5 = scalar_lea.hbm %s7340_s3, 128 }
  0x36   :  { %s53_s28 = sshll.u32 %s5502_s27, 4  ;;  %p5444_p10 = scmp.ne.s32.totalorder %s7340_s3, %s5443_s5  ;;  %s54_s28 = int_to_ptr.vmem [resolvable:$true] %s53_s28 }
  0x37   :  { %p5447_p11 = scmp.lt.u32.totalorder %s5443_s5, %s7340_s3 }
  0x39   :  { %p5449_p12 = pnand %p5447_p11, %p5444_p10 }
  0x3b   :  { %5452 = shalt.err (!%p5449_p12)
}
  0x3c   :  { %s5453_s11 = scalar_lea.vmem %s54_s28, 128  ;;  %p5458_p0 = scmp.lt.s32.totalorder %s54_s28, %s54_s28 }
  0x3d   :  { %p5454_p13 = scmp.ne.s32.totalorder %s54_s28, %s5453_s11  ;;  %p5459_p1 = scmp.lt.s32.totalorder %s5453_s11, %s5453_s11 }
  0x3f   :  { %p5460_p2 = por %p5459_p1, %p5458_p0 }
  0x41   :  { %p5461_p3 = pnand %p5460_p2, %p5454_p13 }
  0x43   :  { %5464 = shalt.err (!%p5461_p3)
}
  0x44   :  { %56 = dma.hbm_to_vmem [thread:$0]  %s7340_s3, 128, %s54_s28, [#allocation10]  }
  0x45   :  { %5487 = dma.done.wait [#allocation4], 512  }
  0x46   :  { %5488 = vsyncadd [#allocation4], 4294966784 }
  0x47   :  { %5489 = dma.done.wait [#allocation7], 1600  }
  0x48   :  { %5490 = vsyncadd [#allocation7], 4294965696 }
  0x49   :  { %5491 = dma.done.wait [#allocation10], 128  }
  0x4a   :  { %5492 = vsyncadd [#allocation10], 4294967168  ;;  %v5588_v0 = vld [vmem:[#allocation3 + $0x10] sm:$0xff]  ;;  %v5590_v1 = vld [vmem:[#allocation3] sm:$0xff]  ;;  %s5503_s12 = smov 17   ;;  %s5504_s3 = smov 16   ;;  %v69_v5 = vlaneseq }
  0x4b   :  { %87 = vrot.lane.b32.xlu1 %v5588_v0, %s5503_s12  ;;  %83 = vrot.lane.b32.xlu0 %v5590_v1, %s5503_s12  ;;  %v5596_v2 = vld [vmem:[#allocation3 + $0x18] sm:$0xff]  ;;  %v5598_v3 = vld [vmem:[#allocation3 + $0x8] sm:$0xff]  ;;  %s5505_s13 = smov 15   ;;  %s5506_s1 = smov 1   ;;  %v5510_v4 = vmov 0.0   ;;  %vm5512_vm9 = vmmov 1  }
  0x4c   :  { %s5507_s14 = smov 127   ;;  %s5508_s15 = smov 113   ;;  %548 = vmatprep.mubr.f32.mxu0 %v5510_v4  ;;  %619 = vmatprep.mubr.f32.mxu1 %v5510_v4  ;;  %v5662_v6 = vshrl.u32 %v69_v5, 7  ;;  %v5664_v9 = vand.u32 127, %v69_v5  ;;  %v98_v11 = vld [vmem:[#allocation6] sm:$0xf] }
  0x4d   :  { %s5509_s16 = smov 112   ;;  %s5511_s17 = smov 111   ;;  %v142_v12 = vld [vmem:[#allocation6 + $0x4] sm:$0xf]  ;;  %v186_v52 = vld [vmem:[#allocation6 + $0x8] sm:$0xf] }
  0x4e   :  { %v5667_v10 = vsub.s32 1, %v5662_v6  ;;  %vm93_vm0 = vcmp.lt.s32.totalorder %v5664_v9, 17  ;;  %v5671_v15 = vsub.s32 0, %v5662_v6  ;;  %v5674_v16 = vsub.s32 3, %v5662_v6  ;;  %v230_v53 = vld [vmem:[#allocation6 + $0xc] sm:$0xf] }
  0x4f   :  { %89 = vrot.lane.b32.xlu1 %v5596_v2, %s5503_s12  ;;  %85 = vrot.lane.b32.xlu0 %v5598_v3, %s5503_s12  ;;  %v5677_v17 = vsub.s32 2, %v5662_v6  ;;  %vm136_vm1 = vcmp.lt.s32.totalorder %v5664_v9, 16  ;;  %vm180_vm2 = vcmp.lt.s32.totalorder %v5664_v9, 15  ;;  %vm224_vm3 = vcmp.lt.s32.totalorder %v5664_v9, 1  ;;  %s5514_s18 = smov [#allocation11]  }
  0x50   :  { %v107_v18 = vrot.slane %v98_v11, %v5667_v10  ;;  %v151_v19 = vrot.slane %v142_v12, %v5667_v10  ;;  %v103_v23 = vrot.slane %v98_v11, %v5671_v15  ;;  %v147_v24 = vrot.slane %v142_v12, %v5671_v15  ;;  %s4895_s19 = sshll.u32 %s5514_s18, 4  ;;  %s4896_s19 = int_to_ptr.vmem [resolvable:$true] %s4895_s19 }
  0x51   :  { %v115_v25 = vrot.slane %v98_v11, %v5674_v16  ;;  %v159_v28 = vrot.slane %v142_v12, %v5674_v16  ;;  %v111_v29 = vrot.slane %v98_v11, %v5677_v17  ;;  %v155_v33 = vrot.slane %v142_v12, %v5677_v17  ;;  %s5465_s20 = scalar_lea.vmem %s4896_s19, 512  ;;  %p5470_p5 = scmp.lt.s32.totalorder %s4896_s19, %s4896_s19 }
  0x52   :  { %v195_v56 = vrot.slane %v186_v52, %v5667_v10  ;;  %v239_v57 = vrot.slane %v230_v53, %v5667_v10  ;;  %v191_v59 = vrot.slane %v186_v52, %v5671_v15  ;;  %v199_v60 = vrot.slane %v186_v52, %v5677_v17  ;;  %p5466_p4 = scmp.ne.s32.totalorder %s4896_s19, %s5465_s20  ;;  %p5471_p6 = scmp.lt.s32.totalorder %s5465_s20, %s5465_s20 }
  0x53   :  { %130 = vrot.lane.b32.xlu1 %v5598_v3, %s5504_s3  ;;  %128 = vrot.lane.b32.xlu0 %v5590_v1, %s5504_s3  ;;  %v203_v61 = vrot.slane %v186_v52, %v5674_v16  ;;  %v243_v11 = vrot.slane %v230_v53, %v5677_v17  ;;  %vm272_vm4 = vcmp.lt.s32.totalorder %v5664_v9, 127  ;;  %vm360_vm5 = vcmp.lt.s32.totalorder %v5664_v9, 112 }
  0x54   :  { %vm316_vm6 = vcmp.lt.s32.totalorder %v5664_v9, 113  ;;  %vm404_vm7 = vcmp.lt.s32.totalorder %v5664_v9, 111  ;;  %vm71_vm8 = vcmp.eq.s32.totalorder %v5662_v6, 0  ;;  %vm480_vm11 = vcmask 654336   ;;  %v4347_v9 = vld [vmem:[#allocation9] sm:$0xff]  ;;  %p5472_p7 = por %p5471_p6, %p5470_p5 }
  0x55   :  { %vm5787_vm10 = vmpackc.low %vm71_vm8, %vm5512_vm9 }
  0x56   :  { %p5473_p8 = pnand %p5472_p7, %p5466_p4 }
  0x57   :  { %134 = vrot.lane.b32.xlu1 %v5596_v2, %s5504_s3  ;;  %132 = vrot.lane.b32.xlu0 %v5588_v0, %s5504_s3 }
  0x5b   :  { %174 = vrot.lane.b32.xlu1 %v5598_v3, %s5505_s13  ;;  %172 = vrot.lane.b32.xlu0 %v5590_v1, %s5505_s13 }
  0x5f   :  { %178 = vrot.lane.b32.xlu1 %v5596_v2, %s5505_s13  ;;  %176 = vrot.lane.b32.xlu0 %v5588_v0, %s5505_s13 }
  0x63   :  { %218 = vrot.lane.b32.xlu1 %v5598_v3, %s5506_s1  ;;  %216 = vrot.lane.b32.xlu0 %v5590_v1, %s5506_s1 }
  0x67   :  { %222 = vrot.lane.b32.xlu1 %v5596_v2, %s5506_s1  ;;  %220 = vrot.lane.b32.xlu0 %v5588_v0, %s5506_s1 }
  0x6b   :  { %266 = vrot.lane.b32.xlu1 %v5598_v3, %s5507_s14  ;;  %264 = vrot.lane.b32.xlu0 %v5590_v1, %s5507_s14 }
  0x6f   :  { %270 = vrot.lane.b32.xlu1 %v5596_v2, %s5507_s14  ;;  %268 = vrot.lane.b32.xlu0 %v5588_v0, %s5507_s14 }
  0x73   :  { %310 = vrot.lane.b32.xlu1 %v5598_v3, %s5508_s15  ;;  %308 = vrot.lane.b32.xlu0 %v5590_v1, %s5508_s15 }
  0x77   :  { %314 = vrot.lane.b32.xlu1 %v5596_v2, %s5508_s15  ;;  %312 = vrot.lane.b32.xlu0 %v5588_v0, %s5508_s15 }
  0x7b   :  { %354 = vrot.lane.b32.xlu1 %v5598_v3, %s5509_s16  ;;  %352 = vrot.lane.b32.xlu0 %v5590_v1, %s5509_s16 }
  0x7f   :  { %358 = vrot.lane.b32.xlu1 %v5596_v2, %s5509_s16  ;;  %356 = vrot.lane.b32.xlu0 %v5588_v0, %s5509_s16 }
  0x83   :  { %398 = vrot.lane.b32.xlu1 %v5598_v3, %s5511_s17  ;;  %396 = vrot.lane.b32.xlu0 %v5590_v1, %s5511_s17 }
  0x87   :  { %402 = vrot.lane.b32.xlu1 %v5596_v2, %s5511_s17  ;;  %400 = vrot.lane.b32.xlu0 %v5588_v0, %s5511_s17 }
  0xbd   :  { %v88_v7 = vpop.permute.xlu1 %87  ;;  %v84_v8 = vpop.permute.xlu0 %83 }
  0xc1   :  { %v90_v13 = vpop.permute.xlu1 %89  ;;  %v86_v14 = vpop.permute.xlu0 %85 }
  0xc2   :  { %v96_v20 = vsel %vm93_vm0, %v84_v8, %v86_v14  ;;  %v97_v26 = vsel %vm93_vm0, %v90_v13, %v84_v8  ;;  %v94_v32 = vsel %vm93_vm0, %v88_v7, %v90_v13  ;;  %v95_v34 = vsel %vm93_vm0, %v86_v14, %v88_v7 }
  0xc3   :  { %v121_v30 = vmul.f32 %v107_v18, %v96_v20  ;;  %v120_v38 = vmul.f32 %v103_v23, %v97_v26  ;;  %v123_v41 = vmul.f32 %v115_v25, %v94_v32  ;;  %v122_v45 = vmul.f32 %v111_v29, %v95_v34  ;;  %v278_v32 = vld [vmem:[#allocation6 + $0x14] sm:$0xf] }
  0xc4   :  { %v235_v8 = vrot.slane %v230_v53, %v5671_v15  ;;  %v247_v18 = vrot.slane %v230_v53, %v5674_v16 }
  0xc5   :  { %v131_v21 = vpop.permute.xlu1 %130  ;;  %v129_v22 = vpop.permute.xlu0 %128 }
  0xc6   :  { %v139_v27 = vsel %vm136_vm1, %v129_v22, %v131_v21 }
  0xc7   :  { %v165_v31 = vmul.f32 %v151_v19, %v139_v27 }
  0xc9   :  { %v135_v35 = vpop.permute.xlu1 %134  ;;  %v133_v36 = vpop.permute.xlu0 %132  ;;  %v4961_v37 = vpack.c.bf16 %v165_v31, %v121_v30 }
  0xca   :  { %v140_v39 = vsel %vm136_vm1, %v135_v35, %v129_v22  ;;  %v138_v40 = vsel %vm136_vm1, %v131_v21, %v133_v36  ;;  %v137_v42 = vsel %vm136_vm1, %v133_v36, %v135_v35 }
  0xcb   :  { %4962 = vmatprep.subr.bf16.mxu0 %v4961_v37  ;;  %v164_v43 = vmul.f32 %v147_v24, %v140_v39  ;;  %v167_v44 = vmul.f32 %v159_v28, %v137_v42  ;;  %v166_v46 = vmul.f32 %v155_v33, %v138_v40  ;;  %v295_v39 = vrot.slane %v278_v32, %v5674_v16 }
  0xcc   :  { %v291_v42 = vrot.slane %v278_v32, %v5677_v17 }
  0xcd   :  { %v175_v47 = vpop.permute.xlu1 %174  ;;  %v173_v48 = vpop.permute.xlu0 %172  ;;  %v4963_v49 = vpack.c.bf16 %v164_v43, %v120_v38  ;;  %v4983_v50 = vpack.c.bf16 %v167_v44, %v123_v41  ;;  %v4985_v51 = vpack.c.bf16 %v166_v46, %v122_v45  ;;  %v283_v38 = vrot.slane %v278_v32, %v5671_v15 }
  0xce   :  { %v183_v58 = vsel %vm180_vm2, %v173_v48, %v175_v47  ;;  %v287_v41 = vrot.slane %v278_v32, %v5667_v10 }
  0xcf   :  { %4964 = vmatpush1.bf16.msra.mxu0 %v4963_v49  ;;  %4984 = vmatprep.subr.bf16.mxu1 %v4983_v50  ;;  %v209_v12 = vmul.f32 %v195_v56, %v183_v58 }
  0xd0   :  { %4986 = vmatpush1.bf16.msra.mxu1 %v4985_v51 }
  0xd1   :  { %v179_v54 = vpop.permute.xlu1 %178  ;;  %v177_v55 = vpop.permute.xlu0 %176 }
  0xd2   :  { %v184_v5 = vsel %vm180_vm2, %v179_v54, %v173_v48  ;;  %v182_v13 = vsel %vm180_vm2, %v175_v47, %v177_v55  ;;  %v181_v19 = vsel %vm180_vm2, %v177_v55, %v179_v54 }
  0xd3   :  { %v208_v20 = vmul.f32 %v191_v59, %v184_v5  ;;  %v210_v24 = vmul.f32 %v199_v60, %v182_v13  ;;  %v211_v28 = vmul.f32 %v203_v61, %v181_v19  ;;  %v366_v60 = vld [vmem:[#allocation6 + $0x1c] sm:$0xf]  ;;  %v322_v61 = vld [vmem:[#allocation6 + $0x18] sm:$0xf] }
  0xd4   :  { %v371_v13 = vrot.slane %v366_v60, %v5671_v15  ;;  %v375_v19 = vrot.slane %v366_v60, %v5667_v10 }
  0xd5   :  { %v219_v62 = vpop.permute.xlu1 %218  ;;  %v217_v63 = vpop.permute.xlu0 %216 }
  0xd6   :  { %v227_v7 = vsel %vm224_vm3, %v217_v63, %v219_v62 }
  0xd7   :  { %v253_v14 = vmul.f32 %v239_v57, %v227_v7 }
  0xd9   :  { %v223_v21 = vpop.permute.xlu1 %222  ;;  %v221_v22 = vpop.permute.xlu0 %220  ;;  %v4965_v23 = vpack.c.bf16 %v253_v14, %v209_v12 }
  0xda   :  { %v228_v25 = vsel %vm224_vm3, %v223_v21, %v217_v63  ;;  %v225_v26 = vsel %vm224_vm3, %v221_v22, %v223_v21  ;;  %v226_v27 = vsel %vm224_vm3, %v219_v62, %v221_v22  ;;  %v339_v62 = vrot.slane %v322_v61, %v5674_v16 }
  0xdb   :  { %v252_v29 = vmul.f32 %v235_v8, %v228_v25  ;;  %v254_v30 = vmul.f32 %v243_v11, %v226_v27  ;;  %v255_v31 = vmul.f32 %v247_v18, %v225_v26  ;;  %4966 = vmatprep.subr.bf16.mxu0 %v4965_v23  ;;  %v331_v63 = vrot.slane %v322_v61, %v5667_v10 }
  0xdc   :  { %v335_v11 = vrot.slane %v322_v61, %v5677_v17  ;;  %v383_v18 = vrot.slane %v366_v60, %v5674_v16  ;;  %v327_v21 = vrot.slane %v322_v61, %v5671_v15 }
  0xdd   :  { %v267_v33 = vpop.permute.xlu1 %266  ;;  %v265_v34 = vpop.permute.xlu0 %264  ;;  %v4967_v35 = vpack.c.bf16 %v252_v29, %v208_v20  ;;  %v4987_v36 = vpack.c.bf16 %v255_v31, %v211_v28  ;;  %v4989_v37 = vpack.c.bf16 %v254_v30, %v210_v24  ;;  %v379_v20 = vrot.slane %v366_v60, %v5677_v17 }
  0xde   :  { %v275_v40 = vsel %vm272_vm4, %v265_v34, %v267_v33 }
  0xdf   :  { %4968 = vmatpush1.bf16.msra.mxu0 %v4967_v35  ;;  %4988 = vmatprep.subr.bf16.mxu1 %v4987_v36  ;;  %v300_v45 = vmul.f32 %v283_v38, %v275_v40  ;;  %v410_v36 = vld [vmem:[#allocation6 + $0x20] sm:$0xf] }
  0xe0   :  { %4990 = vmatpush1.bf16.msra.mxu1 %v4989_v37 }
  0xe1   :  { %v271_v43 = vpop.permute.xlu1 %270  ;;  %v269_v44 = vpop.permute.xlu0 %268  ;;  %v4971_v57 = vpack.c.bf16 %v300_v45, %v5590_v1  ;;  %v427_v45 = vrot.slane %v410_v36, %v5674_v16 }
  0xe2   :  { %v276_v46 = vsel %vm272_vm4, %v271_v43, %v265_v34  ;;  %v273_v47 = vsel %vm272_vm4, %v269_v44, %v271_v43  ;;  %v274_v48 = vsel %vm272_vm4, %v267_v33, %v269_v44  ;;  %v415_v43 = vrot.slane %v410_v36, %v5671_v15 }
  0xe3   :  { %v303_v49 = vmul.f32 %v295_v39, %v276_v46  ;;  %v301_v50 = vmul.f32 %v287_v41, %v274_v48  ;;  %v302_v51 = vmul.f32 %v291_v42, %v273_v47  ;;  %v419_v47 = vrot.slane %v410_v36, %v5667_v10 }
  0xe4   :  { %v423_v48 = vrot.slane %v410_v36, %v5677_v17 }
  0xe5   :  { %v311_v52 = vpop.permute.xlu1 %310  ;;  %v309_v53 = vpop.permute.xlu0 %308  ;;  %v4969_v54 = vpack.c.bf16 %v301_v50, %v5598_v3  ;;  %v4991_v55 = vpack.c.bf16 %v303_v49, %v5596_v2  ;;  %v4993_v56 = vpack.c.bf16 %v302_v51, %v5588_v0 }
  0xe6   :  { %v319_v23 = vsel %vm316_vm6, %v309_v53, %v311_v52 }
  0xe7   :  { %4970 = vmatprep.subr.bf16.mxu0 %v4969_v54  ;;  %4992 = vmatprep.subr.bf16.mxu1 %v4991_v55  ;;  %v344_v37 = vmul.f32 %v327_v21, %v319_v23  ;;  %v644_v21 = vld [vmem:[#allocation6] sm:$0xf]  ;;  %v686_v23 = vld [vmem:[#allocation6 + $0x4] sm:$0xf] }
  0xe8   :  { %4972 = vmatpush1.bf16.msra.mxu0 %v4971_v57  ;;  %4994 = vmatpush1.bf16.msra.mxu1 %v4993_v56  ;;  %v691_v36 = vrot.slane %v686_v23, %v5671_v15 }
  0xe9   :  { %v315_v58 = vpop.permute.xlu1 %314  ;;  %v313_v59 = vpop.permute.xlu0 %312 }
  0xea   :  { %v320_v8 = vsel %vm316_vm6, %v315_v58, %v309_v53  ;;  %v318_v12 = vsel %vm316_vm6, %v311_v52, %v313_v59  ;;  %v317_v22 = vsel %vm316_vm6, %v313_v59, %v315_v58  ;;  %v5513_v59 = vmov 1.0  }
  0xeb   :  { %v347_v24 = vmul.f32 %v339_v62, %v320_v8  ;;  %v345_v25 = vmul.f32 %v331_v63, %v318_v12  ;;  %v346_v32 = vmul.f32 %v335_v11, %v317_v22  ;;  %v82_v63 = vld [vmem:[#allocation8] sm:$0xff] }
  0xed   :  { %v355_v5 = vpop.permute.xlu1 %354  ;;  %v353_v7 = vpop.permute.xlu0 %352 }
  0xee   :  { %v363_v14 = vsel %vm360_vm5, %v353_v7, %v355_v5 }
  0xef   :  { %v388_v28 = vmul.f32 %v371_v13, %v363_v14 }
  0xf1   :  { %v359_v26 = vpop.permute.xlu1 %358  ;;  %v357_v27 = vpop.permute.xlu0 %356  ;;  %v4975_v44 = vpack.c.bf16 %v388_v28, %v344_v37  ;;  %v703_v37 = vrot.slane %v686_v23, %v5674_v16 }
  0xf2   :  { %v364_v29 = vsel %vm360_vm5, %v359_v26, %v353_v7  ;;  %v361_v30 = vsel %vm360_vm5, %v357_v27, %v359_v26  ;;  %v362_v31 = vsel %vm360_vm5, %v355_v5, %v357_v27  ;;  %v695_v26 = vrot.slane %v686_v23, %v5667_v10 }
  0xf3   :  { %v391_v33 = vmul.f32 %v383_v18, %v364_v29  ;;  %v389_v34 = vmul.f32 %v375_v19, %v362_v31  ;;  %v390_v35 = vmul.f32 %v379_v20, %v361_v30  ;;  %v649_v30 = vrot.slane %v644_v21, %v5671_v15 }
  0xf4   :  { %v661_v31 = vrot.slane %v644_v21, %v5674_v16 }
  0xf5   :  { %v399_v38 = vpop.permute.xlu1 %398  ;;  %v397_v39 = vpop.permute.xlu0 %396  ;;  %v4973_v40 = vpack.c.bf16 %v389_v34, %v345_v25  ;;  %v4995_v41 = vpack.c.bf16 %v391_v33, %v347_v24  ;;  %v4997_v42 = vpack.c.bf16 %v390_v35, %v346_v32  ;;  %v653_v25 = vrot.slane %v644_v21, %v5667_v10 }
  0xf6   :  { %v407_v46 = vsel %vm404_vm7, %v397_v39, %v399_v38  ;;  %v699_v33 = vrot.slane %v686_v23, %v5677_v17 }
  0xf7   :  { %4974 = vmatprep.subr.bf16.mxu0 %v4973_v40  ;;  %4996 = vmatprep.subr.bf16.mxu1 %v4995_v41  ;;  %v432_v51 = vmul.f32 %v415_v43, %v407_v46 }
  0xf8   :  { %4976 = vmatpush1.bf16.msra.mxu0 %v4975_v44  ;;  %4998 = vmatpush1.bf16.msra.mxu1 %v4997_v42 }
  0xf9   :  { %v403_v49 = vpop.permute.xlu1 %402  ;;  %v401_v50 = vpop.permute.xlu0 %400  ;;  %v4980_v62 = vpack.c.bf16 %v5513_v59, %v432_v51 }
  0xfa   :  { %v408_v52 = vsel %vm404_vm7, %v403_v49, %v397_v39  ;;  %v405_v53 = vsel %vm404_vm7, %v401_v50, %v403_v49  ;;  %v406_v54 = vsel %vm404_vm7, %v399_v38, %v401_v50  ;;  %v657_v38 = vrot.slane %v644_v21, %v5677_v17 }
  0xfb   :  { %v435_v55 = vmul.f32 %v427_v45, %v408_v52  ;;  %v433_v56 = vmul.f32 %v419_v47, %v406_v54  ;;  %v434_v57 = vmul.f32 %v423_v48, %v405_v53 }
  0xfd   :  { %v4999_v6 = vpack.c.bf16 %v5513_v59, %v435_v55  ;;  %v4977_v60 = vpack.c.bf16 %v5513_v59, %v433_v56  ;;  %v5002_v61 = vpack.c.bf16 %v5513_v59, %v434_v57 }
  0xff   :  { %4979 = vmatprep.subr.msk.bf16.mxu0 %vm5787_vm10, %v4977_v60  ;;  %5001 = vmatprep.subr.msk.bf16.mxu1 %vm5787_vm10, %v4999_v6  ;;  %v728_v60 = vld [vmem:[#allocation6 + $0x8] sm:$0xf] }
 0x100   :  { %4982 = vmatpush1.bf16.msk.msra.mxu0 %vm5787_vm10, %v4980_v62  ;;  %5004 = vmatpush1.bf16.msk.msra.mxu1 %vm5787_vm10, %v5002_v61  ;;  %v770_v62 = vld [vmem:[#allocation6 + $0xc] sm:$0xf]  ;;  %v745_v21 = vrot.slane %v728_v60, %v5674_v16 }
 0x101   :  { %v783_v23 = vrot.slane %v770_v62, %v5677_v17 }
 0x103   :  { %4907 = vmatmul.mubr.msk.f32.vlgmr.msra.gmra.mrb[0].mxu0 %vm480_vm11, %v82_v63  ;;  %4908 = vmatmul.mubr.msk.f32.vlgmr.msra.gmra.mrb[0].mxu1 %vm480_vm11, %v82_v63 }
 0x104   :  { %1079 = vmatprep.mubr.f32.mxu0 %v5510_v4  ;;  %1150 = vmatprep.mubr.f32.mxu1 %v5510_v4 }
 0x1d6   :  { %v550_v5 = vpop.f32.mrb[0].mxu0  ;;  %v621_v7 = vpop.f32.mrb[0].mxu1 }
 0x1d7   :  { %v5807_v8 = vmax.f32 %v550_v5, 0.0  ;;  %v552_v11 = vpop.f32.mrb[1].mxu0  ;;  %v623_v12 = vpop.f32.mrb[1].mxu1  ;;  %v5813_v14 = vmax.f32 %v621_v7, 0.0  ;;  %v737_v5 = vrot.slane %v728_v60, %v5667_v10  ;;  %v779_v7 = vrot.slane %v770_v62, %v5667_v10 }
 0x1d8   :  { %v5809_v13 = vmax.f32 %v552_v11, 0.0  ;;  %v5817_v18 = vmax.f32 %v623_v12, 0.0 }
 0x1d9   :  { %632 = vrot.lane.b32.xlu0 %v5807_v8, %s5503_s12 }
 0x1da   :  { %634 = vrot.lane.b32.xlu1 %v5809_v13, %s5503_s12 }
 0x1dd   :  { %636 = vrot.lane.b32.xlu0 %v5813_v14, %s5503_s12 }
 0x1de   :  { %638 = vrot.lane.b32.xlu1 %v5817_v18, %s5503_s12 }
 0x1e1   :  { %674 = vrot.lane.b32.xlu0 %v5807_v8, %s5504_s3 }
 0x1e2   :  { %676 = vrot.lane.b32.xlu1 %v5809_v13, %s5504_s3 }
 0x1e5   :  { %678 = vrot.lane.b32.xlu0 %v5813_v14, %s5504_s3 }
 0x1e6   :  { %680 = vrot.lane.b32.xlu1 %v5817_v18, %s5504_s3 }
 0x1e9   :  { %716 = vrot.lane.b32.xlu0 %v5807_v8, %s5505_s13 }
 0x1ea   :  { %718 = vrot.lane.b32.xlu1 %v5809_v13, %s5505_s13 }
 0x1ed   :  { %720 = vrot.lane.b32.xlu0 %v5813_v14, %s5505_s13 }
 0x1ee   :  { %722 = vrot.lane.b32.xlu1 %v5817_v18, %s5505_s13 }
 0x1f1   :  { %758 = vrot.lane.b32.xlu0 %v5807_v8, %s5506_s1 }
 0x1f2   :  { %760 = vrot.lane.b32.xlu1 %v5809_v13, %s5506_s1 }
 0x1f5   :  { %762 = vrot.lane.b32.xlu0 %v5813_v14, %s5506_s1 }
 0x1f6   :  { %764 = vrot.lane.b32.xlu1 %v5817_v18, %s5506_s1 }
 0x1f9   :  { %804 = vrot.lane.b32.xlu0 %v5807_v8, %s5507_s14 }
 0x1fa   :  { %806 = vrot.lane.b32.xlu1 %v5809_v13, %s5507_s14 }
 0x1fd   :  { %808 = vrot.lane.b32.xlu0 %v5813_v14, %s5507_s14 }
 0x1fe   :  { %810 = vrot.lane.b32.xlu1 %v5817_v18, %s5507_s14 }
 0x201   :  { %846 = vrot.lane.b32.xlu0 %v5807_v8, %s5508_s15 }
 0x202   :  { %848 = vrot.lane.b32.xlu1 %v5809_v13, %s5508_s15 }
 0x205   :  { %850 = vrot.lane.b32.xlu0 %v5813_v14, %s5508_s15 }
 0x206   :  { %852 = vrot.lane.b32.xlu1 %v5817_v18, %s5508_s15 }
 0x209   :  { %888 = vrot.lane.b32.xlu0 %v5807_v8, %s5509_s16 }
 0x20a   :  { %890 = vrot.lane.b32.xlu1 %v5809_v13, %s5509_s16 }
 0x20d   :  { %892 = vrot.lane.b32.xlu0 %v5813_v14, %s5509_s16 }
 0x20e   :  { %894 = vrot.lane.b32.xlu1 %v5817_v18, %s5509_s16 }
 0x211   :  { %930 = vrot.lane.b32.xlu0 %v5807_v8, %s5511_s17 }
 0x212   :  { %932 = vrot.lane.b32.xlu1 %v5809_v13, %s5511_s17 }
 0x215   :  { %934 = vrot.lane.b32.xlu0 %v5813_v14, %s5511_s17 }
 0x216   :  { %936 = vrot.lane.b32.xlu1 %v5817_v18, %s5511_s17 }
 0x24b   :  { %v633_v19 = vpop.permute.xlu0 %632 }
 0x24c   :  { %v635_v20 = vpop.permute.xlu1 %634 }
 0x24d   :  { %v642_v27 = vsel %vm93_vm0, %v633_v19, %v635_v20 }
 0x24e   :  { %v667_v34 = vmul.f32 %v653_v25, %v642_v27  ;;  %v787_v27 = vrot.slane %v770_v62, %v5674_v16 }
 0x24f   :  { %v637_v22 = vpop.permute.xlu0 %636 }
 0x250   :  { %v639_v24 = vpop.permute.xlu1 %638  ;;  %v641_v42 = vsel %vm93_vm0, %v635_v20, %v637_v22  ;;  %v733_v20 = vrot.slane %v728_v60, %v5671_v15 }
 0x251   :  { %v640_v39 = vsel %vm93_vm0, %v637_v22, %v639_v24  ;;  %v643_v40 = vsel %vm93_vm0, %v639_v24, %v633_v19  ;;  %v668_v53 = vmul.f32 %v657_v38, %v641_v42 }
 0x252   :  { %v666_v49 = vmul.f32 %v649_v30, %v643_v40  ;;  %v669_v50 = vmul.f32 %v661_v31, %v640_v39  ;;  %v816_v39 = vld [vmem:[#allocation6 + $0x14] sm:$0xf] }
 0x253   :  { %v675_v28 = vpop.permute.xlu0 %674 }
 0x254   :  { %v677_v29 = vpop.permute.xlu1 %676 }
 0x255   :  { %v684_v32 = vsel %vm136_vm1, %v675_v28, %v677_v29 }
 0x256   :  { %v709_v35 = vmul.f32 %v695_v26, %v684_v32  ;;  %v775_v26 = vrot.slane %v770_v62, %v5671_v15 }
 0x257   :  { %v679_v41 = vpop.permute.xlu0 %678 }
 0x258   :  { %v683_v43 = vsel %vm136_vm1, %v677_v29, %v679_v41  ;;  %v681_v44 = vpop.permute.xlu1 %680  ;;  %v5005_v45 = vpack.c.bf16 %v709_v35, %v667_v34 }
 0x259   :  { %v710_v46 = vmul.f32 %v699_v33, %v683_v43  ;;  %v682_v47 = vsel %vm136_vm1, %v679_v41, %v681_v44  ;;  %v685_v48 = vsel %vm136_vm1, %v681_v44, %v675_v28  ;;  %v741_v28 = vrot.slane %v728_v60, %v5677_v17 }
 0x25a   :  { %v708_v51 = vmul.f32 %v691_v36, %v685_v48  ;;  %v711_v52 = vmul.f32 %v703_v37, %v682_v47  ;;  %5006 = vmatprep.subr.bf16.mxu0 %v5005_v45  ;;  %v821_v47 = vrot.slane %v816_v39, %v5671_v15 }
 0x25b   :  { %v717_v54 = vpop.permute.xlu0 %716  ;;  %v5029_v6 = vpack.c.bf16 %v710_v46, %v668_v53  ;;  %v829_v53 = vrot.slane %v816_v39, %v5677_v17 }
 0x25c   :  { %v5007_v55 = vpack.c.bf16 %v708_v51, %v666_v49  ;;  %v719_v56 = vpop.permute.xlu1 %718  ;;  %v5027_v57 = vpack.c.bf16 %v711_v52, %v669_v50  ;;  %v825_v52 = vrot.slane %v816_v39, %v5667_v10 }
 0x25d   :  { %v726_v11 = vsel %vm180_vm2, %v717_v54, %v719_v56 }
 0x25e   :  { %5008 = vmatpush1.bf16.msra.mxu0 %v5007_v55  ;;  %5028 = vmatprep.subr.bf16.mxu1 %v5027_v57  ;;  %v751_v24 = vmul.f32 %v737_v5, %v726_v11 }
 0x25f   :  { %v721_v61 = vpop.permute.xlu0 %720  ;;  %5030 = vmatpush1.bf16.msra.mxu1 %v5029_v6 }
 0x260   :  { %v723_v63 = vpop.permute.xlu1 %722  ;;  %v725_v32 = vsel %vm180_vm2, %v719_v56, %v721_v61 }
 0x261   :  { %v724_v29 = vsel %vm180_vm2, %v721_v61, %v723_v63  ;;  %v727_v30 = vsel %vm180_vm2, %v723_v63, %v717_v54  ;;  %v752_v44 = vmul.f32 %v741_v28, %v725_v32  ;;  %v833_v54 = vrot.slane %v816_v39, %v5674_v16 }
 0x262   :  { %v750_v40 = vmul.f32 %v733_v20, %v727_v30  ;;  %v753_v41 = vmul.f32 %v745_v21, %v724_v29 }
 0x263   :  { %v759_v12 = vpop.permute.xlu0 %758 }
 0x264   :  { %v761_v19 = vpop.permute.xlu1 %760 }
 0x265   :  { %v768_v22 = vsel %vm224_vm3, %v759_v12, %v761_v19 }
 0x266   :  { %v793_v25 = vmul.f32 %v779_v7, %v768_v22 }
 0x267   :  { %v763_v31 = vpop.permute.xlu0 %762 }
 0x268   :  { %v767_v33 = vsel %vm224_vm3, %v761_v19, %v763_v31  ;;  %v765_v34 = vpop.permute.xlu1 %764  ;;  %v5009_v35 = vpack.c.bf16 %v793_v25, %v751_v24  ;;  %v858_v24 = vld [vmem:[#allocation6 + $0x18] sm:$0xf]  ;;  %v900_v25 = vld [vmem:[#allocation6 + $0x1c] sm:$0xf] }
 0x269   :  { %v794_v36 = vmul.f32 %v783_v23, %v767_v33  ;;  %v766_v37 = vsel %vm224_vm3, %v763_v31, %v765_v34  ;;  %v769_v38 = vsel %vm224_vm3, %v765_v34, %v759_v12  ;;  %v909_v30 = vrot.slane %v900_v25, %v5667_v10 }
 0x26a   :  { %v792_v42 = vmul.f32 %v775_v26, %v769_v38  ;;  %v795_v43 = vmul.f32 %v787_v27, %v766_v37  ;;  %5010 = vmatprep.subr.bf16.mxu0 %v5009_v35  ;;  %v863_v27 = vrot.slane %v858_v24, %v5671_v15  ;;  %v875_v32 = vrot.slane %v858_v24, %v5674_v16 }
 0x26b   :  { %v805_v45 = vpop.permute.xlu0 %804  ;;  %v5033_v50 = vpack.c.bf16 %v794_v36, %v752_v44  ;;  %v913_v33 = vrot.slane %v900_v25, %v5677_v17  ;;  %v917_v34 = vrot.slane %v900_v25, %v5674_v16 }
 0x26c   :  { %v5011_v46 = vpack.c.bf16 %v792_v42, %v750_v40  ;;  %v807_v48 = vpop.permute.xlu1 %806  ;;  %v5031_v49 = vpack.c.bf16 %v795_v43, %v753_v41 }
 0x26d   :  { %v814_v51 = vsel %vm272_vm4, %v805_v45, %v807_v48 }
 0x26e   :  { %5012 = vmatpush1.bf16.msra.mxu0 %v5011_v46  ;;  %5032 = vmatprep.subr.bf16.mxu1 %v5031_v49  ;;  %v838_v56 = vmul.f32 %v821_v47, %v814_v51  ;;  %v942_v46 = vld [vmem:[#allocation6 + $0x20] sm:$0xf] }
 0x26f   :  { %v809_v55 = vpop.permute.xlu0 %808  ;;  %5034 = vmatpush1.bf16.msra.mxu1 %v5033_v50 }
 0x270   :  { %v813_v57 = vsel %vm272_vm4, %v807_v48, %v809_v55  ;;  %v811_v6 = vpop.permute.xlu1 %810  ;;  %v5015_v12 = vpack.c.bf16 %v838_v56, %v5807_v8  ;;  %v905_v8 = vrot.slane %v900_v25, %v5671_v15 }
 0x271   :  { %v839_v60 = vmul.f32 %v825_v52, %v813_v57  ;;  %v812_v61 = vsel %vm272_vm4, %v809_v55, %v811_v6  ;;  %v815_v62 = vsel %vm272_vm4, %v811_v6, %v805_v45  ;;  %v947_v55 = vrot.slane %v942_v46, %v5671_v15 }
 0x272   :  { %v840_v63 = vmul.f32 %v829_v53, %v812_v61  ;;  %v841_v5 = vmul.f32 %v833_v54, %v815_v62  ;;  %v955_v61 = vrot.slane %v942_v46, %v5677_v17  ;;  %v959_v62 = vrot.slane %v942_v46, %v5674_v16 }
 0x273   :  { %v847_v7 = vpop.permute.xlu0 %846  ;;  %v5013_v11 = vpack.c.bf16 %v839_v60, %v5809_v13  ;;  %v867_v13 = vrot.slane %v858_v24, %v5667_v10  ;;  %v951_v60 = vrot.slane %v942_v46, %v5667_v10 }
 0x274   :  { %v5037_v19 = vpack.c.bf16 %v840_v63, %v5813_v14  ;;  %v849_v20 = vpop.permute.xlu1 %848  ;;  %v5035_v21 = vpack.c.bf16 %v841_v5, %v5817_v18  ;;  %v871_v18 = vrot.slane %v858_v24, %v5677_v17 }
 0x275   :  { %5014 = vmatprep.subr.bf16.mxu0 %v5013_v11  ;;  %v856_v14 = vsel %vm316_vm6, %v847_v7, %v849_v20 }
 0x276   :  { %5016 = vmatpush1.bf16.msra.mxu0 %v5015_v12  ;;  %5036 = vmatprep.subr.bf16.mxu1 %v5035_v21  ;;  %v880_v38 = vmul.f32 %v863_v27, %v856_v14  ;;  %v631_v27 = vld [vmem:[#allocation8 + $0x8] sm:$0xff] }
 0x277   :  { %v851_v22 = vpop.permute.xlu0 %850  ;;  %5038 = vmatpush1.bf16.msra.mxu1 %v5037_v19 }
 0x278   :  { %v853_v23 = vpop.permute.xlu1 %852  ;;  %v855_v31 = vsel %vm316_vm6, %v849_v20, %v851_v22 }
 0x279   :  { %v854_v35 = vsel %vm316_vm6, %v851_v22, %v853_v23  ;;  %v857_v36 = vsel %vm316_vm6, %v853_v23, %v847_v7  ;;  %v881_v42 = vmul.f32 %v867_v13, %v855_v31 }
 0x27a   :  { %v882_v47 = vmul.f32 %v871_v18, %v854_v35  ;;  %v883_v48 = vmul.f32 %v875_v32, %v857_v36  ;;  %v1217_v32 = vld [vmem:[#allocation6 + $0x4] sm:$0xf] }
 0x27b   :  { %v889_v26 = vpop.permute.xlu0 %888  ;;  %v1226_v35 = vrot.slane %v1217_v32, %v5667_v10  ;;  %v1234_v46 = vrot.slane %v1217_v32, %v5674_v16 }
 0x27c   :  { %v891_v28 = vpop.permute.xlu1 %890 }
 0x27d   :  { %v898_v29 = vsel %vm360_vm5, %v889_v26, %v891_v28 }
 0x27e   :  { %v922_v39 = vmul.f32 %v905_v8, %v898_v29 }
 0x27f   :  { %v893_v37 = vpop.permute.xlu0 %892 }
 0x280   :  { %v897_v40 = vsel %vm360_vm5, %v891_v28, %v893_v37  ;;  %v895_v41 = vpop.permute.xlu1 %894  ;;  %v5019_v53 = vpack.c.bf16 %v922_v39, %v880_v38 }
 0x281   :  { %v923_v43 = vmul.f32 %v909_v30, %v897_v40  ;;  %v896_v44 = vsel %vm360_vm5, %v893_v37, %v895_v41  ;;  %v899_v45 = vsel %vm360_vm5, %v895_v41, %v889_v26 }
 0x282   :  { %v924_v49 = vmul.f32 %v913_v33, %v896_v44  ;;  %v925_v50 = vmul.f32 %v917_v34, %v899_v45  ;;  %v1222_v45 = vrot.slane %v1217_v32, %v5671_v15 }
 0x283   :  { %v931_v51 = vpop.permute.xlu0 %930  ;;  %v5017_v52 = vpack.c.bf16 %v923_v43, %v881_v42  ;;  %v1230_v42 = vrot.slane %v1217_v32, %v5677_v17 }
 0x284   :  { %v5041_v54 = vpack.c.bf16 %v924_v49, %v882_v47  ;;  %v933_v56 = vpop.permute.xlu1 %932  ;;  %v5039_v57 = vpack.c.bf16 %v925_v50, %v883_v48 }
 0x285   :  { %v940_v6 = vsel %vm404_vm7, %v931_v51, %v933_v56  ;;  %5018 = vmatprep.subr.bf16.mxu0 %v5017_v52 }
 0x286   :  { %5020 = vmatpush1.bf16.msra.mxu0 %v5019_v53  ;;  %5040 = vmatprep.subr.bf16.mxu1 %v5039_v57  ;;  %v964_v5 = vmul.f32 %v947_v55, %v940_v6 }
 0x287   :  { %v935_v63 = vpop.permute.xlu0 %934  ;;  %5042 = vmatpush1.bf16.msra.mxu1 %v5041_v54 }
 0x288   :  { %v939_v7 = vsel %vm404_vm7, %v933_v56, %v935_v63  ;;  %v937_v11 = vpop.permute.xlu1 %936  ;;  %v5024_v24 = vpack.c.bf16 %v5513_v59, %v964_v5 }
 0x289   :  { %v965_v12 = vmul.f32 %v951_v60, %v939_v7  ;;  %v938_v19 = vsel %vm404_vm7, %v935_v63, %v937_v11  ;;  %v941_v20 = vsel %vm404_vm7, %v937_v11, %v931_v51 }
 0x28a   :  { %v966_v21 = vmul.f32 %v955_v61, %v938_v19  ;;  %v967_v22 = vmul.f32 %v959_v62, %v941_v20  ;;  %v1259_v20 = vld [vmem:[#allocation6 + $0x8] sm:$0xf] }
 0x28b   :  { %v5021_v23 = vpack.c.bf16 %v5513_v59, %v965_v12 }
 0x28c   :  { %v5043_v25 = vpack.c.bf16 %v5513_v59, %v967_v22  ;;  %v5046_v26 = vpack.c.bf16 %v5513_v59, %v966_v21  ;;  %v1301_v22 = vld [vmem:[#allocation6 + $0xc] sm:$0xf] }
 0x28d   :  { %5023 = vmatprep.subr.msk.bf16.mxu0 %vm5787_vm10, %v5021_v23  ;;  %v1318_v32 = vrot.slane %v1301_v22, %v5674_v16 }
 0x28e   :  { %5026 = vmatpush1.bf16.msk.msra.mxu0 %vm5787_vm10, %v5024_v24  ;;  %5045 = vmatprep.subr.msk.bf16.mxu1 %vm5787_vm10, %v5043_v25  ;;  %v1268_v24 = vrot.slane %v1259_v20, %v5667_v10  ;;  %v1310_v25 = vrot.slane %v1301_v22, %v5667_v10 }
 0x28f   :  { %5048 = vmatpush1.bf16.msk.msra.mxu1 %vm5787_vm10, %v5046_v26 }
 0x291   :  { %4909 = vmatmul.mubr.msk.f32.vlgmr.msra.gmra.mrb[2].mxu0 %vm480_vm11, %v631_v27 }
 0x292   :  { %4910 = vmatmul.mubr.msk.f32.vlgmr.msra.gmra.mrb[2].mxu1 %vm480_vm11, %v631_v27  ;;  %1610 = vmatprep.mubr.f32.mxu0 %v5510_v4 }
 0x293   :  { %1681 = vmatprep.mubr.f32.mxu1 %v5510_v4 }
 0x364   :  { %v1081_v13 = vpop.f32.mrb[2].mxu0 }
 0x365   :  { %v5996_v8 = vadd.f32 %v1081_v13, %v5590_v1  ;;  %v1083_v28 = vpop.f32.mrb[3].mxu0  ;;  %v1152_v14 = vpop.f32.mrb[2].mxu1 }
 0x366   :  { %v5999_v18 = vadd.f32 %v1083_v28, %v5598_v3  ;;  %v1154_v29 = vpop.f32.mrb[3].mxu1  ;;  %v6004_v30 = vadd.f32 %v1152_v14, %v5588_v0  ;;  %v1264_v28 = vrot.slane %v1259_v20, %v5671_v15  ;;  %v1276_v14 = vrot.slane %v1259_v20, %v5674_v16 }
 0x367   :  { %1163 = vrot.lane.b32.xlu0 %v5996_v8, %s5503_s12  ;;  %v6009_v31 = vadd.f32 %v1154_v29, %v5596_v2  ;;  %v1175_v2 = vld [vmem:[#allocation6] sm:$0xf] }
 0x368   :  { %1165 = vrot.lane.b32.xlu1 %v5999_v18, %s5503_s12  ;;  %v1184_v34 = vrot.slane %v1175_v2, %v5667_v10  ;;  %v1180_v39 = vrot.slane %v1175_v2, %v5671_v15  ;;  %v1192_v40 = vrot.slane %v1175_v2, %v5674_v16  ;;  %v1188_v47 = vrot.slane %v1175_v2, %v5677_v17 }
 0x36b   :  { %1167 = vrot.lane.b32.xlu0 %v6004_v30, %s5503_s12 }
 0x36c   :  { %1169 = vrot.lane.b32.xlu1 %v6009_v31, %s5503_s12 }
 0x36f   :  { %1205 = vrot.lane.b32.xlu0 %v5996_v8, %s5504_s3 }
 0x370   :  { %1207 = vrot.lane.b32.xlu1 %v5999_v18, %s5504_s3 }
 0x373   :  { %1209 = vrot.lane.b32.xlu0 %v6004_v30, %s5504_s3 }
 0x374   :  { %1211 = vrot.lane.b32.xlu1 %v6009_v31, %s5504_s3 }
 0x377   :  { %1247 = vrot.lane.b32.xlu0 %v5996_v8, %s5505_s13 }
 0x378   :  { %1249 = vrot.lane.b32.xlu1 %v5999_v18, %s5505_s13 }
 0x37b   :  { %1251 = vrot.lane.b32.xlu0 %v6004_v30, %s5505_s13 }
 0x37c   :  { %1253 = vrot.lane.b32.xlu1 %v6009_v31, %s5505_s13 }
 0x37f   :  { %1289 = vrot.lane.b32.xlu0 %v5996_v8, %s5506_s1 }
 0x380   :  { %1291 = vrot.lane.b32.xlu1 %v5999_v18, %s5506_s1 }
 0x383   :  { %1293 = vrot.lane.b32.xlu0 %v6004_v30, %s5506_s1 }
 0x384   :  { %1295 = vrot.lane.b32.xlu1 %v6009_v31, %s5506_s1 }
 0x387   :  { %1335 = vrot.lane.b32.xlu0 %v5996_v8, %s5507_s14 }
 0x388   :  { %1337 = vrot.lane.b32.xlu1 %v5999_v18, %s5507_s14 }
 0x38b   :  { %1339 = vrot.lane.b32.xlu0 %v6004_v30, %s5507_s14 }
 0x38c   :  { %1341 = vrot.lane.b32.xlu1 %v6009_v31, %s5507_s14 }
 0x38f   :  { %1377 = vrot.lane.b32.xlu0 %v5996_v8, %s5508_s15 }
 0x390   :  { %1379 = vrot.lane.b32.xlu1 %v5999_v18, %s5508_s15 }
 0x393   :  { %1381 = vrot.lane.b32.xlu0 %v6004_v30, %s5508_s15 }
 0x394   :  { %1383 = vrot.lane.b32.xlu1 %v6009_v31, %s5508_s15 }
 0x397   :  { %1419 = vrot.lane.b32.xlu0 %v5996_v8, %s5509_s16 }
 0x398   :  { %1421 = vrot.lane.b32.xlu1 %v5999_v18, %s5509_s16 }
 0x39b   :  { %1423 = vrot.lane.b32.xlu0 %v6004_v30, %s5509_s16 }
 0x39c   :  { %1425 = vrot.lane.b32.xlu1 %v6009_v31, %s5509_s16 }
 0x39f   :  { %1461 = vrot.lane.b32.xlu0 %v5996_v8, %s5511_s17 }
 0x3a0   :  { %1463 = vrot.lane.b32.xlu1 %v5999_v18, %s5511_s17 }
 0x3a3   :  { %1465 = vrot.lane.b32.xlu0 %v6004_v30, %s5511_s17 }
 0x3a4   :  { %1467 = vrot.lane.b32.xlu1 %v6009_v31, %s5511_s17 }
 0x3d9   :  { %v1164_v0 = vpop.permute.xlu0 %1163 }
 0x3da   :  { %v1166_v1 = vpop.permute.xlu1 %1165 }
 0x3db   :  { %v1173_v36 = vsel %vm93_vm0, %v1164_v0, %v1166_v1 }
 0x3dc   :  { %v1198_v43 = vmul.f32 %v1184_v34, %v1173_v36 }
 0x3dd   :  { %v1168_v3 = vpop.permute.xlu0 %1167 }
 0x3de   :  { %v1170_v33 = vpop.permute.xlu1 %1169  ;;  %v1172_v51 = vsel %vm93_vm0, %v1166_v1, %v1168_v3 }
 0x3df   :  { %v1171_v48 = vsel %vm93_vm0, %v1168_v3, %v1170_v33  ;;  %v1174_v49 = vsel %vm93_vm0, %v1170_v33, %v1164_v0  ;;  %v1199_v63 = vmul.f32 %v1188_v47, %v1172_v51  ;;  %v1314_v0 = vrot.slane %v1301_v22, %v5677_v17 }
 0x3e0   :  { %v1197_v6 = vmul.f32 %v1180_v39, %v1174_v49  ;;  %v1200_v60 = vmul.f32 %v1192_v40, %v1171_v48  ;;  %v1306_v3 = vrot.slane %v1301_v22, %v5671_v15  ;;  %v1272_v33 = vrot.slane %v1259_v20, %v5677_v17 }
 0x3e1   :  { %v1206_v37 = vpop.permute.xlu0 %1205 }
 0x3e2   :  { %v1208_v38 = vpop.permute.xlu1 %1207 }
 0x3e3   :  { %v1215_v41 = vsel %vm136_vm1, %v1206_v37, %v1208_v38 }
 0x3e4   :  { %v1240_v44 = vmul.f32 %v1226_v35, %v1215_v41 }
 0x3e5   :  { %v1210_v50 = vpop.permute.xlu0 %1209 }
 0x3e6   :  { %v1214_v52 = vsel %vm136_vm1, %v1208_v38, %v1210_v50  ;;  %v1212_v53 = vpop.permute.xlu1 %1211  ;;  %v5049_v54 = vpack.c.bf16 %v1240_v44, %v1198_v43  ;;  %v1347_v44 = vld [vmem:[#allocation6 + $0x14] sm:$0xf] }
 0x3e7   :  { %v1241_v55 = vmul.f32 %v1230_v42, %v1214_v52  ;;  %v1213_v56 = vsel %vm136_vm1, %v1210_v50, %v1212_v53  ;;  %v1216_v57 = vsel %vm136_vm1, %v1212_v53, %v1206_v37  ;;  %v1352_v52 = vrot.slane %v1347_v44, %v5671_v15 }
 0x3e8   :  { %v1239_v61 = vmul.f32 %v1222_v45, %v1216_v57  ;;  %v1242_v62 = vmul.f32 %v1234_v46, %v1213_v56  ;;  %5050 = vmatprep.subr.bf16.mxu0 %v5049_v54  ;;  %v1356_v57 = vrot.slane %v1347_v44, %v5667_v10 }
 0x3e9   :  { %v1248_v5 = vpop.permute.xlu0 %1247  ;;  %v5073_v19 = vpack.c.bf16 %v1241_v55, %v1199_v63 }
 0x3ea   :  { %v5051_v7 = vpack.c.bf16 %v1239_v61, %v1197_v6  ;;  %v1250_v11 = vpop.permute.xlu1 %1249  ;;  %v5071_v12 = vpack.c.bf16 %v1242_v62, %v1200_v60  ;;  %v1360_v6 = vrot.slane %v1347_v44, %v5677_v17  ;;  %v1364_v60 = vrot.slane %v1347_v44, %v5674_v16 }
 0x3eb   :  { %v1257_v26 = vsel %vm180_vm2, %v1248_v5, %v1250_v11 }
 0x3ec   :  { %5052 = vmatpush1.bf16.msra.mxu0 %v5051_v7  ;;  %5072 = vmatprep.subr.bf16.mxu1 %v5071_v12  ;;  %v1282_v1 = vmul.f32 %v1268_v24, %v1257_v26 }
 0x3ed   :  { %v1252_v21 = vpop.permute.xlu0 %1251  ;;  %5074 = vmatpush1.bf16.msra.mxu1 %v5073_v19 }
 0x3ee   :  { %v1254_v23 = vpop.permute.xlu1 %1253  ;;  %v1256_v37 = vsel %vm180_vm2, %v1250_v11, %v1252_v21 }
 0x3ef   :  { %v1255_v34 = vsel %vm180_vm2, %v1252_v21, %v1254_v23  ;;  %v1258_v35 = vsel %vm180_vm2, %v1254_v23, %v1248_v5  ;;  %v1283_v49 = vmul.f32 %v1272_v33, %v1256_v37 }
 0x3f0   :  { %v1281_v45 = vmul.f32 %v1264_v28, %v1258_v35  ;;  %v1284_v46 = vmul.f32 %v1276_v14, %v1255_v34  ;;  %v1389_v28 = vld [vmem:[#allocation6 + $0x18] sm:$0xf]  ;;  %v1431_v14 = vld [vmem:[#allocation6 + $0x1c] sm:$0xf] }
 0x3f1   :  { %v1290_v27 = vpop.permute.xlu0 %1289  ;;  %v1402_v33 = vrot.slane %v1389_v28, %v5677_v17  ;;  %v1440_v35 = vrot.slane %v1431_v14, %v5667_v10  ;;  %v1406_v37 = vrot.slane %v1389_v28, %v5674_v16 }
 0x3f2   :  { %v1292_v13 = vpop.permute.xlu1 %1291 }
 0x3f3   :  { %v1299_v29 = vsel %vm224_vm3, %v1290_v27, %v1292_v13 }
 0x3f4   :  { %v1324_v2 = vmul.f32 %v1310_v25, %v1299_v29 }
 0x3f5   :  { %v1294_v36 = vpop.permute.xlu0 %1293 }
 0x3f6   :  { %v1298_v38 = vsel %vm224_vm3, %v1292_v13, %v1294_v36  ;;  %v1296_v39 = vpop.permute.xlu1 %1295  ;;  %v5053_v40 = vpack.c.bf16 %v1324_v2, %v1282_v1  ;;  %v1398_v1 = vrot.slane %v1389_v28, %v5667_v10  ;;  %v1436_v2 = vrot.slane %v1431_v14, %v5671_v15 }
 0x3f7   :  { %v1325_v41 = vmul.f32 %v1314_v0, %v1298_v38  ;;  %v1297_v42 = vsel %vm224_vm3, %v1294_v36, %v1296_v39  ;;  %v1300_v43 = vsel %vm224_vm3, %v1296_v39, %v1290_v27  ;;  %v1394_v0 = vrot.slane %v1389_v28, %v5671_v15 }
 0x3f8   :  { %v1323_v47 = vmul.f32 %v1306_v3, %v1300_v43  ;;  %v1326_v48 = vmul.f32 %v1318_v32, %v1297_v42  ;;  %5054 = vmatprep.subr.bf16.mxu0 %v5053_v40  ;;  %v1444_v38 = vrot.slane %v1431_v14, %v5677_v17  ;;  %v1448_v39 = vrot.slane %v1431_v14, %v5674_v16 }
 0x3f9   :  { %v1336_v50 = vpop.permute.xlu0 %1335  ;;  %v5077_v55 = vpack.c.bf16 %v1325_v41, %v1283_v49 }
 0x3fa   :  { %v5055_v51 = vpack.c.bf16 %v1323_v47, %v1281_v45  ;;  %v1338_v53 = vpop.permute.xlu1 %1337  ;;  %v5075_v54 = vpack.c.bf16 %v1326_v48, %v1284_v46 }
 0x3fb   :  { %v1345_v56 = vsel %vm272_vm4, %v1336_v50, %v1338_v53 }
 0x3fc   :  { %5056 = vmatpush1.bf16.msra.mxu0 %v5055_v51  ;;  %5076 = vmatprep.subr.bf16.mxu1 %v5075_v54  ;;  %v1369_v62 = vmul.f32 %v1352_v52, %v1345_v56  ;;  %v1473_v51 = vld [vmem:[#allocation6 + $0x20] sm:$0xf] }
 0x3fd   :  { %v1340_v61 = vpop.permute.xlu0 %1339  ;;  %5078 = vmatpush1.bf16.msra.mxu1 %v5077_v55 }
 0x3fe   :  { %v1344_v63 = vsel %vm272_vm4, %v1338_v53, %v1340_v61  ;;  %v1342_v5 = vpop.permute.xlu1 %1341  ;;  %v5059_v23 = vpack.c.bf16 %v1369_v62, %v5996_v8 }
 0x3ff   :  { %v1370_v7 = vmul.f32 %v1356_v57, %v1344_v63  ;;  %v1343_v11 = vsel %vm272_vm4, %v1340_v61, %v1342_v5  ;;  %v1346_v12 = vsel %vm272_vm4, %v1342_v5, %v1336_v50  ;;  %v1478_v61 = vrot.slane %v1473_v51, %v5671_v15 }
 0x400   :  { %v1371_v19 = vmul.f32 %v1360_v6, %v1343_v11  ;;  %v1372_v20 = vmul.f32 %v1364_v60, %v1346_v12  ;;  %v1486_v11 = vrot.slane %v1473_v51, %v5677_v17  ;;  %v1490_v12 = vrot.slane %v1473_v51, %v5674_v16 }
 0x401   :  { %v1378_v21 = vpop.permute.xlu0 %1377  ;;  %v5057_v22 = vpack.c.bf16 %v1370_v7, %v5999_v18  ;;  %v1482_v7 = vrot.slane %v1473_v51, %v5667_v10 }
 0x402   :  { %v5081_v24 = vpack.c.bf16 %v1371_v19, %v6004_v30  ;;  %v1380_v25 = vpop.permute.xlu1 %1379  ;;  %v5079_v26 = vpack.c.bf16 %v1372_v20, %v6009_v31 }
 0x403   :  { %5058 = vmatprep.subr.bf16.mxu0 %v5057_v22  ;;  %v1387_v32 = vsel %vm316_vm6, %v1378_v21, %v1380_v25 }
 0x404   :  { %5060 = vmatpush1.bf16.msra.mxu0 %v5059_v23  ;;  %5080 = vmatprep.subr.bf16.mxu1 %v5079_v26  ;;  %v1411_v43 = vmul.f32 %v1394_v0, %v1387_v32  ;;  %v1162_v0 = vld [vmem:[#allocation8 + $0x10] sm:$0xff] }
 0x405   :  { %v1382_v27 = vpop.permute.xlu0 %1381  ;;  %5082 = vmatpush1.bf16.msra.mxu1 %v5081_v24 }
 0x406   :  { %v1384_v13 = vpop.permute.xlu1 %1383  ;;  %v1386_v36 = vsel %vm316_vm6, %v1380_v25, %v1382_v27 }
 0x407   :  { %v1385_v40 = vsel %vm316_vm6, %v1382_v27, %v1384_v13  ;;  %v1388_v41 = vsel %vm316_vm6, %v1384_v13, %v1378_v21  ;;  %v1412_v47 = vmul.f32 %v1398_v1, %v1386_v36 }
 0x408   :  { %v1413_v52 = vmul.f32 %v1402_v33, %v1385_v40  ;;  %v1414_v53 = vmul.f32 %v1406_v37, %v1388_v41  ;;  %v1748_v41 = vld [vmem:[#allocation6 + $0x4] sm:$0xf] }
 0x409   :  { %v1420_v29 = vpop.permute.xlu0 %1419  ;;  %v1761_v51 = vrot.slane %v1748_v41, %v5677_v17 }
 0x40a   :  { %v1422_v3 = vpop.permute.xlu1 %1421 }
 0x40b   :  { %v1429_v34 = vsel %vm360_vm5, %v1420_v29, %v1422_v3 }
 0x40c   :  { %v1453_v44 = vmul.f32 %v1436_v2, %v1429_v34 }
 0x40d   :  { %v1424_v42 = vpop.permute.xlu0 %1423 }
 0x40e   :  { %v1428_v45 = vsel %vm360_vm5, %v1422_v3, %v1424_v42  ;;  %v1426_v46 = vpop.permute.xlu1 %1425  ;;  %v5063_v6 = vpack.c.bf16 %v1453_v44, %v1411_v43  ;;  %v1757_v44 = vrot.slane %v1748_v41, %v5667_v10 }
 0x40f   :  { %v1454_v48 = vmul.f32 %v1440_v35, %v1428_v45  ;;  %v1427_v49 = vsel %vm360_vm5, %v1424_v42, %v1426_v46  ;;  %v1430_v50 = vsel %vm360_vm5, %v1426_v46, %v1420_v29 }
 0x410   :  { %v1455_v54 = vmul.f32 %v1444_v38, %v1427_v49  ;;  %v1456_v55 = vmul.f32 %v1448_v39, %v1430_v50  ;;  %v1706_v39 = vld [vmem:[#allocation6] sm:$0xf] }
 0x411   :  { %v1462_v56 = vpop.permute.xlu0 %1461  ;;  %v5061_v57 = vpack.c.bf16 %v1454_v48, %v1412_v47  ;;  %v1715_v43 = vrot.slane %v1706_v39, %v5667_v10  ;;  %v1711_v48 = vrot.slane %v1706_v39, %v5671_v15  ;;  %v1723_v49 = vrot.slane %v1706_v39, %v5674_v16 }
 0x412   :  { %v5085_v60 = vpack.c.bf16 %v1455_v54, %v1413_v52  ;;  %v1464_v62 = vpop.permute.xlu1 %1463  ;;  %v5083_v63 = vpack.c.bf16 %v1456_v55, %v1414_v53  ;;  %v1753_v54 = vrot.slane %v1748_v41, %v5671_v15  ;;  %v1765_v55 = vrot.slane %v1748_v41, %v5674_v16 }
 0x413   :  { %v1471_v5 = vsel %vm404_vm7, %v1462_v56, %v1464_v62  ;;  %5062 = vmatprep.subr.bf16.mxu0 %v5061_v57 }
 0x414   :  { %5064 = vmatpush1.bf16.msra.mxu0 %v5063_v6  ;;  %5084 = vmatprep.subr.bf16.mxu1 %v5083_v63  ;;  %v1495_v20 = vmul.f32 %v1478_v61, %v1471_v5 }
 0x415   :  { %v1466_v19 = vpop.permute.xlu0 %1465  ;;  %5086 = vmatpush1.bf16.msra.mxu1 %v5085_v60 }
 0x416   :  { %v1470_v21 = vsel %vm404_vm7, %v1464_v62, %v1466_v19  ;;  %v1468_v22 = vpop.permute.xlu1 %1467  ;;  %v5068_v28 = vpack.c.bf16 %v5513_v59, %v1495_v20 }
 0x417   :  { %v1496_v23 = vmul.f32 %v1482_v7, %v1470_v21  ;;  %v1469_v24 = vsel %vm404_vm7, %v1466_v19, %v1468_v22  ;;  %v1472_v25 = vsel %vm404_vm7, %v1468_v22, %v1462_v56  ;;  %v1719_v56 = vrot.slane %v1706_v39, %v5677_v17 }
 0x418   :  { %v1497_v26 = vmul.f32 %v1486_v11, %v1469_v24  ;;  %v1498_v27 = vmul.f32 %v1490_v12, %v1472_v25 }
 0x419   :  { %v5065_v13 = vpack.c.bf16 %v5513_v59, %v1496_v23 }
 0x41a   :  { %v5087_v14 = vpack.c.bf16 %v5513_v59, %v1498_v27  ;;  %v5090_v29 = vpack.c.bf16 %v5513_v59, %v1497_v26 }
 0x41b   :  { %5067 = vmatprep.subr.msk.bf16.mxu0 %vm5787_vm10, %v5065_v13 }
 0x41c   :  { %5070 = vmatpush1.bf16.msk.msra.mxu0 %vm5787_vm10, %v5068_v28  ;;  %5089 = vmatprep.subr.msk.bf16.mxu1 %vm5787_vm10, %v5087_v14  ;;  %v1790_v28 = vld [vmem:[#allocation6 + $0x8] sm:$0xf] }
 0x41d   :  { %5092 = vmatpush1.bf16.msk.msra.mxu1 %vm5787_vm10, %v5090_v29  ;;  %v1832_v29 = vld [vmem:[#allocation6 + $0xc] sm:$0xf]  ;;  %v1807_v39 = vrot.slane %v1790_v28, %v5674_v16 }
 0x41e   :  { %v1845_v41 = vrot.slane %v1832_v29, %v5677_v17 }
 0x41f   :  { %4911 = vmatmul.mubr.msk.f32.vlgmr.msra.gmra.mrb[4].mxu0 %vm480_vm11, %v1162_v0 }
 0x420   :  { %4912 = vmatmul.mubr.msk.f32.vlgmr.msra.gmra.mrb[4].mxu1 %vm480_vm11, %v1162_v0  ;;  %2141 = vmatprep.mubr.f32.mxu0 %v5510_v4 }
 0x421   :  { %2212 = vmatprep.mubr.f32.mxu1 %v5510_v4 }
 0x4f2   :  { %v1612_v1 = vpop.f32.mrb[4].mxu0 }
 0x4f3   :  { %v6187_v2 = vmax.f32 %v1612_v1, 0.0  ;;  %v1614_v3 = vpop.f32.mrb[5].mxu0  ;;  %v1683_v32 = vpop.f32.mrb[4].mxu1  ;;  %v1799_v1 = vrot.slane %v1790_v28, %v5667_v10 }
 0x4f4   :  { %v6189_v33 = vmax.f32 %v1614_v3, 0.0  ;;  %v1685_v34 = vpop.f32.mrb[5].mxu1  ;;  %v6193_v35 = vmax.f32 %v1683_v32, 0.0  ;;  %v1841_v3 = vrot.slane %v1832_v29, %v5667_v10 }
 0x4f5   :  { %1694 = vrot.lane.b32.xlu0 %v6187_v2, %s5503_s12  ;;  %v6197_v36 = vmax.f32 %v1685_v34, 0.0 }
 0x4f6   :  { %1696 = vrot.lane.b32.xlu1 %v6189_v33, %s5503_s12 }
 0x4f9   :  { %1698 = vrot.lane.b32.xlu0 %v6193_v35, %s5503_s12 }
 0x4fa   :  { %1700 = vrot.lane.b32.xlu1 %v6197_v36, %s5503_s12 }
 0x4fd   :  { %1736 = vrot.lane.b32.xlu0 %v6187_v2, %s5504_s3 }
 0x4fe   :  { %1738 = vrot.lane.b32.xlu1 %v6189_v33, %s5504_s3 }
 0x501   :  { %1740 = vrot.lane.b32.xlu0 %v6193_v35, %s5504_s3 }
 0x502   :  { %1742 = vrot.lane.b32.xlu1 %v6197_v36, %s5504_s3 }
 0x505   :  { %1778 = vrot.lane.b32.xlu0 %v6187_v2, %s5505_s13 }
 0x506   :  { %1780 = vrot.lane.b32.xlu1 %v6189_v33, %s5505_s13 }
 0x509   :  { %1782 = vrot.lane.b32.xlu0 %v6193_v35, %s5505_s13 }
 0x50a   :  { %1784 = vrot.lane.b32.xlu1 %v6197_v36, %s5505_s13 }
 0x50d   :  { %1820 = vrot.lane.b32.xlu0 %v6187_v2, %s5506_s1 }
 0x50e   :  { %1822 = vrot.lane.b32.xlu1 %v6189_v33, %s5506_s1 }
 0x511   :  { %1824 = vrot.lane.b32.xlu0 %v6193_v35, %s5506_s1 }
 0x512   :  { %1826 = vrot.lane.b32.xlu1 %v6197_v36, %s5506_s1 }
 0x515   :  { %1866 = vrot.lane.b32.xlu0 %v6187_v2, %s5507_s14 }
 0x516   :  { %1868 = vrot.lane.b32.xlu1 %v6189_v33, %s5507_s14 }
 0x519   :  { %1870 = vrot.lane.b32.xlu0 %v6193_v35, %s5507_s14 }
 0x51a   :  { %1872 = vrot.lane.b32.xlu1 %v6197_v36, %s5507_s14 }
 0x51d   :  { %1908 = vrot.lane.b32.xlu0 %v6187_v2, %s5508_s15 }
 0x51e   :  { %1910 = vrot.lane.b32.xlu1 %v6189_v33, %s5508_s15 }
 0x521   :  { %1912 = vrot.lane.b32.xlu0 %v6193_v35, %s5508_s15 }
 0x522   :  { %1914 = vrot.lane.b32.xlu1 %v6197_v36, %s5508_s15 }
 0x525   :  { %1950 = vrot.lane.b32.xlu0 %v6187_v2, %s5509_s16 }
 0x526   :  { %1952 = vrot.lane.b32.xlu1 %v6189_v33, %s5509_s16 }
 0x529   :  { %1954 = vrot.lane.b32.xlu0 %v6193_v35, %s5509_s16 }
 0x52a   :  { %1956 = vrot.lane.b32.xlu1 %v6197_v36, %s5509_s16 }
 0x52d   :  { %1992 = vrot.lane.b32.xlu0 %v6187_v2, %s5511_s17 }
 0x52e   :  { %1994 = vrot.lane.b32.xlu1 %v6189_v33, %s5511_s17 }
 0x531   :  { %1996 = vrot.lane.b32.xlu0 %v6193_v35, %s5511_s17 }
 0x532   :  { %1998 = vrot.lane.b32.xlu1 %v6197_v36, %s5511_s17 }
 0x567   :  { %v1695_v37 = vpop.permute.xlu0 %1694 }
 0x568   :  { %v1697_v38 = vpop.permute.xlu1 %1696 }
 0x569   :  { %v1704_v45 = vsel %vm93_vm0, %v1695_v37, %v1697_v38 }
 0x56a   :  { %v1729_v52 = vmul.f32 %v1715_v43, %v1704_v45  ;;  %v1849_v45 = vrot.slane %v1832_v29, %v5674_v16 }
 0x56b   :  { %v1699_v40 = vpop.permute.xlu0 %1698 }
 0x56c   :  { %v1701_v42 = vpop.permute.xlu1 %1700  ;;  %v1703_v61 = vsel %vm93_vm0, %v1697_v38, %v1699_v40  ;;  %v1795_v38 = vrot.slane %v1790_v28, %v5671_v15 }
 0x56d   :  { %v1702_v57 = vsel %vm93_vm0, %v1699_v40, %v1701_v42  ;;  %v1705_v6 = vsel %vm93_vm0, %v1701_v42, %v1695_v37  ;;  %v1730_v23 = vmul.f32 %v1719_v56, %v1703_v61 }
 0x56e   :  { %v1728_v19 = vmul.f32 %v1711_v48, %v1705_v6  ;;  %v1731_v20 = vmul.f32 %v1723_v49, %v1702_v57  ;;  %v1878_v57 = vld [vmem:[#allocation6 + $0x14] sm:$0xf] }
 0x56f   :  { %v1737_v46 = vpop.permute.xlu0 %1736 }
 0x570   :  { %v1739_v47 = vpop.permute.xlu1 %1738 }
 0x571   :  { %v1746_v50 = vsel %vm136_vm1, %v1737_v46, %v1739_v47 }
 0x572   :  { %v1771_v53 = vmul.f32 %v1757_v44, %v1746_v50  ;;  %v1837_v44 = vrot.slane %v1832_v29, %v5671_v15 }
 0x573   :  { %v1741_v60 = vpop.permute.xlu0 %1740 }
 0x574   :  { %v1745_v62 = vsel %vm136_vm1, %v1739_v47, %v1741_v60  ;;  %v1743_v63 = vpop.permute.xlu1 %1742  ;;  %v5093_v5 = vpack.c.bf16 %v1771_v53, %v1729_v52 }
 0x575   :  { %v1772_v7 = vmul.f32 %v1761_v51, %v1745_v62  ;;  %v1744_v11 = vsel %vm136_vm1, %v1741_v60, %v1743_v63  ;;  %v1747_v12 = vsel %vm136_vm1, %v1743_v63, %v1737_v46  ;;  %v1803_v46 = vrot.slane %v1790_v28, %v5677_v17 }
 0x576   :  { %v1770_v21 = vmul.f32 %v1753_v54, %v1747_v12  ;;  %v1773_v22 = vmul.f32 %v1765_v55, %v1744_v11  ;;  %5094 = vmatprep.subr.bf16.mxu0 %v5093_v5  ;;  %v1883_v11 = vrot.slane %v1878_v57, %v5671_v15 }
 0x577   :  { %v1779_v24 = vpop.permute.xlu0 %1778  ;;  %v5117_v13 = vpack.c.bf16 %v1772_v7, %v1730_v23  ;;  %v1891_v23 = vrot.slane %v1878_v57, %v5677_v17 }
 0x578   :  { %v5095_v25 = vpack.c.bf16 %v1770_v21, %v1728_v19  ;;  %v1781_v26 = vpop.permute.xlu1 %1780  ;;  %v5115_v27 = vpack.c.bf16 %v1773_v22, %v1731_v20  ;;  %v1887_v22 = vrot.slane %v1878_v57, %v5667_v10 }
 0x579   :  { %v1788_v32 = vsel %vm180_vm2, %v1779_v24, %v1781_v26 }
 0x57a   :  { %5096 = vmatpush1.bf16.msra.mxu0 %v5095_v25  ;;  %5116 = vmatprep.subr.bf16.mxu1 %v5115_v27  ;;  %v1813_v42 = vmul.f32 %v1799_v1, %v1788_v32 }
 0x57b   :  { %v1783_v14 = vpop.permute.xlu0 %1782  ;;  %5118 = vmatpush1.bf16.msra.mxu1 %v5117_v13 }
 0x57c   :  { %v1785_v0 = vpop.permute.xlu1 %1784  ;;  %v1787_v50 = vsel %vm180_vm2, %v1781_v26, %v1783_v14 }
 0x57d   :  { %v1786_v47 = vsel %vm180_vm2, %v1783_v14, %v1785_v0  ;;  %v1789_v48 = vsel %vm180_vm2, %v1785_v0, %v1779_v24  ;;  %v1814_v63 = vmul.f32 %v1803_v46, %v1787_v50  ;;  %v1895_v24 = vrot.slane %v1878_v57, %v5674_v16 }
 0x57e   :  { %v1812_v6 = vmul.f32 %v1795_v38, %v1789_v48  ;;  %v1815_v60 = vmul.f32 %v1807_v39, %v1786_v47 }
 0x57f   :  { %v1821_v34 = vpop.permute.xlu0 %1820 }
 0x580   :  { %v1823_v37 = vpop.permute.xlu1 %1822 }
 0x581   :  { %v1830_v40 = vsel %vm224_vm3, %v1821_v34, %v1823_v37 }
 0x582   :  { %v1855_v43 = vmul.f32 %v1841_v3, %v1830_v40 }
 0x583   :  { %v1825_v49 = vpop.permute.xlu0 %1824 }
 0x584   :  { %v1829_v51 = vsel %vm224_vm3, %v1823_v37, %v1825_v49  ;;  %v1827_v52 = vpop.permute.xlu1 %1826  ;;  %v5097_v53 = vpack.c.bf16 %v1855_v43, %v1813_v42  ;;  %v1920_v42 = vld [vmem:[#allocation6 + $0x18] sm:$0xf]  ;;  %v1962_v43 = vld [vmem:[#allocation6 + $0x1c] sm:$0xf] }
 0x585   :  { %v1856_v54 = vmul.f32 %v1845_v41, %v1829_v51  ;;  %v1828_v55 = vsel %vm224_vm3, %v1825_v49, %v1827_v52  ;;  %v1831_v56 = vsel %vm224_vm3, %v1827_v52, %v1821_v34  ;;  %v1971_v48 = vrot.slane %v1962_v43, %v5667_v10 }
 0x586   :  { %v1854_v61 = vmul.f32 %v1837_v44, %v1831_v56  ;;  %v1857_v62 = vmul.f32 %v1849_v45, %v1828_v55  ;;  %5098 = vmatprep.subr.bf16.mxu0 %v5097_v53  ;;  %v1925_v45 = vrot.slane %v1920_v42, %v5671_v15  ;;  %v1937_v50 = vrot.slane %v1920_v42, %v5674_v16 }
 0x587   :  { %v1867_v5 = vpop.permute.xlu0 %1866  ;;  %v5121_v20 = vpack.c.bf16 %v1856_v54, %v1814_v63  ;;  %v1975_v51 = vrot.slane %v1962_v43, %v5677_v17  ;;  %v1979_v52 = vrot.slane %v1962_v43, %v5674_v16 }
 0x588   :  { %v5099_v7 = vpack.c.bf16 %v1854_v61, %v1812_v6  ;;  %v1869_v12 = vpop.permute.xlu1 %1868  ;;  %v5119_v19 = vpack.c.bf16 %v1857_v62, %v1815_v60 }
 0x589   :  { %v1876_v21 = vsel %vm272_vm4, %v1867_v5, %v1869_v12 }
 0x58a   :  { %5100 = vmatpush1.bf16.msra.mxu0 %v5099_v7  ;;  %5120 = vmatprep.subr.bf16.mxu1 %v5119_v19  ;;  %v1900_v26 = vmul.f32 %v1883_v11, %v1876_v21  ;;  %v2004_v7 = vld [vmem:[#allocation6 + $0x20] sm:$0xf] }
 0x58b   :  { %v1871_v25 = vpop.permute.xlu0 %1870  ;;  %5122 = vmatpush1.bf16.msra.mxu1 %v5121_v20 }
 0x58c   :  { %v1875_v27 = vsel %vm272_vm4, %v1869_v12, %v1871_v25  ;;  %v1873_v13 = vpop.permute.xlu1 %1872  ;;  %v5103_v34 = vpack.c.bf16 %v1900_v26, %v6187_v2  ;;  %v1967_v2 = vrot.slane %v1962_v43, %v5671_v15 }
 0x58d   :  { %v1901_v28 = vmul.f32 %v1887_v22, %v1875_v27  ;;  %v1874_v14 = vsel %vm272_vm4, %v1871_v25, %v1873_v13  ;;  %v1877_v29 = vsel %vm272_vm4, %v1873_v13, %v1867_v5  ;;  %v2009_v25 = vrot.slane %v2004_v7, %v5671_v15 }
 0x58e   :  { %v1902_v0 = vmul.f32 %v1891_v23, %v1874_v14  ;;  %v1903_v1 = vmul.f32 %v1895_v24, %v1877_v29  ;;  %v2017_v14 = vrot.slane %v2004_v7, %v5677_v17  ;;  %v2021_v29 = vrot.slane %v2004_v7, %v5674_v16 }
 0x58f   :  { %v1909_v3 = vpop.permute.xlu0 %1908  ;;  %v5101_v32 = vpack.c.bf16 %v1901_v28, %v6189_v33  ;;  %v1929_v33 = vrot.slane %v1920_v42, %v5667_v10  ;;  %v2013_v28 = vrot.slane %v2004_v7, %v5667_v10 }
 0x590   :  { %v5125_v37 = vpack.c.bf16 %v1902_v0, %v6193_v35  ;;  %v1911_v38 = vpop.permute.xlu1 %1910  ;;  %v5123_v39 = vpack.c.bf16 %v1903_v1, %v6197_v36  ;;  %v1933_v36 = vrot.slane %v1920_v42, %v5677_v17 }
 0x591   :  { %5102 = vmatprep.subr.bf16.mxu0 %v5101_v32  ;;  %v1918_v35 = vsel %vm316_vm6, %v1909_v3, %v1911_v38 }
 0x592   :  { %5104 = vmatpush1.bf16.msra.mxu0 %v5103_v34  ;;  %5124 = vmatprep.subr.bf16.mxu1 %v5123_v39  ;;  %v1942_v56 = vmul.f32 %v1925_v45, %v1918_v35  ;;  %v1693_v45 = vld [vmem:[#allocation8 + $0x18] sm:$0xff] }
 0x593   :  { %v1913_v40 = vpop.permute.xlu0 %1912  ;;  %5126 = vmatpush1.bf16.msra.mxu1 %v5125_v37 }
 0x594   :  { %v1915_v41 = vpop.permute.xlu1 %1914  ;;  %v1917_v49 = vsel %vm316_vm6, %v1911_v38, %v1913_v40 }
 0x595   :  { %v1916_v53 = vsel %vm316_vm6, %v1913_v40, %v1915_v41  ;;  %v1919_v54 = vsel %vm316_vm6, %v1915_v41, %v1909_v3  ;;  %v1943_v61 = vmul.f32 %v1929_v33, %v1917_v49 }
 0x596   :  { %v1944_v11 = vmul.f32 %v1933_v36, %v1916_v53  ;;  %v1945_v12 = vmul.f32 %v1937_v50, %v1919_v54  ;;  %v2279_v50 = vld [vmem:[#allocation6 + $0x4] sm:$0xf] }
 0x597   :  { %v1951_v44 = vpop.permute.xlu0 %1950  ;;  %v2288_v53 = vrot.slane %v2279_v50, %v5667_v10  ;;  %v2296_v7 = vrot.slane %v2279_v50, %v5674_v16 }
 0x598   :  { %v1953_v46 = vpop.permute.xlu1 %1952 }
 0x599   :  { %v1960_v47 = vsel %vm360_vm5, %v1951_v44, %v1953_v46 }
 0x59a   :  { %v1984_v57 = vmul.f32 %v1967_v2, %v1960_v47 }
 0x59b   :  { %v1955_v55 = vpop.permute.xlu0 %1954 }
 0x59c   :  { %v1959_v6 = vsel %vm360_vm5, %v1953_v46, %v1955_v55  ;;  %v1957_v60 = vpop.permute.xlu1 %1956  ;;  %v5107_v23 = vpack.c.bf16 %v1984_v57, %v1942_v56 }
 0x59d   :  { %v1985_v62 = vmul.f32 %v1971_v48, %v1959_v6  ;;  %v1958_v63 = vsel %vm360_vm5, %v1955_v55, %v1957_v60  ;;  %v1961_v5 = vsel %vm360_vm5, %v1957_v60, %v1951_v44 }
 0x59e   :  { %v1986_v19 = vmul.f32 %v1975_v51, %v1958_v63  ;;  %v1987_v20 = vmul.f32 %v1979_v52, %v1961_v5  ;;  %v2284_v5 = vrot.slane %v2279_v50, %v5671_v15 }
 0x59f   :  { %v1993_v21 = vpop.permute.xlu0 %1992  ;;  %v5105_v22 = vpack.c.bf16 %v1985_v62, %v1943_v61  ;;  %v2292_v61 = vrot.slane %v2279_v50, %v5677_v17 }
 0x5a0   :  { %v5129_v24 = vpack.c.bf16 %v1986_v19, %v1944_v11  ;;  %v1995_v26 = vpop.permute.xlu1 %1994  ;;  %v5127_v27 = vpack.c.bf16 %v1987_v20, %v1945_v12 }
 0x5a1   :  { %v2002_v13 = vsel %vm404_vm7, %v1993_v21, %v1995_v26  ;;  %5106 = vmatprep.subr.bf16.mxu0 %v5105_v22 }
 0x5a2   :  { %5108 = vmatpush1.bf16.msra.mxu0 %v5107_v23  ;;  %5128 = vmatprep.subr.bf16.mxu1 %v5127_v27  ;;  %v2026_v1 = vmul.f32 %v2009_v25, %v2002_v13 }
 0x5a3   :  { %v1997_v0 = vpop.permute.xlu0 %1996  ;;  %5130 = vmatpush1.bf16.msra.mxu1 %v5129_v24 }
 0x5a4   :  { %v2001_v3 = vsel %vm404_vm7, %v1995_v26, %v1997_v0  ;;  %v1999_v32 = vpop.permute.xlu1 %1998  ;;  %v5112_v42 = vpack.c.bf16 %v5513_v59, %v2026_v1 }
 0x5a5   :  { %v2027_v34 = vmul.f32 %v2013_v28, %v2001_v3  ;;  %v2000_v37 = vsel %vm404_vm7, %v1997_v0, %v1999_v32  ;;  %v2003_v38 = vsel %vm404_vm7, %v1999_v32, %v1993_v21 }
 0x5a6   :  { %v2028_v39 = vmul.f32 %v2017_v14, %v2000_v37  ;;  %v2029_v40 = vmul.f32 %v2021_v29, %v2003_v38  ;;  %v2321_v38 = vld [vmem:[#allocation6 + $0x8] sm:$0xf] }
 0x5a7   :  { %v5109_v41 = vpack.c.bf16 %v5513_v59, %v2027_v34 }
 0x5a8   :  { %v5131_v43 = vpack.c.bf16 %v5513_v59, %v2029_v40  ;;  %v5134_v44 = vpack.c.bf16 %v5513_v59, %v2028_v39  ;;  %v2363_v40 = vld [vmem:[#allocation6 + $0xc] sm:$0xf] }
 0x5a9   :  { %5111 = vmatprep.subr.msk.bf16.mxu0 %vm5787_vm10, %v5109_v41  ;;  %v2380_v50 = vrot.slane %v2363_v40, %v5674_v16 }
 0x5aa   :  { %5114 = vmatpush1.bf16.msk.msra.mxu0 %vm5787_vm10, %v5112_v42  ;;  %5133 = vmatprep.subr.msk.bf16.mxu1 %vm5787_vm10, %v5131_v43  ;;  %v2330_v42 = vrot.slane %v2321_v38, %v5667_v10  ;;  %v2372_v43 = vrot.slane %v2363_v40, %v5667_v10 }
 0x5ab   :  { %5136 = vmatpush1.bf16.msk.msra.mxu1 %vm5787_vm10, %v5134_v44 }
 0x5ad   :  { %4913 = vmatmul.mubr.msk.f32.vlgmr.msra.gmra.mrb[6].mxu0 %vm480_vm11, %v1693_v45 }
 0x5ae   :  { %4914 = vmatmul.mubr.msk.f32.vlgmr.msra.gmra.mrb[6].mxu1 %vm480_vm11, %v1693_v45  ;;  %2672 = vmatprep.mubr.f32.mxu0 %v5510_v4 }
 0x5af   :  { %2743 = vmatprep.mubr.f32.mxu1 %v5510_v4 }
 0x680   :  { %v2143_v33 = vpop.f32.mrb[6].mxu0 }
 0x681   :  { %v6376_v2 = vadd.f32 %v2143_v33, %v5996_v8  ;;  %v2145_v46 = vpop.f32.mrb[7].mxu0  ;;  %v2214_v35 = vpop.f32.mrb[6].mxu1 }
 0x682   :  { %v6379_v36 = vadd.f32 %v2145_v46, %v5999_v18  ;;  %v2216_v47 = vpop.f32.mrb[7].mxu1  ;;  %v6386_v48 = vadd.f32 %v2214_v35, %v6004_v30  ;;  %v2237_v30 = vld [vmem:[#allocation6] sm:$0xf]  ;;  %v2326_v46 = vrot.slane %v2321_v38, %v5671_v15  ;;  %v2338_v35 = vrot.slane %v2321_v38, %v5674_v16 }
 0x683   :  { %2225 = vrot.lane.b32.xlu0 %v6376_v2, %s5503_s12  ;;  %v6389_v49 = vadd.f32 %v2216_v47, %v6009_v31  ;;  %v2246_v52 = vrot.slane %v2237_v30, %v5667_v10  ;;  %v2242_v57 = vrot.slane %v2237_v30, %v5671_v15  ;;  %v2254_v6 = vrot.slane %v2237_v30, %v5674_v16 }
 0x684   :  { %2227 = vrot.lane.b32.xlu1 %v6379_v36, %s5503_s12  ;;  %v2250_v11 = vrot.slane %v2237_v30, %v5677_v17 }
 0x687   :  { %2229 = vrot.lane.b32.xlu0 %v6386_v48, %s5503_s12 }
 0x688   :  { %2231 = vrot.lane.b32.xlu1 %v6389_v49, %s5503_s12 }
 0x68b   :  { %2267 = vrot.lane.b32.xlu0 %v6376_v2, %s5504_s3 }
 0x68c   :  { %2269 = vrot.lane.b32.xlu1 %v6379_v36, %s5504_s3 }
 0x68f   :  { %2271 = vrot.lane.b32.xlu0 %v6386_v48, %s5504_s3 }
 0x690   :  { %2273 = vrot.lane.b32.xlu1 %v6389_v49, %s5504_s3 }
 0x693   :  { %2309 = vrot.lane.b32.xlu0 %v6376_v2, %s5505_s13 }
 0x694   :  { %2311 = vrot.lane.b32.xlu1 %v6379_v36, %s5505_s13 }
 0x697   :  { %2313 = vrot.lane.b32.xlu0 %v6386_v48, %s5505_s13 }
 0x698   :  { %2315 = vrot.lane.b32.xlu1 %v6389_v49, %s5505_s13 }
 0x69b   :  { %2351 = vrot.lane.b32.xlu0 %v6376_v2, %s5506_s1 }
 0x69c   :  { %2353 = vrot.lane.b32.xlu1 %v6379_v36, %s5506_s1 }
 0x69f   :  { %2355 = vrot.lane.b32.xlu0 %v6386_v48, %s5506_s1 }
 0x6a0   :  { %2357 = vrot.lane.b32.xlu1 %v6389_v49, %s5506_s1 }
 0x6a3   :  { %2397 = vrot.lane.b32.xlu0 %v6376_v2, %s5507_s14 }
 0x6a4   :  { %2399 = vrot.lane.b32.xlu1 %v6379_v36, %s5507_s14 }
 0x6a7   :  { %2401 = vrot.lane.b32.xlu0 %v6386_v48, %s5507_s14 }
 0x6a8   :  { %2403 = vrot.lane.b32.xlu1 %v6389_v49, %s5507_s14 }
 0x6ab   :  { %2439 = vrot.lane.b32.xlu0 %v6376_v2, %s5508_s15 }
 0x6ac   :  { %2441 = vrot.lane.b32.xlu1 %v6379_v36, %s5508_s15 }
 0x6af   :  { %2443 = vrot.lane.b32.xlu0 %v6386_v48, %s5508_s15 }
 0x6b0   :  { %2445 = vrot.lane.b32.xlu1 %v6389_v49, %s5508_s15 }
 0x6b3   :  { %2481 = vrot.lane.b32.xlu0 %v6376_v2, %s5509_s16 }
 0x6b4   :  { %2483 = vrot.lane.b32.xlu1 %v6379_v36, %s5509_s16 }
 0x6b7   :  { %2485 = vrot.lane.b32.xlu0 %v6386_v48, %s5509_s16 }
 0x6b8   :  { %2487 = vrot.lane.b32.xlu1 %v6389_v49, %s5509_s16 }
 0x6bb   :  { %2523 = vrot.lane.b32.xlu0 %v6376_v2, %s5511_s17 }
 0x6bc   :  { %2525 = vrot.lane.b32.xlu1 %v6379_v36, %s5511_s17 }
 0x6bf   :  { %2527 = vrot.lane.b32.xlu0 %v6386_v48, %s5511_s17 }
 0x6c0   :  { %2529 = vrot.lane.b32.xlu1 %v6389_v49, %s5511_s17 }
 0x6f5   :  { %v2226_v8 = vpop.permute.xlu0 %2225 }
 0x6f6   :  { %v2228_v18 = vpop.permute.xlu1 %2227 }
 0x6f7   :  { %v2235_v54 = vsel %vm93_vm0, %v2226_v8, %v2228_v18 }
 0x6f8   :  { %v2260_v62 = vmul.f32 %v2246_v52, %v2235_v54 }
 0x6f9   :  { %v2230_v31 = vpop.permute.xlu0 %2229 }
 0x6fa   :  { %v2232_v51 = vpop.permute.xlu1 %2231  ;;  %v2234_v21 = vsel %vm93_vm0, %v2228_v18, %v2230_v31 }
 0x6fb   :  { %v2233_v12 = vsel %vm93_vm0, %v2230_v31, %v2232_v51  ;;  %v2236_v19 = vsel %vm93_vm0, %v2232_v51, %v2226_v8  ;;  %v2261_v0 = vmul.f32 %v2250_v11, %v2234_v21  ;;  %v2376_v8 = vrot.slane %v2363_v40, %v5677_v17 }
 0x6fc   :  { %v2259_v13 = vmul.f32 %v2242_v57, %v2236_v19  ;;  %v2262_v28 = vmul.f32 %v2254_v6, %v2233_v12  ;;  %v2368_v31 = vrot.slane %v2363_v40, %v5671_v15  ;;  %v2334_v51 = vrot.slane %v2321_v38, %v5677_v17 }
 0x6fd   :  { %v2268_v55 = vpop.permute.xlu0 %2267 }
 0x6fe   :  { %v2270_v56 = vpop.permute.xlu1 %2269 }
 0x6ff   :  { %v2277_v60 = vsel %vm136_vm1, %v2268_v55, %v2270_v56 }
 0x700   :  { %v2302_v63 = vmul.f32 %v2288_v53, %v2277_v60 }
 0x701   :  { %v2272_v20 = vpop.permute.xlu0 %2271 }
 0x702   :  { %v2276_v22 = vsel %vm136_vm1, %v2270_v56, %v2272_v20  ;;  %v2274_v23 = vpop.permute.xlu1 %2273  ;;  %v5137_v24 = vpack.c.bf16 %v2302_v63, %v2260_v62  ;;  %v2409_v63 = vld [vmem:[#allocation6 + $0x14] sm:$0xf] }
 0x703   :  { %v2303_v25 = vmul.f32 %v2292_v61, %v2276_v22  ;;  %v2275_v26 = vsel %vm136_vm1, %v2272_v20, %v2274_v23  ;;  %v2278_v27 = vsel %vm136_vm1, %v2274_v23, %v2268_v55  ;;  %v2414_v22 = vrot.slane %v2409_v63, %v5671_v15 }
 0x704   :  { %v2301_v14 = vmul.f32 %v2284_v5, %v2278_v27  ;;  %v2304_v29 = vmul.f32 %v2296_v7, %v2275_v26  ;;  %5138 = vmatprep.subr.bf16.mxu0 %v5137_v24  ;;  %v2418_v27 = vrot.slane %v2409_v63, %v5667_v10 }
 0x705   :  { %v2310_v1 = vpop.permute.xlu0 %2309  ;;  %v5161_v37 = vpack.c.bf16 %v2303_v25, %v2261_v0 }
 0x706   :  { %v5139_v3 = vpack.c.bf16 %v2301_v14, %v2259_v13  ;;  %v2312_v32 = vpop.permute.xlu1 %2311  ;;  %v5159_v34 = vpack.c.bf16 %v2304_v29, %v2262_v28  ;;  %v2422_v13 = vrot.slane %v2409_v63, %v5677_v17  ;;  %v2426_v28 = vrot.slane %v2409_v63, %v5674_v16 }
 0x707   :  { %v2319_v44 = vsel %vm180_vm2, %v2310_v1, %v2312_v32 }
 0x708   :  { %5140 = vmatpush1.bf16.msra.mxu0 %v5139_v3  ;;  %5160 = vmatprep.subr.bf16.mxu1 %v5159_v34  ;;  %v2344_v18 = vmul.f32 %v2330_v42, %v2319_v44 }
 0x709   :  { %v2314_v39 = vpop.permute.xlu0 %2313  ;;  %5162 = vmatpush1.bf16.msra.mxu1 %v5161_v37 }
 0x70a   :  { %v2316_v41 = vpop.permute.xlu1 %2315  ;;  %v2318_v55 = vsel %vm180_vm2, %v2312_v32, %v2314_v39 }
 0x70b   :  { %v2317_v52 = vsel %vm180_vm2, %v2314_v39, %v2316_v41  ;;  %v2320_v53 = vsel %vm180_vm2, %v2316_v41, %v2310_v1  ;;  %v2345_v19 = vmul.f32 %v2334_v51, %v2318_v55 }
 0x70c   :  { %v2343_v5 = vmul.f32 %v2326_v46, %v2320_v53  ;;  %v2346_v7 = vmul.f32 %v2338_v35, %v2317_v52  ;;  %v2451_v46 = vld [vmem:[#allocation6 + $0x18] sm:$0xf]  ;;  %v2493_v35 = vld [vmem:[#allocation6 + $0x1c] sm:$0xf] }
 0x70d   :  { %v2352_v45 = vpop.permute.xlu0 %2351  ;;  %v2464_v51 = vrot.slane %v2451_v46, %v5677_v17  ;;  %v2502_v53 = vrot.slane %v2493_v35, %v5667_v10  ;;  %v2468_v55 = vrot.slane %v2451_v46, %v5674_v16 }
 0x70e   :  { %v2354_v33 = vpop.permute.xlu1 %2353 }
 0x70f   :  { %v2361_v47 = vsel %vm224_vm3, %v2352_v45, %v2354_v33 }
 0x710   :  { %v2386_v30 = vmul.f32 %v2372_v43, %v2361_v47 }
 0x711   :  { %v2356_v54 = vpop.permute.xlu0 %2355 }
 0x712   :  { %v2360_v56 = vsel %vm224_vm3, %v2354_v33, %v2356_v54  ;;  %v2358_v57 = vpop.permute.xlu1 %2357  ;;  %v5141_v6 = vpack.c.bf16 %v2386_v30, %v2344_v18  ;;  %v2460_v18 = vrot.slane %v2451_v46, %v5667_v10  ;;  %v2498_v30 = vrot.slane %v2493_v35, %v5671_v15 }
 0x713   :  { %v2387_v60 = vmul.f32 %v2376_v8, %v2360_v56  ;;  %v2359_v61 = vsel %vm224_vm3, %v2356_v54, %v2358_v57  ;;  %v2362_v62 = vsel %vm224_vm3, %v2358_v57, %v2352_v45  ;;  %v2456_v8 = vrot.slane %v2451_v46, %v5671_v15 }
 0x714   :  { %v2385_v11 = vmul.f32 %v2368_v31, %v2362_v62  ;;  %v2388_v12 = vmul.f32 %v2380_v50, %v2359_v61  ;;  %5142 = vmatprep.subr.bf16.mxu0 %v5141_v6  ;;  %v2506_v56 = vrot.slane %v2493_v35, %v5677_v17  ;;  %v2510_v57 = vrot.slane %v2493_v35, %v5674_v16 }
 0x715   :  { %v2398_v20 = vpop.permute.xlu0 %2397  ;;  %v5165_v25 = vpack.c.bf16 %v2387_v60, %v2345_v19 }
 0x716   :  { %v5143_v21 = vpack.c.bf16 %v2385_v11, %v2343_v5  ;;  %v2400_v23 = vpop.permute.xlu1 %2399  ;;  %v5163_v24 = vpack.c.bf16 %v2388_v12, %v2346_v7 }
 0x717   :  { %v2407_v26 = vsel %vm272_vm4, %v2398_v20, %v2400_v23 }
 0x718   :  { %5144 = vmatpush1.bf16.msra.mxu0 %v5143_v21  ;;  %5164 = vmatprep.subr.bf16.mxu1 %v5163_v24  ;;  %v2431_v29 = vmul.f32 %v2414_v22, %v2407_v26  ;;  %v2535_v21 = vld [vmem:[#allocation6 + $0x20] sm:$0xf] }
 0x719   :  { %v2402_v14 = vpop.permute.xlu0 %2401  ;;  %5166 = vmatpush1.bf16.msra.mxu1 %v5165_v25 }
 0x71a   :  { %v2406_v0 = vsel %vm272_vm4, %v2400_v23, %v2402_v14  ;;  %v2404_v1 = vpop.permute.xlu1 %2403  ;;  %v5147_v41 = vpack.c.bf16 %v2431_v29, %v6376_v2 }
 0x71b   :  { %v2432_v3 = vmul.f32 %v2418_v27, %v2406_v0  ;;  %v2405_v32 = vsel %vm272_vm4, %v2402_v14, %v2404_v1  ;;  %v2408_v34 = vsel %vm272_vm4, %v2404_v1, %v2398_v20  ;;  %v2540_v14 = vrot.slane %v2535_v21, %v5671_v15 }
 0x71c   :  { %v2433_v37 = vmul.f32 %v2422_v13, %v2405_v32  ;;  %v2434_v38 = vmul.f32 %v2426_v28, %v2408_v34  ;;  %v2548_v32 = vrot.slane %v2535_v21, %v5677_v17  ;;  %v2552_v34 = vrot.slane %v2535_v21, %v5674_v16 }
 0x71d   :  { %v2440_v39 = vpop.permute.xlu0 %2439  ;;  %v5145_v40 = vpack.c.bf16 %v2432_v3, %v6379_v36  ;;  %v2544_v3 = vrot.slane %v2535_v21, %v5667_v10 }
 0x71e   :  { %v5169_v42 = vpack.c.bf16 %v2433_v37, %v6386_v48  ;;  %v2442_v43 = vpop.permute.xlu1 %2441  ;;  %v5167_v44 = vpack.c.bf16 %v2434_v38, %v6389_v49 }
 0x71f   :  { %5146 = vmatprep.subr.bf16.mxu0 %v5145_v40  ;;  %v2449_v50 = vsel %vm316_vm6, %v2440_v39, %v2442_v43 }
 0x720   :  { %5148 = vmatpush1.bf16.msra.mxu0 %v5147_v41  ;;  %5168 = vmatprep.subr.bf16.mxu1 %v5167_v44  ;;  %v2473_v62 = vmul.f32 %v2456_v8, %v2449_v50  ;;  %v2224_v8 = vld [vmem:[#allocation8 + $0x20] sm:$0xff] }
 0x721   :  { %v2444_v45 = vpop.permute.xlu0 %2443  ;;  %5170 = vmatpush1.bf16.msra.mxu1 %v5169_v42 }
 0x722   :  { %v2446_v33 = vpop.permute.xlu1 %2445  ;;  %v2448_v54 = vsel %vm316_vm6, %v2442_v43, %v2444_v45 }
 0x723   :  { %v2447_v6 = vsel %vm316_vm6, %v2444_v45, %v2446_v33  ;;  %v2450_v60 = vsel %vm316_vm6, %v2446_v33, %v2440_v39  ;;  %v2474_v11 = vmul.f32 %v2460_v18, %v2448_v54 }
 0x724   :  { %v2475_v22 = vmul.f32 %v2464_v51, %v2447_v6  ;;  %v2476_v23 = vmul.f32 %v2468_v55, %v2450_v60  ;;  %v2810_v60 = vld [vmem:[#allocation6 + $0x4] sm:$0xf] }
 0x725   :  { %v2482_v47 = vpop.permute.xlu0 %2481  ;;  %v2823_v21 = vrot.slane %v2810_v60, %v5677_v17 }
 0x726   :  { %v2484_v31 = vpop.permute.xlu1 %2483 }
 0x727   :  { %v2491_v52 = vsel %vm360_vm5, %v2482_v47, %v2484_v31 }
 0x728   :  { %v2515_v63 = vmul.f32 %v2498_v30, %v2491_v52 }
 0x729   :  { %v2486_v61 = vpop.permute.xlu0 %2485 }
 0x72a   :  { %v2490_v5 = vsel %vm360_vm5, %v2484_v31, %v2486_v61  ;;  %v2488_v7 = vpop.permute.xlu1 %2487  ;;  %v5151_v13 = vpack.c.bf16 %v2515_v63, %v2473_v62  ;;  %v2819_v63 = vrot.slane %v2810_v60, %v5667_v10 }
 0x72b   :  { %v2516_v12 = vmul.f32 %v2502_v53, %v2490_v5  ;;  %v2489_v19 = vsel %vm360_vm5, %v2486_v61, %v2488_v7  ;;  %v2492_v20 = vsel %vm360_vm5, %v2488_v7, %v2482_v47 }
 0x72c   :  { %v2517_v24 = vmul.f32 %v2506_v56, %v2489_v19  ;;  %v2518_v25 = vmul.f32 %v2510_v57, %v2492_v20  ;;  %v2768_v57 = vld [vmem:[#allocation6] sm:$0xf] }
 0x72d   :  { %v2524_v26 = vpop.permute.xlu0 %2523  ;;  %v5149_v27 = vpack.c.bf16 %v2516_v12, %v2474_v11  ;;  %v2777_v62 = vrot.slane %v2768_v57, %v5667_v10  ;;  %v2773_v12 = vrot.slane %v2768_v57, %v5671_v15  ;;  %v2785_v19 = vrot.slane %v2768_v57, %v5674_v16 }
 0x72e   :  { %v5173_v28 = vpack.c.bf16 %v2517_v24, %v2475_v22  ;;  %v2526_v29 = vpop.permute.xlu1 %2525  ;;  %v5171_v0 = vpack.c.bf16 %v2518_v25, %v2476_v23  ;;  %v2815_v24 = vrot.slane %v2810_v60, %v5671_v15  ;;  %v2827_v25 = vrot.slane %v2810_v60, %v5674_v16 }
 0x72f   :  { %v2533_v1 = vsel %vm404_vm7, %v2524_v26, %v2526_v29  ;;  %5150 = vmatprep.subr.bf16.mxu0 %v5149_v27 }
 0x730   :  { %5152 = vmatpush1.bf16.msra.mxu0 %v5151_v13  ;;  %5172 = vmatprep.subr.bf16.mxu1 %v5171_v0  ;;  %v2557_v38 = vmul.f32 %v2540_v14, %v2533_v1 }
 0x731   :  { %v2528_v37 = vpop.permute.xlu0 %2527  ;;  %5174 = vmatpush1.bf16.msra.mxu1 %v5173_v28 }
 0x732   :  { %v2532_v39 = vsel %vm404_vm7, %v2526_v29, %v2528_v37  ;;  %v2530_v40 = vpop.permute.xlu1 %2529  ;;  %v5156_v46 = vpack.c.bf16 %v5513_v59, %v2557_v38 }
 0x733   :  { %v2558_v41 = vmul.f32 %v2544_v3, %v2532_v39  ;;  %v2531_v42 = vsel %vm404_vm7, %v2528_v37, %v2530_v40  ;;  %v2534_v43 = vsel %vm404_vm7, %v2530_v40, %v2524_v26  ;;  %v2781_v26 = vrot.slane %v2768_v57, %v5677_v17 }
 0x734   :  { %v2559_v44 = vmul.f32 %v2548_v32, %v2531_v42  ;;  %v2560_v45 = vmul.f32 %v2552_v34, %v2534_v43 }
 0x735   :  { %v5153_v33 = vpack.c.bf16 %v5513_v59, %v2558_v41 }
 0x736   :  { %v5175_v35 = vpack.c.bf16 %v5513_v59, %v2560_v45  ;;  %v5178_v47 = vpack.c.bf16 %v5513_v59, %v2559_v44 }
 0x737   :  { %5155 = vmatprep.subr.msk.bf16.mxu0 %vm5787_vm10, %v5153_v33 }
 0x738   :  { %5158 = vmatpush1.bf16.msk.msra.mxu0 %vm5787_vm10, %v5156_v46  ;;  %5177 = vmatprep.subr.msk.bf16.mxu1 %vm5787_vm10, %v5175_v35  ;;  %v2852_v46 = vld [vmem:[#allocation6 + $0x8] sm:$0xf] }
 0x739   :  { %5180 = vmatpush1.bf16.msk.msra.mxu1 %vm5787_vm10, %v5178_v47  ;;  %v2894_v47 = vld [vmem:[#allocation6 + $0xc] sm:$0xf]  ;;  %v2869_v57 = vrot.slane %v2852_v46, %v5674_v16 }
 0x73a   :  { %v2907_v60 = vrot.slane %v2894_v47, %v5677_v17 }
 0x73b   :  { %4915 = vmatmul.mubr.msk.f32.vlgmr.msra.gmra.mrb[8].mxu0 %vm480_vm11, %v2224_v8 }
 0x73c   :  { %4916 = vmatmul.mubr.msk.f32.vlgmr.msra.gmra.mrb[8].mxu1 %vm480_vm11, %v2224_v8  ;;  %3203 = vmatprep.mubr.f32.mxu0 %v5510_v4 }
 0x73d   :  { %3274 = vmatprep.mubr.f32.mxu1 %v5510_v4 }
 0x80e   :  { %v2674_v18 = vpop.f32.mrb[8].mxu0 }
 0x80f   :  { %v6567_v30 = vmax.f32 %v2674_v18, 0.0  ;;  %v2676_v31 = vpop.f32.mrb[9].mxu0  ;;  %v2745_v50 = vpop.f32.mrb[8].mxu1  ;;  %v2861_v18 = vrot.slane %v2852_v46, %v5667_v10 }
 0x810   :  { %v6569_v51 = vmax.f32 %v2676_v31, 0.0  ;;  %v2747_v52 = vpop.f32.mrb[9].mxu1  ;;  %v6573_v53 = vmax.f32 %v2745_v50, 0.0  ;;  %v2903_v31 = vrot.slane %v2894_v47, %v5667_v10 }
 0x811   :  { %2756 = vrot.lane.b32.xlu0 %v6567_v30, %s5503_s12  ;;  %v6577_v54 = vmax.f32 %v2747_v52, 0.0 }
 0x812   :  { %2758 = vrot.lane.b32.xlu1 %v6569_v51, %s5503_s12 }
 0x815   :  { %2760 = vrot.lane.b32.xlu0 %v6573_v53, %s5503_s12 }
 0x816   :  { %2762 = vrot.lane.b32.xlu1 %v6577_v54, %s5503_s12 }
 0x819   :  { %2798 = vrot.lane.b32.xlu0 %v6567_v30, %s5504_s3 }
 0x81a   :  { %2800 = vrot.lane.b32.xlu1 %v6569_v51, %s5504_s3 }
 0x81d   :  { %2802 = vrot.lane.b32.xlu0 %v6573_v53, %s5504_s3 }
 0x81e   :  { %2804 = vrot.lane.b32.xlu1 %v6577_v54, %s5504_s3 }
 0x821   :  { %2840 = vrot.lane.b32.xlu0 %v6567_v30, %s5505_s13 }
 0x822   :  { %2842 = vrot.lane.b32.xlu1 %v6569_v51, %s5505_s13 }
 0x825   :  { %2844 = vrot.lane.b32.xlu0 %v6573_v53, %s5505_s13 }
 0x826   :  { %2846 = vrot.lane.b32.xlu1 %v6577_v54, %s5505_s13 }
 0x829   :  { %2882 = vrot.lane.b32.xlu0 %v6567_v30, %s5506_s1 }
 0x82a   :  { %2884 = vrot.lane.b32.xlu1 %v6569_v51, %s5506_s1 }
 0x82d   :  { %2886 = vrot.lane.b32.xlu0 %v6573_v53, %s5506_s1 }
 0x82e   :  { %2888 = vrot.lane.b32.xlu1 %v6577_v54, %s5506_s1 }
 0x831   :  { %2928 = vrot.lane.b32.xlu0 %v6567_v30, %s5507_s14 }
 0x832   :  { %2930 = vrot.lane.b32.xlu1 %v6569_v51, %s5507_s14 }
 0x835   :  { %2932 = vrot.lane.b32.xlu0 %v6573_v53, %s5507_s14 }
 0x836   :  { %2934 = vrot.lane.b32.xlu1 %v6577_v54, %s5507_s14 }
 0x839   :  { %2970 = vrot.lane.b32.xlu0 %v6567_v30, %s5508_s15 }
 0x83a   :  { %2972 = vrot.lane.b32.xlu1 %v6569_v51, %s5508_s15 }
 0x83d   :  { %2974 = vrot.lane.b32.xlu0 %v6573_v53, %s5508_s15 }
 0x83e   :  { %2976 = vrot.lane.b32.xlu1 %v6577_v54, %s5508_s15 }
 0x841   :  { %3012 = vrot.lane.b32.xlu0 %v6567_v30, %s5509_s16 }
 0x842   :  { %3014 = vrot.lane.b32.xlu1 %v6569_v51, %s5509_s16 }
 0x845   :  { %3016 = vrot.lane.b32.xlu0 %v6573_v53, %s5509_s16 }
 0x846   :  { %3018 = vrot.lane.b32.xlu1 %v6577_v54, %s5509_s16 }
 0x849   :  { %3054 = vrot.lane.b32.xlu0 %v6567_v30, %s5511_s17 }
 0x84a   :  { %3056 = vrot.lane.b32.xlu1 %v6569_v51, %s5511_s17 }
 0x84d   :  { %3058 = vrot.lane.b32.xlu0 %v6573_v53, %s5511_s17 }
 0x84e   :  { %3060 = vrot.lane.b32.xlu1 %v6577_v54, %s5511_s17 }
 0x883   :  { %v2757_v55 = vpop.permute.xlu0 %2756 }
 0x884   :  { %v2759_v56 = vpop.permute.xlu1 %2758 }
 0x885   :  { %v2766_v5 = vsel %vm93_vm0, %v2757_v55, %v2759_v56 }
 0x886   :  { %v2791_v22 = vmul.f32 %v2777_v62, %v2766_v5  ;;  %v2911_v5 = vrot.slane %v2894_v47, %v5674_v16 }
 0x887   :  { %v2761_v6 = vpop.permute.xlu0 %2760 }
 0x888   :  { %v2763_v61 = vpop.permute.xlu1 %2762  ;;  %v2765_v14 = vsel %vm93_vm0, %v2759_v56, %v2761_v6  ;;  %v2857_v56 = vrot.slane %v2852_v46, %v5671_v15 }
 0x889   :  { %v2764_v27 = vsel %vm93_vm0, %v2761_v6, %v2763_v61  ;;  %v2767_v13 = vsel %vm93_vm0, %v2763_v61, %v2757_v55  ;;  %v2792_v41 = vmul.f32 %v2781_v26, %v2765_v14 }
 0x88a   :  { %v2790_v37 = vmul.f32 %v2773_v12, %v2767_v13  ;;  %v2793_v38 = vmul.f32 %v2785_v19, %v2764_v27  ;;  %v2940_v27 = vld [vmem:[#allocation6 + $0x14] sm:$0xf] }
 0x88b   :  { %v2799_v7 = vpop.permute.xlu0 %2798 }
 0x88c   :  { %v2801_v11 = vpop.permute.xlu1 %2800 }
 0x88d   :  { %v2808_v20 = vsel %vm136_vm1, %v2799_v7, %v2801_v11 }
 0x88e   :  { %v2833_v23 = vmul.f32 %v2819_v63, %v2808_v20  ;;  %v2899_v63 = vrot.slane %v2894_v47, %v5671_v15 }
 0x88f   :  { %v2803_v28 = vpop.permute.xlu0 %2802 }
 0x890   :  { %v2807_v29 = vsel %vm136_vm1, %v2801_v11, %v2803_v28  ;;  %v2805_v0 = vpop.permute.xlu1 %2804  ;;  %v5181_v1 = vpack.c.bf16 %v2833_v23, %v2791_v22 }
 0x891   :  { %v2834_v3 = vmul.f32 %v2823_v21, %v2807_v29  ;;  %v2806_v32 = vsel %vm136_vm1, %v2803_v28, %v2805_v0  ;;  %v2809_v34 = vsel %vm136_vm1, %v2805_v0, %v2799_v7  ;;  %v2865_v7 = vrot.slane %v2852_v46, %v5677_v17 }
 0x892   :  { %v2832_v39 = vmul.f32 %v2815_v24, %v2809_v34  ;;  %v2835_v40 = vmul.f32 %v2827_v25, %v2806_v32  ;;  %5182 = vmatprep.subr.bf16.mxu0 %v5181_v1  ;;  %v2945_v32 = vrot.slane %v2940_v27, %v5671_v15 }
 0x893   :  { %v2841_v42 = vpop.permute.xlu0 %2840  ;;  %v5205_v33 = vpack.c.bf16 %v2834_v3, %v2792_v41  ;;  %v2953_v41 = vrot.slane %v2940_v27, %v5677_v17 }
 0x894   :  { %v5183_v43 = vpack.c.bf16 %v2832_v39, %v2790_v37  ;;  %v2843_v44 = vpop.permute.xlu1 %2842  ;;  %v5203_v45 = vpack.c.bf16 %v2835_v40, %v2793_v38  ;;  %v2949_v40 = vrot.slane %v2940_v27, %v5667_v10 }
 0x895   :  { %v2850_v50 = vsel %vm180_vm2, %v2841_v42, %v2843_v44 }
 0x896   :  { %5184 = vmatpush1.bf16.msra.mxu0 %v5183_v43  ;;  %5204 = vmatprep.subr.bf16.mxu1 %v5203_v45  ;;  %v2875_v61 = vmul.f32 %v2861_v18, %v2850_v50 }
 0x897   :  { %v2845_v35 = vpop.permute.xlu0 %2844  ;;  %5206 = vmatpush1.bf16.msra.mxu1 %v5205_v33 }
 0x898   :  { %v2847_v8 = vpop.permute.xlu1 %2846  ;;  %v2849_v20 = vsel %vm180_vm2, %v2843_v44, %v2845_v35 }
 0x899   :  { %v2848_v11 = vsel %vm180_vm2, %v2845_v35, %v2847_v8  ;;  %v2851_v12 = vsel %vm180_vm2, %v2847_v8, %v2841_v42  ;;  %v2876_v0 = vmul.f32 %v2865_v7, %v2849_v20  ;;  %v2957_v42 = vrot.slane %v2940_v27, %v5674_v16 }
 0x89a   :  { %v2874_v13 = vmul.f32 %v2857_v56, %v2851_v12  ;;  %v2877_v28 = vmul.f32 %v2869_v57, %v2848_v11 }
 0x89b   :  { %v2883_v52 = vpop.permute.xlu0 %2882 }
 0x89c   :  { %v2885_v55 = vpop.permute.xlu1 %2884 }
 0x89d   :  { %v2892_v6 = vsel %vm224_vm3, %v2883_v52, %v2885_v55 }
 0x89e   :  { %v2917_v62 = vmul.f32 %v2903_v31, %v2892_v6 }
 0x89f   :  { %v2887_v19 = vpop.permute.xlu0 %2886 }
 0x8a0   :  { %v2891_v21 = vsel %vm224_vm3, %v2885_v55, %v2887_v19  ;;  %v2889_v22 = vpop.permute.xlu1 %2888  ;;  %v5185_v23 = vpack.c.bf16 %v2917_v62, %v2875_v61  ;;  %v2982_v61 = vld [vmem:[#allocation6 + $0x18] sm:$0xf]  ;;  %v3024_v62 = vld [vmem:[#allocation6 + $0x1c] sm:$0xf] }
 0x8a1   :  { %v2918_v24 = vmul.f32 %v2907_v60, %v2891_v21  ;;  %v2890_v25 = vsel %vm224_vm3, %v2887_v19, %v2889_v22  ;;  %v2893_v26 = vsel %vm224_vm3, %v2889_v22, %v2883_v52  ;;  %v3033_v12 = vrot.slane %v3024_v62, %v5667_v10 }
 0x8a2   :  { %v2916_v14 = vmul.f32 %v2899_v63, %v2893_v26  ;;  %v2919_v29 = vmul.f32 %v2911_v5, %v2890_v25  ;;  %5186 = vmatprep.subr.bf16.mxu0 %v5185_v23  ;;  %v2987_v5 = vrot.slane %v2982_v61, %v5671_v15  ;;  %v2999_v20 = vrot.slane %v2982_v61, %v5674_v16 }
 0x8a3   :  { %v2929_v1 = vpop.permute.xlu0 %2928  ;;  %v5209_v38 = vpack.c.bf16 %v2918_v24, %v2876_v0  ;;  %v3037_v21 = vrot.slane %v3024_v62, %v5677_v17  ;;  %v3041_v22 = vrot.slane %v3024_v62, %v5674_v16 }
 0x8a4   :  { %v5187_v3 = vpack.c.bf16 %v2916_v14, %v2874_v13  ;;  %v2931_v34 = vpop.permute.xlu1 %2930  ;;  %v5207_v37 = vpack.c.bf16 %v2919_v29, %v2877_v28 }
 0x8a5   :  { %v2938_v39 = vsel %vm272_vm4, %v2929_v1, %v2931_v34 }
 0x8a6   :  { %5188 = vmatpush1.bf16.msra.mxu0 %v5187_v3  ;;  %5208 = vmatprep.subr.bf16.mxu1 %v5207_v37  ;;  %v2962_v44 = vmul.f32 %v2945_v32, %v2938_v39  ;;  %v3066_v3 = vld [vmem:[#allocation6 + $0x20] sm:$0xf] }
 0x8a7   :  { %v2933_v43 = vpop.permute.xlu0 %2932  ;;  %5210 = vmatpush1.bf16.msra.mxu1 %v5209_v38 }
 0x8a8   :  { %v2937_v45 = vsel %vm272_vm4, %v2931_v34, %v2933_v43  ;;  %v2935_v33 = vpop.permute.xlu1 %2934  ;;  %v5191_v52 = vpack.c.bf16 %v2962_v44, %v6567_v30  ;;  %v3029_v30 = vrot.slane %v3024_v62, %v5671_v15 }
 0x8a9   :  { %v2963_v46 = vmul.f32 %v2949_v40, %v2937_v45  ;;  %v2936_v35 = vsel %vm272_vm4, %v2933_v43, %v2935_v33  ;;  %v2939_v47 = vsel %vm272_vm4, %v2935_v33, %v2929_v1  ;;  %v3071_v43 = vrot.slane %v3066_v3, %v5671_v15 }
 0x8aa   :  { %v2964_v8 = vmul.f32 %v2953_v41, %v2936_v35  ;;  %v2965_v18 = vmul.f32 %v2957_v42, %v2939_v47  ;;  %v3079_v35 = vrot.slane %v3066_v3, %v5677_v17  ;;  %v3083_v47 = vrot.slane %v3066_v3, %v5674_v16 }
 0x8ab   :  { %v2971_v31 = vpop.permute.xlu0 %2970  ;;  %v5189_v50 = vpack.c.bf16 %v2963_v46, %v6569_v51  ;;  %v2991_v51 = vrot.slane %v2982_v61, %v5667_v10  ;;  %v3075_v46 = vrot.slane %v3066_v3, %v5667_v10 }
 0x8ac   :  { %v5213_v55 = vpack.c.bf16 %v2964_v8, %v6573_v53  ;;  %v2973_v56 = vpop.permute.xlu1 %2972  ;;  %v5211_v57 = vpack.c.bf16 %v2965_v18, %v6577_v54  ;;  %v2995_v54 = vrot.slane %v2982_v61, %v5677_v17 }
 0x8ad   :  { %5190 = vmatprep.subr.bf16.mxu0 %v5189_v50  ;;  %v2980_v53 = vsel %vm316_vm6, %v2971_v31, %v2973_v56 }
 0x8ae   :  { %5192 = vmatpush1.bf16.msra.mxu0 %v5191_v52  ;;  %5212 = vmatprep.subr.bf16.mxu1 %v5211_v57  ;;  %v3004_v26 = vmul.f32 %v2987_v5, %v2980_v53  ;;  %v2755_v5 = vld [vmem:[#allocation8 + $0x28] sm:$0xff] }
 0x8af   :  { %v2975_v6 = vpop.permute.xlu0 %2974  ;;  %5214 = vmatpush1.bf16.msra.mxu1 %v5213_v55 }
 0x8b0   :  { %v2977_v60 = vpop.permute.xlu1 %2976  ;;  %v2979_v19 = vsel %vm316_vm6, %v2973_v56, %v2975_v6 }
 0x8b1   :  { %v2978_v23 = vsel %vm316_vm6, %v2975_v6, %v2977_v60  ;;  %v2981_v24 = vsel %vm316_vm6, %v2977_v60, %v2971_v31  ;;  %v3005_v14 = vmul.f32 %v2991_v51, %v2979_v19 }
 0x8b2   :  { %v3006_v32 = vmul.f32 %v2995_v54, %v2978_v23  ;;  %v3007_v34 = vmul.f32 %v2999_v20, %v2981_v24  ;;  %v3341_v20 = vld [vmem:[#allocation6 + $0x4] sm:$0xf] }
 0x8b3   :  { %v3013_v63 = vpop.permute.xlu0 %3012  ;;  %v3350_v23 = vrot.slane %v3341_v20, %v5667_v10  ;;  %v3358_v3 = vrot.slane %v3341_v20, %v5674_v16 }
 0x8b4   :  { %v3015_v7 = vpop.permute.xlu1 %3014 }
 0x8b5   :  { %v3022_v11 = vsel %vm360_vm5, %v3013_v63, %v3015_v7 }
 0x8b6   :  { %v3046_v27 = vmul.f32 %v3029_v30, %v3022_v11 }
 0x8b7   :  { %v3017_v25 = vpop.permute.xlu0 %3016 }
 0x8b8   :  { %v3021_v13 = vsel %vm360_vm5, %v3015_v7, %v3017_v25  ;;  %v3019_v28 = vpop.permute.xlu1 %3018  ;;  %v5195_v41 = vpack.c.bf16 %v3046_v27, %v3004_v26 }
 0x8b9   :  { %v3047_v29 = vmul.f32 %v3033_v12, %v3021_v13  ;;  %v3020_v0 = vsel %vm360_vm5, %v3017_v25, %v3019_v28  ;;  %v3023_v1 = vsel %vm360_vm5, %v3019_v28, %v3013_v63 }
 0x8ba   :  { %v3048_v37 = vmul.f32 %v3037_v21, %v3020_v0  ;;  %v3049_v38 = vmul.f32 %v3041_v22, %v3023_v1  ;;  %v3346_v1 = vrot.slane %v3341_v20, %v5671_v15 }
 0x8bb   :  { %v3055_v39 = vpop.permute.xlu0 %3054  ;;  %v5193_v40 = vpack.c.bf16 %v3047_v29, %v3005_v14  ;;  %v3354_v14 = vrot.slane %v3341_v20, %v5677_v17 }
 0x8bc   :  { %v5217_v42 = vpack.c.bf16 %v3048_v37, %v3006_v32  ;;  %v3057_v44 = vpop.permute.xlu1 %3056  ;;  %v5215_v45 = vpack.c.bf16 %v3049_v38, %v3007_v34 }
 0x8bd   :  { %v3064_v33 = vsel %vm404_vm7, %v3055_v39, %v3057_v44  ;;  %5194 = vmatprep.subr.bf16.mxu0 %v5193_v40 }
 0x8be   :  { %5196 = vmatpush1.bf16.msra.mxu0 %v5195_v41  ;;  %5216 = vmatprep.subr.bf16.mxu1 %v5215_v45  ;;  %v3088_v18 = vmul.f32 %v3071_v43, %v3064_v33 }
 0x8bf   :  { %v3059_v8 = vpop.permute.xlu0 %3058  ;;  %5218 = vmatpush1.bf16.msra.mxu1 %v5217_v42 }
 0x8c0   :  { %v3063_v31 = vsel %vm404_vm7, %v3057_v44, %v3059_v8  ;;  %v3061_v50 = vpop.permute.xlu1 %3060  ;;  %v5200_v61 = vpack.c.bf16 %v5513_v59, %v3088_v18 }
 0x8c1   :  { %v3089_v52 = vmul.f32 %v3075_v46, %v3063_v31  ;;  %v3062_v55 = vsel %vm404_vm7, %v3059_v8, %v3061_v50  ;;  %v3065_v56 = vsel %vm404_vm7, %v3061_v50, %v3055_v39 }
 0x8c2   :  { %v3090_v57 = vmul.f32 %v3079_v35, %v3062_v55  ;;  %v3091_v6 = vmul.f32 %v3083_v47, %v3065_v56  ;;  %v3383_v56 = vld [vmem:[#allocation6 + $0x8] sm:$0xf] }
 0x8c3   :  { %v5197_v60 = vpack.c.bf16 %v5513_v59, %v3089_v52 }
 0x8c4   :  { %v5219_v62 = vpack.c.bf16 %v5513_v59, %v3091_v6  ;;  %v5222_v63 = vpack.c.bf16 %v5513_v59, %v3090_v57  ;;  %v3425_v6 = vld [vmem:[#allocation6 + $0xc] sm:$0xf] }
 0x8c5   :  { %5199 = vmatprep.subr.msk.bf16.mxu0 %vm5787_vm10, %v5197_v60  ;;  %v3442_v20 = vrot.slane %v3425_v6, %v5674_v16 }
 0x8c6   :  { %5202 = vmatpush1.bf16.msk.msra.mxu0 %vm5787_vm10, %v5200_v61  ;;  %5221 = vmatprep.subr.msk.bf16.mxu1 %vm5787_vm10, %v5219_v62  ;;  %v3392_v61 = vrot.slane %v3383_v56, %v5667_v10  ;;  %v3434_v62 = vrot.slane %v3425_v6, %v5667_v10 }
 0x8c7   :  { %5224 = vmatpush1.bf16.msk.msra.mxu1 %vm5787_vm10, %v5222_v63 }
 0x8c9   :  { %4917 = vmatmul.mubr.msk.f32.vlgmr.msra.gmra.mrb[10].mxu0 %vm480_vm11, %v2755_v5 }
 0x8ca   :  { %4918 = vmatmul.mubr.msk.f32.vlgmr.msra.gmra.mrb[10].mxu1 %vm480_vm11, %v2755_v5  ;;  %3734 = vmatprep.mubr.f32.mxu0 %v5510_v4 }
 0x8cb   :  { %3805 = vmatprep.mubr.f32.mxu1 %v5510_v4 }
 0x99c   :  { %v3205_v51 = vpop.f32.mrb[10].mxu0 }
 0x99d   :  { %v6756_v30 = vadd.f32 %v3205_v51, %v6376_v2  ;;  %v3207_v7 = vpop.f32.mrb[11].mxu0  ;;  %v3276_v53 = vpop.f32.mrb[10].mxu1 }
 0x99e   :  { %v6759_v54 = vadd.f32 %v3207_v7, %v6379_v36  ;;  %v3278_v11 = vpop.f32.mrb[11].mxu1  ;;  %v6766_v12 = vadd.f32 %v3276_v53, %v6386_v48  ;;  %v3299_v48 = vld [vmem:[#allocation6] sm:$0xf]  ;;  %v3388_v7 = vrot.slane %v3383_v56, %v5671_v15  ;;  %v3400_v53 = vrot.slane %v3383_v56, %v5674_v16 }
 0x99f   :  { %3287 = vrot.lane.b32.xlu0 %v6756_v30, %s5503_s12  ;;  %v6769_v19 = vadd.f32 %v3278_v11, %v6389_v49  ;;  %v3308_v22 = vrot.slane %v3299_v48, %v5667_v10  ;;  %v3304_v27 = vrot.slane %v3299_v48, %v5671_v15  ;;  %v3316_v13 = vrot.slane %v3299_v48, %v5674_v16 }
 0x9a0   :  { %3289 = vrot.lane.b32.xlu1 %v6759_v54, %s5503_s12  ;;  %v3312_v32 = vrot.slane %v3299_v48, %v5677_v17 }
 0x9a3   :  { %3291 = vrot.lane.b32.xlu0 %v6766_v12, %s5503_s12 }
 0x9a4   :  { %3293 = vrot.lane.b32.xlu1 %v6769_v19, %s5503_s12 }
 0x9a7   :  { %3329 = vrot.lane.b32.xlu0 %v6756_v30, %s5504_s3 }
 0x9a8   :  { %3331 = vrot.lane.b32.xlu1 %v6759_v54, %s5504_s3 }
 0x9ab   :  { %3333 = vrot.lane.b32.xlu0 %v6766_v12, %s5504_s3 }
 0x9ac   :  { %3335 = vrot.lane.b32.xlu1 %v6769_v19, %s5504_s3 }
 0x9af   :  { %3371 = vrot.lane.b32.xlu0 %v6756_v30, %s5505_s13 }
 0x9b0   :  { %3373 = vrot.lane.b32.xlu1 %v6759_v54, %s5505_s13 }
 0x9b3   :  { %3375 = vrot.lane.b32.xlu0 %v6766_v12, %s5505_s13 }
 0x9b4   :  { %3377 = vrot.lane.b32.xlu1 %v6769_v19, %s5505_s13 }
 0x9b7   :  { %3413 = vrot.lane.b32.xlu0 %v6756_v30, %s5506_s1 }
 0x9b8   :  { %3415 = vrot.lane.b32.xlu1 %v6759_v54, %s5506_s1 }
 0x9bb   :  { %3417 = vrot.lane.b32.xlu0 %v6766_v12, %s5506_s1 }
 0x9bc   :  { %3419 = vrot.lane.b32.xlu1 %v6769_v19, %s5506_s1 }
 0x9bf   :  { %3459 = vrot.lane.b32.xlu0 %v6756_v30, %s5507_s14 }
 0x9c0   :  { %3461 = vrot.lane.b32.xlu1 %v6759_v54, %s5507_s14 }
 0x9c3   :  { %3463 = vrot.lane.b32.xlu0 %v6766_v12, %s5507_s14 }
 0x9c4   :  { %3465 = vrot.lane.b32.xlu1 %v6769_v19, %s5507_s14 }
 0x9c7   :  { %3501 = vrot.lane.b32.xlu0 %v6756_v30, %s5508_s15 }
 0x9c8   :  { %3503 = vrot.lane.b32.xlu1 %v6759_v54, %s5508_s15 }
 0x9cb   :  { %3505 = vrot.lane.b32.xlu0 %v6766_v12, %s5508_s15 }
 0x9cc   :  { %3507 = vrot.lane.b32.xlu1 %v6769_v19, %s5508_s15 }
 0x9cf   :  { %3543 = vrot.lane.b32.xlu0 %v6756_v30, %s5509_s16 }
 0x9d0   :  { %3545 = vrot.lane.b32.xlu1 %v6759_v54, %s5509_s16 }
 0x9d3   :  { %3547 = vrot.lane.b32.xlu0 %v6766_v12, %s5509_s16 }
 0x9d4   :  { %3549 = vrot.lane.b32.xlu1 %v6769_v19, %s5509_s16 }
 0x9d7   :  { %3585 = vrot.lane.b32.xlu0 %v6756_v30, %s5511_s17 }
 0x9d8   :  { %3587 = vrot.lane.b32.xlu1 %v6759_v54, %s5511_s17 }
 0x9db   :  { %3589 = vrot.lane.b32.xlu0 %v6766_v12, %s5511_s17 }
 0x9dc   :  { %3591 = vrot.lane.b32.xlu1 %v6769_v19, %s5511_s17 }
 0xa11   :  { %v3288_v2 = vpop.permute.xlu0 %3287 }
 0xa12   :  { %v3290_v36 = vpop.permute.xlu1 %3289 }
 0xa13   :  { %v3297_v24 = vsel %vm93_vm0, %v3288_v2, %v3290_v36 }
 0xa14   :  { %v3322_v29 = vmul.f32 %v3308_v22, %v3297_v24 }
 0xa15   :  { %v3292_v49 = vpop.permute.xlu0 %3291 }
 0xa16   :  { %v3294_v21 = vpop.permute.xlu1 %3293  ;;  %v3296_v39 = vsel %vm93_vm0, %v3290_v36, %v3292_v49 }
 0xa17   :  { %v3295_v34 = vsel %vm93_vm0, %v3292_v49, %v3294_v21  ;;  %v3298_v37 = vsel %vm93_vm0, %v3294_v21, %v3288_v2  ;;  %v3323_v8 = vmul.f32 %v3312_v32, %v3296_v39  ;;  %v3438_v2 = vrot.slane %v3425_v6, %v5677_v17 }
 0xa18   :  { %v3321_v33 = vmul.f32 %v3304_v27, %v3298_v37  ;;  %v3324_v46 = vmul.f32 %v3316_v13, %v3295_v34  ;;  %v3430_v49 = vrot.slane %v3425_v6, %v5671_v15  ;;  %v3396_v21 = vrot.slane %v3383_v56, %v5677_v17 }
 0xa19   :  { %v3330_v25 = vpop.permute.xlu0 %3329 }
 0xa1a   :  { %v3332_v26 = vpop.permute.xlu1 %3331 }
 0xa1b   :  { %v3339_v28 = vsel %vm136_vm1, %v3330_v25, %v3332_v26 }
 0xa1c   :  { %v3364_v0 = vmul.f32 %v3350_v23, %v3339_v28 }
 0xa1d   :  { %v3334_v38 = vpop.permute.xlu0 %3333 }
 0xa1e   :  { %v3338_v40 = vsel %vm136_vm1, %v3332_v26, %v3334_v38  ;;  %v3336_v41 = vpop.permute.xlu1 %3335  ;;  %v5225_v42 = vpack.c.bf16 %v3364_v0, %v3322_v29  ;;  %v3471_v0 = vld [vmem:[#allocation6 + $0x14] sm:$0xf] }
 0xa1f   :  { %v3365_v43 = vmul.f32 %v3354_v14, %v3338_v40  ;;  %v3337_v44 = vsel %vm136_vm1, %v3334_v38, %v3336_v41  ;;  %v3340_v45 = vsel %vm136_vm1, %v3336_v41, %v3330_v25  ;;  %v3476_v40 = vrot.slane %v3471_v0, %v5671_v15 }
 0xa20   :  { %v3363_v35 = vmul.f32 %v3346_v1, %v3340_v45  ;;  %v3366_v47 = vmul.f32 %v3358_v3, %v3337_v44  ;;  %5226 = vmatprep.subr.bf16.mxu0 %v5225_v42  ;;  %v3480_v45 = vrot.slane %v3471_v0, %v5667_v10 }
 0xa21   :  { %v3372_v18 = vpop.permute.xlu0 %3371  ;;  %v5249_v55 = vpack.c.bf16 %v3365_v43, %v3323_v8 }
 0xa22   :  { %v5227_v31 = vpack.c.bf16 %v3363_v35, %v3321_v33  ;;  %v3374_v50 = vpop.permute.xlu1 %3373  ;;  %v5247_v52 = vpack.c.bf16 %v3366_v47, %v3324_v46  ;;  %v3484_v33 = vrot.slane %v3471_v0, %v5677_v17  ;;  %v3488_v46 = vrot.slane %v3471_v0, %v5674_v16 }
 0xa23   :  { %v3381_v63 = vsel %vm180_vm2, %v3372_v18, %v3374_v50 }
 0xa24   :  { %5228 = vmatpush1.bf16.msra.mxu0 %v5227_v31  ;;  %5248 = vmatprep.subr.bf16.mxu1 %v5247_v52  ;;  %v3406_v36 = vmul.f32 %v3392_v61, %v3381_v63 }
 0xa25   :  { %v3376_v57 = vpop.permute.xlu0 %3375  ;;  %5250 = vmatpush1.bf16.msra.mxu1 %v5249_v55 }
 0xa26   :  { %v3378_v60 = vpop.permute.xlu1 %3377  ;;  %v3380_v25 = vsel %vm180_vm2, %v3374_v50, %v3376_v57 }
 0xa27   :  { %v3379_v22 = vsel %vm180_vm2, %v3376_v57, %v3378_v60  ;;  %v3382_v23 = vsel %vm180_vm2, %v3378_v60, %v3372_v18  ;;  %v3407_v37 = vmul.f32 %v3396_v21, %v3380_v25 }
 0xa28   :  { %v3405_v1 = vmul.f32 %v3388_v7, %v3382_v23  ;;  %v3408_v3 = vmul.f32 %v3400_v53, %v3379_v22  ;;  %v3513_v7 = vld [vmem:[#allocation6 + $0x18] sm:$0xf]  ;;  %v3555_v53 = vld [vmem:[#allocation6 + $0x1c] sm:$0xf] }
 0xa29   :  { %v3414_v5 = vpop.permute.xlu0 %3413  ;;  %v3526_v21 = vrot.slane %v3513_v7, %v5677_v17  ;;  %v3564_v23 = vrot.slane %v3555_v53, %v5667_v10  ;;  %v3530_v25 = vrot.slane %v3513_v7, %v5674_v16 }
 0xa2a   :  { %v3416_v51 = vpop.permute.xlu1 %3415 }
 0xa2b   :  { %v3423_v11 = vsel %vm224_vm3, %v3414_v5, %v3416_v51 }
 0xa2c   :  { %v3448_v48 = vmul.f32 %v3434_v62, %v3423_v11 }
 0xa2d   :  { %v3418_v24 = vpop.permute.xlu0 %3417 }
 0xa2e   :  { %v3422_v26 = vsel %vm224_vm3, %v3416_v51, %v3418_v24  ;;  %v3420_v27 = vpop.permute.xlu1 %3419  ;;  %v5229_v13 = vpack.c.bf16 %v3448_v48, %v3406_v36  ;;  %v3522_v36 = vrot.slane %v3513_v7, %v5667_v10  ;;  %v3560_v48 = vrot.slane %v3555_v53, %v5671_v15 }
 0xa2f   :  { %v3449_v28 = vmul.f32 %v3438_v2, %v3422_v26  ;;  %v3421_v14 = vsel %vm224_vm3, %v3418_v24, %v3420_v27  ;;  %v3424_v29 = vsel %vm224_vm3, %v3420_v27, %v3414_v5  ;;  %v3518_v2 = vrot.slane %v3513_v7, %v5671_v15 }
 0xa30   :  { %v3447_v32 = vmul.f32 %v3430_v49, %v3424_v29  ;;  %v3450_v34 = vmul.f32 %v3442_v20, %v3421_v14  ;;  %5230 = vmatprep.subr.bf16.mxu0 %v5229_v13  ;;  %v3568_v26 = vrot.slane %v3555_v53, %v5677_v17  ;;  %v3572_v27 = vrot.slane %v3555_v53, %v5674_v16 }
 0xa31   :  { %v3460_v38 = vpop.permute.xlu0 %3459  ;;  %v5253_v43 = vpack.c.bf16 %v3449_v28, %v3407_v37 }
 0xa32   :  { %v5231_v39 = vpack.c.bf16 %v3447_v32, %v3405_v1  ;;  %v3462_v41 = vpop.permute.xlu1 %3461  ;;  %v5251_v42 = vpack.c.bf16 %v3450_v34, %v3408_v3 }
 0xa33   :  { %v3469_v44 = vsel %vm272_vm4, %v3460_v38, %v3462_v41 }
 0xa34   :  { %5232 = vmatpush1.bf16.msra.mxu0 %v5231_v39  ;;  %5252 = vmatprep.subr.bf16.mxu1 %v5251_v42  ;;  %v3493_v47 = vmul.f32 %v3476_v40, %v3469_v44  ;;  %v3597_v39 = vld [vmem:[#allocation6 + $0x20] sm:$0xf] }
 0xa35   :  { %v3464_v35 = vpop.permute.xlu0 %3463  ;;  %5254 = vmatpush1.bf16.msra.mxu1 %v5253_v43 }
 0xa36   :  { %v3468_v8 = vsel %vm272_vm4, %v3462_v41, %v3464_v35  ;;  %v3466_v18 = vpop.permute.xlu1 %3465  ;;  %v5235_v60 = vpack.c.bf16 %v3493_v47, %v6756_v30 }
 0xa37   :  { %v3494_v31 = vmul.f32 %v3480_v45, %v3468_v8  ;;  %v3467_v50 = vsel %vm272_vm4, %v3464_v35, %v3466_v18  ;;  %v3470_v52 = vsel %vm272_vm4, %v3466_v18, %v3460_v38  ;;  %v3602_v35 = vrot.slane %v3597_v39, %v5671_v15 }
 0xa38   :  { %v3495_v55 = vmul.f32 %v3484_v33, %v3467_v50  ;;  %v3496_v56 = vmul.f32 %v3488_v46, %v3470_v52  ;;  %v3610_v50 = vrot.slane %v3597_v39, %v5677_v17  ;;  %v3614_v52 = vrot.slane %v3597_v39, %v5674_v16 }
 0xa39   :  { %v3502_v57 = vpop.permute.xlu0 %3501  ;;  %v5233_v6 = vpack.c.bf16 %v3494_v31, %v6759_v54  ;;  %v3606_v31 = vrot.slane %v3597_v39, %v5667_v10 }
 0xa3a   :  { %v5257_v61 = vpack.c.bf16 %v3495_v55, %v6766_v12  ;;  %v3504_v62 = vpop.permute.xlu1 %3503  ;;  %v5255_v63 = vpack.c.bf16 %v3496_v56, %v6769_v19 }
 0xa3b   :  { %5234 = vmatprep.subr.bf16.mxu0 %v5233_v6  ;;  %v3511_v20 = vsel %vm316_vm6, %v3502_v57, %v3504_v62 }
 0xa3c   :  { %5236 = vmatpush1.bf16.msra.mxu0 %v5235_v60  ;;  %5256 = vmatprep.subr.bf16.mxu1 %v5255_v63  ;;  %v3535_v29 = vmul.f32 %v3518_v2, %v3511_v20  ;;  %v3286_v2 = vld [vmem:[#allocation8 + $0x30] sm:$0xff] }
 0xa3d   :  { %v3506_v5 = vpop.permute.xlu0 %3505  ;;  %5258 = vmatpush1.bf16.msra.mxu1 %v5257_v61 }
 0xa3e   :  { %v3508_v51 = vpop.permute.xlu1 %3507  ;;  %v3510_v24 = vsel %vm316_vm6, %v3504_v62, %v3506_v5 }
 0xa3f   :  { %v3509_v13 = vsel %vm316_vm6, %v3506_v5, %v3508_v51  ;;  %v3512_v28 = vsel %vm316_vm6, %v3508_v51, %v3502_v57  ;;  %v3536_v32 = vmul.f32 %v3522_v36, %v3510_v24 }
 0xa40   :  { %v3537_v40 = vmul.f32 %v3526_v21, %v3509_v13  ;;  %v3538_v41 = vmul.f32 %v3530_v25, %v3512_v28  ;;  %v3872_v28 = vld [vmem:[#allocation6 + $0x4] sm:$0xf] }
 0xa41   :  { %v3544_v11 = vpop.permute.xlu0 %3543  ;;  %v3885_v39 = vrot.slane %v3872_v28, %v5677_v17 }
 0xa42   :  { %v3546_v49 = vpop.permute.xlu1 %3545 }
 0xa43   :  { %v3553_v22 = vsel %vm360_vm5, %v3544_v11, %v3546_v49 }
 0xa44   :  { %v3577_v0 = vmul.f32 %v3560_v48, %v3553_v22 }
 0xa45   :  { %v3548_v14 = vpop.permute.xlu0 %3547 }
 0xa46   :  { %v3552_v1 = vsel %vm360_vm5, %v3546_v49, %v3548_v14  ;;  %v3550_v3 = vpop.permute.xlu1 %3549  ;;  %v5239_v33 = vpack.c.bf16 %v3577_v0, %v3535_v29  ;;  %v3881_v0 = vrot.slane %v3872_v28, %v5667_v10 }
 0xa47   :  { %v3578_v34 = vmul.f32 %v3564_v23, %v3552_v1  ;;  %v3551_v37 = vsel %vm360_vm5, %v3548_v14, %v3550_v3  ;;  %v3554_v38 = vsel %vm360_vm5, %v3550_v3, %v3544_v11 }
 0xa48   :  { %v3579_v42 = vmul.f32 %v3568_v26, %v3551_v37  ;;  %v3580_v43 = vmul.f32 %v3572_v27, %v3554_v38  ;;  %v3830_v27 = vld [vmem:[#allocation6] sm:$0xf] }
 0xa49   :  { %v3586_v44 = vpop.permute.xlu0 %3585  ;;  %v5237_v45 = vpack.c.bf16 %v3578_v34, %v3536_v32  ;;  %v3839_v29 = vrot.slane %v3830_v27, %v5667_v10  ;;  %v3835_v34 = vrot.slane %v3830_v27, %v5671_v15  ;;  %v3847_v37 = vrot.slane %v3830_v27, %v5674_v16 }
 0xa4a   :  { %v5261_v46 = vpack.c.bf16 %v3579_v42, %v3537_v40  ;;  %v3588_v47 = vpop.permute.xlu1 %3587  ;;  %v5259_v8 = vpack.c.bf16 %v3580_v43, %v3538_v41  ;;  %v3877_v42 = vrot.slane %v3872_v28, %v5671_v15  ;;  %v3889_v43 = vrot.slane %v3872_v28, %v5674_v16 }
 0xa4b   :  { %v3595_v18 = vsel %vm404_vm7, %v3586_v44, %v3588_v47  ;;  %5238 = vmatprep.subr.bf16.mxu0 %v5237_v45 }
 0xa4c   :  { %5240 = vmatpush1.bf16.msra.mxu0 %v5239_v33  ;;  %5260 = vmatprep.subr.bf16.mxu1 %v5259_v8  ;;  %v3619_v56 = vmul.f32 %v3602_v35, %v3595_v18 }
 0xa4d   :  { %v3590_v55 = vpop.permute.xlu0 %3589  ;;  %5262 = vmatpush1.bf16.msra.mxu1 %v5261_v46 }
 0xa4e   :  { %v3594_v57 = vsel %vm404_vm7, %v3588_v47, %v3590_v55  ;;  %v3592_v6 = vpop.permute.xlu1 %3591  ;;  %v5244_v7 = vpack.c.bf16 %v5513_v59, %v3619_v56 }
 0xa4f   :  { %v3620_v60 = vmul.f32 %v3606_v31, %v3594_v57  ;;  %v3593_v61 = vsel %vm404_vm7, %v3590_v55, %v3592_v6  ;;  %v3596_v62 = vsel %vm404_vm7, %v3592_v6, %v3586_v44  ;;  %v3843_v44 = vrot.slane %v3830_v27, %v5677_v17 }
 0xa50   :  { %v3621_v63 = vmul.f32 %v3610_v50, %v3593_v61  ;;  %v3622_v5 = vmul.f32 %v3614_v52, %v3596_v62 }
 0xa51   :  { %v5241_v51 = vpack.c.bf16 %v5513_v59, %v3620_v60 }
 0xa52   :  { %v5263_v53 = vpack.c.bf16 %v5513_v59, %v3622_v5  ;;  %v5266_v11 = vpack.c.bf16 %v5513_v59, %v3621_v63 }
 0xa53   :  { %5243 = vmatprep.subr.msk.bf16.mxu0 %vm5787_vm10, %v5241_v51 }
 0xa54   :  { %5246 = vmatpush1.bf16.msk.msra.mxu0 %vm5787_vm10, %v5244_v7  ;;  %5265 = vmatprep.subr.msk.bf16.mxu1 %vm5787_vm10, %v5263_v53  ;;  %v3914_v7 = vld [vmem:[#allocation6 + $0x8] sm:$0xf] }
 0xa55   :  { %5268 = vmatpush1.bf16.msk.msra.mxu1 %vm5787_vm10, %v5266_v11  ;;  %v3956_v11 = vld [vmem:[#allocation6 + $0xc] sm:$0xf]  ;;  %v3931_v27 = vrot.slane %v3914_v7, %v5674_v16 }
 0xa56   :  { %v3969_v28 = vrot.slane %v3956_v11, %v5677_v17 }
 0xa57   :  { %4919 = vmatmul.mubr.msk.f32.vlgmr.msra.gmra.mrb[12].mxu0 %vm480_vm11, %v3286_v2 }
 0xa58   :  { %4920 = vmatmul.mubr.msk.f32.vlgmr.msra.gmra.mrb[12].mxu1 %vm480_vm11, %v3286_v2  ;;  %4265 = vmatprep.mubr.f32.mxu0 %v5510_v4 }
 0xa59   :  { %4336 = vmatprep.mubr.f32.mxu1 %v5510_v4 }
 0xb2a   :  { %v3736_v36 = vpop.f32.mrb[12].mxu0 }
 0xb2b   :  { %v6947_v48 = vmax.f32 %v3736_v36, 0.0  ;;  %v3738_v49 = vpop.f32.mrb[13].mxu0  ;;  %v3807_v20 = vpop.f32.mrb[12].mxu1  ;;  %v3923_v36 = vrot.slane %v3914_v7, %v5667_v10 }
 0xb2c   :  { %v6949_v21 = vmax.f32 %v3738_v49, 0.0  ;;  %v3809_v22 = vpop.f32.mrb[13].mxu1  ;;  %v6953_v23 = vmax.f32 %v3807_v20, 0.0  ;;  %v3965_v49 = vrot.slane %v3956_v11, %v5667_v10 }
 0xb2d   :  { %3818 = vrot.lane.b32.xlu0 %v6947_v48, %s5503_s12  ;;  %v6957_v24 = vmax.f32 %v3809_v22, 0.0 }
 0xb2e   :  { %3820 = vrot.lane.b32.xlu1 %v6949_v21, %s5503_s12 }
 0xb31   :  { %3822 = vrot.lane.b32.xlu0 %v6953_v23, %s5503_s12 }
 0xb32   :  { %3824 = vrot.lane.b32.xlu1 %v6957_v24, %s5503_s12 }
 0xb35   :  { %3860 = vrot.lane.b32.xlu0 %v6947_v48, %s5504_s3 }
 0xb36   :  { %3862 = vrot.lane.b32.xlu1 %v6949_v21, %s5504_s3 }
 0xb39   :  { %3864 = vrot.lane.b32.xlu0 %v6953_v23, %s5504_s3 }
 0xb3a   :  { %3866 = vrot.lane.b32.xlu1 %v6957_v24, %s5504_s3 }
 0xb3d   :  { %3902 = vrot.lane.b32.xlu0 %v6947_v48, %s5505_s13 }
 0xb3e   :  { %3904 = vrot.lane.b32.xlu1 %v6949_v21, %s5505_s13 }
 0xb41   :  { %3906 = vrot.lane.b32.xlu0 %v6953_v23, %s5505_s13 }
 0xb42   :  { %3908 = vrot.lane.b32.xlu1 %v6957_v24, %s5505_s13 }
 0xb45   :  { %3944 = vrot.lane.b32.xlu0 %v6947_v48, %s5506_s1 }
 0xb46   :  { %3946 = vrot.lane.b32.xlu1 %v6949_v21, %s5506_s1 }
 0xb49   :  { %3948 = vrot.lane.b32.xlu0 %v6953_v23, %s5506_s1 }
 0xb4a   :  { %3950 = vrot.lane.b32.xlu1 %v6957_v24, %s5506_s1 }
 0xb4d   :  { %3990 = vrot.lane.b32.xlu0 %v6947_v48, %s5507_s14 }
 0xb4e   :  { %3992 = vrot.lane.b32.xlu1 %v6949_v21, %s5507_s14 }
 0xb51   :  { %3994 = vrot.lane.b32.xlu0 %v6953_v23, %s5507_s14 }
 0xb52   :  { %3996 = vrot.lane.b32.xlu1 %v6957_v24, %s5507_s14 }
 0xb55   :  { %4032 = vrot.lane.b32.xlu0 %v6947_v48, %s5508_s15 }
 0xb56   :  { %4034 = vrot.lane.b32.xlu1 %v6949_v21, %s5508_s15 }
 0xb59   :  { %4036 = vrot.lane.b32.xlu0 %v6953_v23, %s5508_s15 }
 0xb5a   :  { %4038 = vrot.lane.b32.xlu1 %v6957_v24, %s5508_s15 }
 0xb5d   :  { %4074 = vrot.lane.b32.xlu0 %v6947_v48, %s5509_s16 }
 0xb5e   :  { %4076 = vrot.lane.b32.xlu1 %v6949_v21, %s5509_s16 }
 0xb61   :  { %4078 = vrot.lane.b32.xlu0 %v6953_v23, %s5509_s16 }
 0xb62   :  { %4080 = vrot.lane.b32.xlu1 %v6957_v24, %s5509_s16 }
 0xb65   :  { %4116 = vrot.lane.b32.xlu0 %v6947_v48, %s5511_s17 }
 0xb66   :  { %4118 = vrot.lane.b32.xlu1 %v6949_v21, %s5511_s17 }
 0xb69   :  { %4120 = vrot.lane.b32.xlu0 %v6953_v23, %s5511_s17 }
 0xb6a   :  { %4122 = vrot.lane.b32.xlu1 %v6957_v24, %s5511_s17 }
 0xb9f   :  { %v3819_v25 = vpop.permute.xlu0 %3818 }
 0xba0   :  { %v3821_v26 = vpop.permute.xlu1 %3820 }
 0xba1   :  { %v3828_v1 = vsel %vm93_vm0, %v3819_v25, %v3821_v26 }
 0xba2   :  { %v3853_v40 = vmul.f32 %v3839_v29, %v3828_v1  ;;  %v3973_v1 = vrot.slane %v3956_v11, %v5674_v16 }
 0xba3   :  { %v3823_v13 = vpop.permute.xlu0 %3822 }
 0xba4   :  { %v3825_v14 = vpop.permute.xlu1 %3824  ;;  %v3827_v35 = vsel %vm93_vm0, %v3821_v26, %v3823_v13  ;;  %v3919_v26 = vrot.slane %v3914_v7, %v5671_v15 }
 0xba5   :  { %v3826_v45 = vsel %vm93_vm0, %v3823_v13, %v3825_v14  ;;  %v3829_v33 = vsel %vm93_vm0, %v3825_v14, %v3819_v25  ;;  %v3854_v60 = vmul.f32 %v3843_v44, %v3827_v35 }
 0xba6   :  { %v3852_v55 = vmul.f32 %v3835_v34, %v3829_v33  ;;  %v3855_v56 = vmul.f32 %v3847_v37, %v3826_v45  ;;  %v4002_v45 = vld [vmem:[#allocation6 + $0x14] sm:$0xf] }
 0xba7   :  { %v3861_v3 = vpop.permute.xlu0 %3860 }
 0xba8   :  { %v3863_v32 = vpop.permute.xlu1 %3862 }
 0xba9   :  { %v3870_v38 = vsel %vm136_vm1, %v3861_v3, %v3863_v32 }
 0xbaa   :  { %v3895_v41 = vmul.f32 %v3881_v0, %v3870_v38  ;;  %v3961_v0 = vrot.slane %v3956_v11, %v5671_v15 }
 0xbab   :  { %v3865_v46 = vpop.permute.xlu0 %3864 }
 0xbac   :  { %v3869_v47 = vsel %vm136_vm1, %v3863_v32, %v3865_v46  ;;  %v3867_v8 = vpop.permute.xlu1 %3866  ;;  %v5269_v18 = vpack.c.bf16 %v3895_v41, %v3853_v40 }
 0xbad   :  { %v3896_v31 = vmul.f32 %v3885_v39, %v3869_v47  ;;  %v3868_v50 = vsel %vm136_vm1, %v3865_v46, %v3867_v8  ;;  %v3871_v52 = vsel %vm136_vm1, %v3867_v8, %v3861_v3  ;;  %v3927_v3 = vrot.slane %v3914_v7, %v5677_v17 }
 0xbae   :  { %v3894_v57 = vmul.f32 %v3877_v42, %v3871_v52  ;;  %v3897_v6 = vmul.f32 %v3889_v43, %v3868_v50  ;;  %5270 = vmatprep.subr.bf16.mxu0 %v5269_v18  ;;  %v4007_v50 = vrot.slane %v4002_v45, %v5671_v15 }
 0xbaf   :  { %v3903_v61 = vpop.permute.xlu0 %3902  ;;  %v5293_v51 = vpack.c.bf16 %v3896_v31, %v3854_v60  ;;  %v4015_v60 = vrot.slane %v4002_v45, %v5677_v17 }
 0xbb0   :  { %v5271_v62 = vpack.c.bf16 %v3894_v57, %v3852_v55  ;;  %v3905_v63 = vpop.permute.xlu1 %3904  ;;  %v5291_v5 = vpack.c.bf16 %v3897_v6, %v3855_v56  ;;  %v4011_v6 = vrot.slane %v4002_v45, %v5667_v10 }
 0xbb1   :  { %v3912_v20 = vsel %vm180_vm2, %v3903_v61, %v3905_v63 }
 0xbb2   :  { %5272 = vmatpush1.bf16.msra.mxu0 %v5271_v62  ;;  %5292 = vmatprep.subr.bf16.mxu1 %v5291_v5  ;;  %v3937_v14 = vmul.f32 %v3923_v36, %v3912_v20 }
 0xbb3   :  { %v3907_v53 = vpop.permute.xlu0 %3906  ;;  %5294 = vmatpush1.bf16.msra.mxu1 %v5293_v51 }
 0xbb4   :  { %v3909_v2 = vpop.permute.xlu1 %3908  ;;  %v3911_v38 = vsel %vm180_vm2, %v3905_v63, %v3907_v53 }
 0xbb5   :  { %v3910_v32 = vsel %vm180_vm2, %v3907_v53, %v3909_v2  ;;  %v3913_v34 = vsel %vm180_vm2, %v3909_v2, %v3903_v61  ;;  %v3938_v8 = vmul.f32 %v3927_v3, %v3911_v38  ;;  %v4019_v61 = vrot.slane %v4002_v45, %v5674_v16 }
 0xbb6   :  { %v3936_v33 = vmul.f32 %v3919_v26, %v3913_v34  ;;  %v3939_v46 = vmul.f32 %v3931_v27, %v3910_v32 }
 0xbb7   :  { %v3945_v22 = vpop.permute.xlu0 %3944 }
 0xbb8   :  { %v3947_v25 = vpop.permute.xlu1 %3946 }
 0xbb9   :  { %v3954_v13 = vsel %vm224_vm3, %v3945_v22, %v3947_v25 }
 0xbba   :  { %v3979_v29 = vmul.f32 %v3965_v49, %v3954_v13 }
 0xbbb   :  { %v3949_v37 = vpop.permute.xlu0 %3948 }
 0xbbc   :  { %v3953_v39 = vsel %vm224_vm3, %v3947_v25, %v3949_v37  ;;  %v3951_v40 = vpop.permute.xlu1 %3950  ;;  %v5273_v41 = vpack.c.bf16 %v3979_v29, %v3937_v14  ;;  %v4044_v14 = vld [vmem:[#allocation6 + $0x18] sm:$0xf]  ;;  %v4086_v29 = vld [vmem:[#allocation6 + $0x1c] sm:$0xf] }
 0xbbd   :  { %v3980_v42 = vmul.f32 %v3969_v28, %v3953_v39  ;;  %v3952_v43 = vsel %vm224_vm3, %v3949_v37, %v3951_v40  ;;  %v3955_v44 = vsel %vm224_vm3, %v3951_v40, %v3945_v22  ;;  %v4095_v34 = vrot.slane %v4086_v29, %v5667_v10 }
 0xbbe   :  { %v3978_v35 = vmul.f32 %v3961_v0, %v3955_v44  ;;  %v3981_v47 = vmul.f32 %v3973_v1, %v3952_v43  ;;  %5274 = vmatprep.subr.bf16.mxu0 %v5273_v41  ;;  %v4049_v1 = vrot.slane %v4044_v14, %v5671_v15  ;;  %v4061_v38 = vrot.slane %v4044_v14, %v5674_v16 }
 0xbbf   :  { %v3991_v18 = vpop.permute.xlu0 %3990  ;;  %v5297_v56 = vpack.c.bf16 %v3980_v42, %v3938_v8  ;;  %v4099_v39 = vrot.slane %v4086_v29, %v5677_v17  ;;  %v4103_v40 = vrot.slane %v4086_v29, %v5674_v16 }
 0xbc0   :  { %v5275_v31 = vpack.c.bf16 %v3978_v35, %v3936_v33  ;;  %v3993_v52 = vpop.permute.xlu1 %3992  ;;  %v5295_v55 = vpack.c.bf16 %v3981_v47, %v3939_v46 }
 0xbc1   :  { %v4000_v57 = vsel %vm272_vm4, %v3991_v18, %v3993_v52 }
 0xbc2   :  { %5276 = vmatpush1.bf16.msra.mxu0 %v5275_v31  ;;  %5296 = vmatprep.subr.bf16.mxu1 %v5295_v55  ;;  %v4024_v63 = vmul.f32 %v4007_v50, %v4000_v57  ;;  %v4128_v31 = vld [vmem:[#allocation6 + $0x20] sm:$0xf] }
 0xbc3   :  { %v3995_v62 = vpop.permute.xlu0 %3994  ;;  %5298 = vmatpush1.bf16.msra.mxu1 %v5297_v56 }
 0xbc4   :  { %v3999_v5 = vsel %vm272_vm4, %v3993_v52, %v3995_v62  ;;  %v3997_v51 = vpop.permute.xlu1 %3996  ;;  %v5279_v22 = vpack.c.bf16 %v4024_v63, %v6947_v48  ;;  %v4091_v48 = vrot.slane %v4086_v29, %v5671_v15 }
 0xbc5   :  { %v4025_v7 = vmul.f32 %v4011_v6, %v3999_v5  ;;  %v3998_v53 = vsel %vm272_vm4, %v3995_v62, %v3997_v51  ;;  %v4001_v11 = vsel %vm272_vm4, %v3997_v51, %v3991_v18  ;;  %v4133_v62 = vrot.slane %v4128_v31, %v5671_v15 }
 0xbc6   :  { %v4026_v2 = vmul.f32 %v4015_v60, %v3998_v53  ;;  %v4027_v36 = vmul.f32 %v4019_v61, %v4001_v11  ;;  %v4141_v53 = vrot.slane %v4128_v31, %v5677_v17  ;;  %v4145_v11 = vrot.slane %v4128_v31, %v5674_v16 }
 0xbc7   :  { %v4033_v49 = vpop.permute.xlu0 %4032  ;;  %v5277_v20 = vpack.c.bf16 %v4025_v7, %v6949_v21  ;;  %v4053_v21 = vrot.slane %v4044_v14, %v5667_v10  ;;  %v4137_v7 = vrot.slane %v4128_v31, %v5667_v10 }
 0xbc8   :  { %v5301_v25 = vpack.c.bf16 %v4026_v2, %v6953_v23  ;;  %v4035_v26 = vpop.permute.xlu1 %4034  ;;  %v5299_v27 = vpack.c.bf16 %v4027_v36, %v6957_v24  ;;  %v4057_v24 = vrot.slane %v4044_v14, %v5677_v17 }
 0xbc9   :  { %5278 = vmatprep.subr.bf16.mxu0 %v5277_v20  ;;  %v4042_v23 = vsel %vm316_vm6, %v4033_v49, %v4035_v26 }
 0xbca   :  { %5280 = vmatpush1.bf16.msra.mxu0 %v5279_v22  ;;  %5300 = vmatprep.subr.bf16.mxu1 %v5299_v27  ;;  %v4066_v44 = vmul.f32 %v4049_v1, %v4042_v23  ;;  %v3817_v1 = vld [vmem:[#allocation8 + $0x38] sm:$0xff] }
 0xbcb   :  { %v4037_v13 = vpop.permute.xlu0 %4036  ;;  %5302 = vmatpush1.bf16.msra.mxu1 %v5301_v25 }
 0xbcc   :  { %v4039_v28 = vpop.permute.xlu1 %4038  ;;  %v4041_v37 = vsel %vm316_vm6, %v4035_v26, %v4037_v13 }
 0xbcd   :  { %v4040_v41 = vsel %vm316_vm6, %v4037_v13, %v4039_v28  ;;  %v4043_v42 = vsel %vm316_vm6, %v4039_v28, %v4033_v49  ;;  %v4067_v35 = vmul.f32 %v4053_v21, %v4041_v37  ;;  %v4402_v37 = vld [vmem:[#allocation6 + $0x4] sm:$0xf] }
 0xbce   :  { %v4068_v50 = vmul.f32 %v4057_v24, %v4040_v41  ;;  %v4069_v52 = vmul.f32 %v4061_v38, %v4043_v42 }
 0xbcf   :  { %v4075_v0 = vpop.permute.xlu0 %4074 }
 0xbd0   :  { %v4077_v3 = vpop.permute.xlu1 %4076 }
 0xbd1   :  { %v4084_v32 = vsel %vm360_vm5, %v4075_v0, %v4077_v3 }
 0xbd2   :  { %v4108_v45 = vmul.f32 %v4091_v48, %v4084_v32 }
 0xbd3   :  { %v4079_v43 = vpop.permute.xlu0 %4078 }
 0xbd4   :  { %v4083_v33 = vsel %vm360_vm5, %v4077_v3, %v4079_v43  ;;  %v4081_v46 = vpop.permute.xlu1 %4080  ;;  %v5283_v60 = vpack.c.bf16 %v4108_v45, %v4066_v44 }
 0xbd5   :  { %v4109_v47 = vmul.f32 %v4095_v34, %v4083_v33  ;;  %v4082_v8 = vsel %vm360_vm5, %v4079_v43, %v4081_v46  ;;  %v4085_v18 = vsel %vm360_vm5, %v4081_v46, %v4075_v0  ;;  %v4415_v46 = vrot.slane %v4402_v37, %v5677_v17 }
 0xbd6   :  { %v4110_v55 = vmul.f32 %v4099_v39, %v4082_v8  ;;  %v4111_v56 = vmul.f32 %v4103_v40, %v4085_v18  ;;  %v4411_v40 = vrot.slane %v4402_v37, %v5667_v10  ;;  %v4407_v8 = vrot.slane %v4402_v37, %v5671_v15 }
 0xbd7   :  { %v4117_v57 = vpop.permute.xlu0 %4116  ;;  %v5281_v6 = vpack.c.bf16 %v4109_v47, %v4067_v35  ;;  %v4419_v18 = vrot.slane %v4402_v37, %v5674_v16 }
 0xbd8   :  { %v5305_v61 = vpack.c.bf16 %v4110_v55, %v4068_v50  ;;  %v4119_v63 = vpop.permute.xlu1 %4118  ;;  %v5303_v5 = vpack.c.bf16 %v4111_v56, %v4069_v52 }
 0xbd9   :  { %v4126_v51 = vsel %vm404_vm7, %v4117_v57, %v4119_v63  ;;  %5282 = vmatprep.subr.bf16.mxu0 %v5281_v6 }
 0xbda   :  { %5284 = vmatpush1.bf16.msra.mxu0 %v5283_v60  ;;  %5304 = vmatprep.subr.bf16.mxu1 %v5303_v5  ;;  %v4150_v36 = vmul.f32 %v4133_v62, %v4126_v51 }
 0xbdb   :  { %v4121_v2 = vpop.permute.xlu0 %4120  ;;  %5306 = vmatpush1.bf16.msra.mxu1 %v5305_v61 }
 0xbdc   :  { %v4125_v49 = vsel %vm404_vm7, %v4119_v63, %v4121_v2  ;;  %v4123_v20 = vpop.permute.xlu1 %4122  ;;  %v5288_v14 = vpack.c.bf16 %v5513_v59, %v4150_v36 }
 0xbdd   :  { %v4151_v22 = vmul.f32 %v4137_v7, %v4125_v49  ;;  %v4124_v25 = vsel %vm404_vm7, %v4121_v2, %v4123_v20  ;;  %v4127_v26 = vsel %vm404_vm7, %v4123_v20, %v4117_v57 }
 0xbde   :  { %v4152_v27 = vmul.f32 %v4141_v53, %v4124_v25  ;;  %v4153_v13 = vmul.f32 %v4145_v11, %v4127_v26  ;;  %v4444_v25 = vld [vmem:[#allocation6 + $0x8] sm:$0xf] }
 0xbdf   :  { %v5285_v28 = vpack.c.bf16 %v5513_v59, %v4151_v22  ;;  %v4457_v37 = vrot.slane %v4444_v25, %v5677_v17 }
 0xbe0   :  { %v5307_v29 = vpack.c.bf16 %v5513_v59, %v4153_v13  ;;  %v5310_v0 = vpack.c.bf16 %v5513_v59, %v4152_v27  ;;  %v4486_v27 = vld [vmem:[#allocation6 + $0xc] sm:$0xf] }
 0xbe1   :  { %5287 = vmatprep.subr.msk.bf16.mxu0 %vm5787_vm10, %v5285_v28  ;;  %v4453_v28 = vrot.slane %v4444_v25, %v5667_v10 }
 0xbe2   :  { %5290 = vmatpush1.bf16.msk.msra.mxu0 %vm5787_vm10, %v5288_v14  ;;  %5309 = vmatprep.subr.msk.bf16.mxu1 %vm5787_vm10, %v5307_v29  ;;  %v4495_v14 = vrot.slane %v4486_v27, %v5667_v10 }
 0xbe3   :  { %5312 = vmatpush1.bf16.msk.msra.mxu1 %vm5787_vm10, %v5310_v0 }
 0xbe5   :  { %4921 = vmatmul.mubr.msk.f32.vlgmr.msra.gmra.mrb[14].mxu0 %vm480_vm11, %v3817_v1 }
 0xbe6   :  { %4922 = vmatmul.mubr.msk.f32.vlgmr.msra.gmra.mrb[14].mxu1 %vm480_vm11, %v3817_v1  ;;  %4795 = vmatprep.mubr.f32.mxu0 %v5510_v4 }
 0xbe7   :  { %4866 = vmatprep.mubr.f32.mxu1 %v5510_v4 }
 0xcb8   :  { %v4267_v21 = vpop.f32.mrb[14].mxu0 }
 0xcb9   :  { %v7136_v48 = vadd.f32 %v4267_v21, %v6756_v30  ;;  %v4269_v3 = vpop.f32.mrb[15].mxu0  ;;  %v4338_v23 = vpop.f32.mrb[14].mxu1  ;;  %v4449_v21 = vrot.slane %v4444_v25, %v5671_v15 }
 0xcba   :  { %v7139_v24 = vadd.f32 %v4269_v3, %v6759_v54  ;;  %v4340_v32 = vpop.f32.mrb[15].mxu1  ;;  %v7146_v34 = vadd.f32 %v4338_v23, %v6766_v12  ;;  %v4360_v12 = vld [vmem:[#allocation6] sm:$0xf]  ;;  %v4461_v3 = vrot.slane %v4444_v25, %v5674_v16 }
 0xcbb   :  { %4348 = vrot.lane.b32.xlu0 %v7136_v48, %s5503_s12  ;;  %v7149_v4 = vadd.f32 %v4340_v32, %v6769_v19  ;;  %v4369_v39 = vrot.slane %v4360_v12, %v5667_v10  ;;  %v4365_v44 = vrot.slane %v4360_v12, %v5671_v15  ;;  %v4377_v45 = vrot.slane %v4360_v12, %v5674_v16 }
 0xcbc   :  { %4350 = vrot.lane.b32.xlu1 %v7139_v24, %s5503_s12  ;;  %v4373_v31 = vrot.slane %v4360_v12, %v5677_v17  ;;  %v4499_v32 = vrot.slane %v4486_v27, %v5677_v17  ;;  %v4491_v12 = vrot.slane %v4486_v27, %v5671_v15 }
 0xcbf   :  { %4352 = vrot.lane.b32.xlu0 %v7146_v34, %s5503_s12 }
 0xcc0   :  { %4354 = vrot.lane.b32.xlu1 %v7149_v4, %s5503_s12 }
 0xcc3   :  { %4390 = vrot.lane.b32.xlu0 %v7136_v48, %s5504_s3 }
 0xcc4   :  { %4392 = vrot.lane.b32.xlu1 %v7139_v24, %s5504_s3 }
 0xcc7   :  { %4394 = vrot.lane.b32.xlu0 %v7146_v34, %s5504_s3 }
 0xcc8   :  { %4396 = vrot.lane.b32.xlu1 %v7149_v4, %s5504_s3 }
 0xccb   :  { %4432 = vrot.lane.b32.xlu0 %v7136_v48, %s5505_s13 }
 0xccc   :  { %4434 = vrot.lane.b32.xlu1 %v7139_v24, %s5505_s13 }
 0xccf   :  { %4436 = vrot.lane.b32.xlu0 %v7146_v34, %s5505_s13 }
 0xcd0   :  { %4438 = vrot.lane.b32.xlu1 %v7149_v4, %s5505_s13 }
 0xcd3   :  { %4474 = vrot.lane.b32.xlu0 %v7136_v48, %s5506_s1 }
 0xcd4   :  { %4476 = vrot.lane.b32.xlu1 %v7139_v24, %s5506_s1 }
 0xcd7   :  { %4478 = vrot.lane.b32.xlu0 %v7146_v34, %s5506_s1 }
 0xcd8   :  { %4480 = vrot.lane.b32.xlu1 %v7149_v4, %s5506_s1 }
 0xcdb   :  { %4520 = vrot.lane.b32.xlu0 %v7136_v48, %s5507_s14 }
 0xcdc   :  { %4522 = vrot.lane.b32.xlu1 %v7139_v24, %s5507_s14 }
 0xcdf   :  { %4524 = vrot.lane.b32.xlu0 %v7146_v34, %s5507_s14 }
 0xce0   :  { %4526 = vrot.lane.b32.xlu1 %v7149_v4, %s5507_s14 }
 0xce3   :  { %4562 = vrot.lane.b32.xlu0 %v7136_v48, %s5508_s15 }
 0xce4   :  { %4564 = vrot.lane.b32.xlu1 %v7139_v24, %s5508_s15 }
 0xce7   :  { %4566 = vrot.lane.b32.xlu0 %v7146_v34, %s5508_s15 }
 0xce8   :  { %4568 = vrot.lane.b32.xlu1 %v7149_v4, %s5508_s15 }
 0xceb   :  { %4604 = vrot.lane.b32.xlu0 %v7136_v48, %s5509_s16 }
 0xcec   :  { %4606 = vrot.lane.b32.xlu1 %v7139_v24, %s5509_s16 }
 0xcef   :  { %4608 = vrot.lane.b32.xlu0 %v7146_v34, %s5509_s16 }
 0xcf0   :  { %4610 = vrot.lane.b32.xlu1 %v7149_v4, %s5509_s16 }
 0xcf3   :  { %4646 = vrot.lane.b32.xlu0 %v7136_v48, %s5511_s17 }
 0xcf4   :  { %4648 = vrot.lane.b32.xlu1 %v7139_v24, %s5511_s17 }
 0xcf7   :  { %4650 = vrot.lane.b32.xlu0 %v7146_v34, %s5511_s17 }
 0xcf8   :  { %4652 = vrot.lane.b32.xlu1 %v7149_v4, %s5511_s17 }
 0xd2d   :  { %v4349_v30 = vpop.permute.xlu0 %4348 }
 0xd2e   :  { %v4351_v54 = vpop.permute.xlu1 %4350 }
 0xd2f   :  { %v4358_v41 = vsel %vm93_vm0, %v4349_v30, %v4351_v54 }
 0xd30   :  { %v4383_v35 = vmul.f32 %v4369_v39, %v4358_v41 }
 0xd31   :  { %v4353_v19 = vpop.permute.xlu0 %4352 }
 0xd32   :  { %v4355_v38 = vpop.permute.xlu1 %4354  ;;  %v4357_v56 = vsel %vm93_vm0, %v4351_v54, %v4353_v19 }
 0xd33   :  { %v4356_v50 = vsel %vm93_vm0, %v4353_v19, %v4355_v38  ;;  %v4359_v52 = vsel %vm93_vm0, %v4355_v38, %v4349_v30  ;;  %v4384_v11 = vmul.f32 %v4373_v31, %v4357_v56  ;;  %v4503_v19 = vrot.slane %v4486_v27, %v5674_v16 }
 0xd34   :  { %v4382_v5 = vmul.f32 %v4365_v44, %v4359_v52  ;;  %v4385_v51 = vmul.f32 %v4377_v45, %v4356_v50 }
 0xd35   :  { %v4391_v42 = vpop.permute.xlu0 %4390 }
 0xd36   :  { %v4393_v43 = vpop.permute.xlu1 %4392 }
 0xd37   :  { %v4400_v33 = vsel %vm136_vm1, %v4391_v42, %v4393_v43 }
 0xd38   :  { %v4425_v47 = vmul.f32 %v4411_v40, %v4400_v33 }
 0xd39   :  { %v4395_v55 = vpop.permute.xlu0 %4394 }
 0xd3a   :  { %v4399_v57 = vsel %vm136_vm1, %v4393_v43, %v4395_v55  ;;  %v4397_v6 = vpop.permute.xlu1 %4396  ;;  %v5313_v60 = vpack.c.bf16 %v4425_v47, %v4383_v35  ;;  %v4532_v35 = vld [vmem:[#allocation6 + $0x14] sm:$0xf] }
 0xd3b   :  { %v4426_v61 = vmul.f32 %v4415_v46, %v4399_v57  ;;  %v4398_v62 = vsel %vm136_vm1, %v4395_v55, %v4397_v6  ;;  %v4401_v63 = vsel %vm136_vm1, %v4397_v6, %v4391_v42  ;;  %v4537_v56 = vrot.slane %v4532_v35, %v5671_v15 }
 0xd3c   :  { %v4424_v7 = vmul.f32 %v4407_v8, %v4401_v63  ;;  %v4427_v53 = vmul.f32 %v4419_v18, %v4398_v62  ;;  %5314 = vmatprep.subr.bf16.mxu0 %v5313_v60  ;;  %v4541_v62 = vrot.slane %v4532_v35, %v5667_v10  ;;  %v4545_v63 = vrot.slane %v4532_v35, %v5677_v17 }
 0xd3d   :  { %v4433_v2 = vpop.permute.xlu0 %4432  ;;  %v5337_v22 = vpack.c.bf16 %v4426_v61, %v4384_v11 }
 0xd3e   :  { %v5315_v36 = vpack.c.bf16 %v4424_v7, %v4382_v5  ;;  %v4435_v49 = vpop.permute.xlu1 %4434  ;;  %v5335_v20 = vpack.c.bf16 %v4427_v53, %v4385_v51  ;;  %v4549_v5 = vrot.slane %v4532_v35, %v5674_v16 }
 0xd3f   :  { %v4442_v29 = vsel %vm180_vm2, %v4433_v2, %v4435_v49 }
 0xd40   :  { %5316 = vmatpush1.bf16.msra.mxu0 %v5315_v36  ;;  %5336 = vmatprep.subr.bf16.mxu1 %v5335_v20  ;;  %v4467_v30 = vmul.f32 %v4453_v28, %v4442_v29 }
 0xd41   :  { %v4437_v26 = vpop.permute.xlu0 %4436  ;;  %5338 = vmatpush1.bf16.msra.mxu1 %v5337_v22 }
 0xd42   :  { %v4439_v13 = vpop.permute.xlu1 %4438  ;;  %v4441_v41 = vsel %vm180_vm2, %v4435_v49, %v4437_v26 }
 0xd43   :  { %v4440_v38 = vsel %vm180_vm2, %v4437_v26, %v4439_v13  ;;  %v4443_v39 = vsel %vm180_vm2, %v4439_v13, %v4433_v2  ;;  %v4468_v50 = vmul.f32 %v4457_v37, %v4441_v41 }
 0xd44   :  { %v4466_v47 = vmul.f32 %v4449_v21, %v4443_v39  ;;  %v4469_v8 = vmul.f32 %v4461_v3, %v4440_v38  ;;  %v4616_v21 = vld [vmem:[#allocation6 + $0x1c] sm:$0xf] }
 0xd45   :  { %v4475_v0 = vpop.permute.xlu0 %4474  ;;  %v4629_v37 = vrot.slane %v4616_v21, %v5677_v17  ;;  %v4633_v38 = vrot.slane %v4616_v21, %v5674_v16 }
 0xd46   :  { %v4477_v1 = vpop.permute.xlu1 %4476 }
 0xd47   :  { %v4484_v23 = vsel %vm224_vm3, %v4475_v0, %v4477_v1 }
 0xd48   :  { %v4509_v54 = vmul.f32 %v4495_v14, %v4484_v23 }
 0xd49   :  { %v4479_v40 = vpop.permute.xlu0 %4478 }
 0xd4a   :  { %v4483_v42 = vsel %vm224_vm3, %v4477_v1, %v4479_v40  ;;  %v4481_v43 = vpop.permute.xlu1 %4480  ;;  %v5317_v44 = vpack.c.bf16 %v4509_v54, %v4467_v30  ;;  %v4574_v1 = vld [vmem:[#allocation6 + $0x18] sm:$0xf]  ;;  %v4625_v54 = vrot.slane %v4616_v21, %v5667_v10 }
 0xd4b   :  { %v4510_v45 = vmul.f32 %v4499_v32, %v4483_v42  ;;  %v4482_v33 = vsel %vm224_vm3, %v4479_v40, %v4481_v43  ;;  %v4485_v46 = vsel %vm224_vm3, %v4481_v43, %v4475_v0  ;;  %v4579_v23 = vrot.slane %v4574_v1, %v5671_v15 }
 0xd4c   :  { %v4508_v18 = vmul.f32 %v4491_v12, %v4485_v46  ;;  %v4511_v31 = vmul.f32 %v4503_v19, %v4482_v33  ;;  %5318 = vmatprep.subr.bf16.mxu0 %v5317_v44  ;;  %v4591_v19 = vrot.slane %v4574_v1, %v5674_v16 }
 0xd4d   :  { %v4521_v52 = vpop.permute.xlu0 %4520  ;;  %v5341_v60 = vpack.c.bf16 %v4510_v45, %v4468_v50 }
 0xd4e   :  { %v5319_v55 = vpack.c.bf16 %v4508_v18, %v4466_v47  ;;  %v4523_v57 = vpop.permute.xlu1 %4522  ;;  %v5339_v6 = vpack.c.bf16 %v4511_v31, %v4469_v8  ;;  %v4658_v8 = vld [vmem:[#allocation6 + $0x20] sm:$0xf] }
 0xd4f   :  { %v4530_v61 = vsel %vm272_vm4, %v4521_v52, %v4523_v57 }
 0xd50   :  { %5320 = vmatpush1.bf16.msra.mxu0 %v5319_v55  ;;  %5340 = vmatprep.subr.bf16.mxu1 %v5339_v6  ;;  %v4554_v7 = vmul.f32 %v4537_v56, %v4530_v61 }
 0xd51   :  { %v4525_v51 = vpop.permute.xlu0 %4524  ;;  %5342 = vmatpush1.bf16.msra.mxu1 %v5341_v60  ;;  %v4663_v60 = vrot.slane %v4658_v8, %v5671_v15 }
 0xd52   :  { %v4529_v53 = vsel %vm272_vm4, %v4523_v57, %v4525_v51  ;;  %v4527_v11 = vpop.permute.xlu1 %4526  ;;  %v5323_v27 = vpack.c.bf16 %v4554_v7, %v7136_v48  ;;  %v4621_v48 = vrot.slane %v4616_v21, %v5671_v15  ;;  %v4675_v7 = vrot.slane %v4658_v8, %v5674_v16 }
 0xd53   :  { %v4555_v2 = vmul.f32 %v4541_v62, %v4529_v53  ;;  %v4528_v36 = vsel %vm272_vm4, %v4525_v51, %v4527_v11  ;;  %v4531_v49 = vsel %vm272_vm4, %v4527_v11, %v4521_v52  ;;  %v4671_v51 = vrot.slane %v4658_v8, %v5677_v17 }
 0xd54   :  { %v4556_v20 = vmul.f32 %v4545_v63, %v4528_v36  ;;  %v4557_v22 = vmul.f32 %v4549_v5, %v4531_v49  ;;  %v4667_v5 = vrot.slane %v4658_v8, %v5667_v10 }
 0xd55   :  { %v4563_v25 = vpop.permute.xlu0 %4562  ;;  %v5321_v26 = vpack.c.bf16 %v4555_v2, %v7139_v24  ;;  %v4583_v24 = vrot.slane %v4574_v1, %v5667_v10 }
 0xd56   :  { %v5345_v13 = vpack.c.bf16 %v4556_v20, %v7146_v34  ;;  %v4565_v28 = vpop.permute.xlu1 %4564  ;;  %v5343_v14 = vpack.c.bf16 %v4557_v22, %v7149_v4  ;;  %v4587_v4 = vrot.slane %v4574_v1, %v5677_v17 }
 0xd57   :  { %5322 = vmatprep.subr.bf16.mxu0 %v5321_v26  ;;  %v4572_v34 = vsel %vm316_vm6, %v4563_v25, %v4565_v28 }
 0xd58   :  { %5324 = vmatpush1.bf16.msra.mxu0 %v5323_v27  ;;  %5344 = vmatprep.subr.bf16.mxu1 %v5343_v14  ;;  %v4596_v42 = vmul.f32 %v4579_v23, %v4572_v34 }
 0xd59   :  { %v4567_v29 = vpop.permute.xlu0 %4566  ;;  %5346 = vmatpush1.bf16.msra.mxu1 %v5345_v13 }
 0xd5a   :  { %v4569_v0 = vpop.permute.xlu1 %4568  ;;  %v4571_v12 = vsel %vm316_vm6, %v4565_v28, %v4567_v29 }
 0xd5b   :  { %v4570_v39 = vsel %vm316_vm6, %v4567_v29, %v4569_v0  ;;  %v4573_v40 = vsel %vm316_vm6, %v4569_v0, %v4563_v25  ;;  %v4597_v33 = vmul.f32 %v4583_v24, %v4571_v12 }
 0xd5c   :  { %v4598_v18 = vmul.f32 %v4587_v4, %v4570_v39  ;;  %v4599_v31 = vmul.f32 %v4591_v19, %v4573_v40 }
 0xd5d   :  { %v4605_v3 = vpop.permute.xlu0 %4604 }
 0xd5e   :  { %v4607_v32 = vpop.permute.xlu1 %4606 }
 0xd5f   :  { %v4614_v30 = vsel %vm360_vm5, %v4605_v3, %v4607_v32 }
 0xd60   :  { %v4638_v43 = vmul.f32 %v4621_v48, %v4614_v30 }
 0xd61   :  { %v4609_v41 = vpop.permute.xlu0 %4608 }
 0xd62   :  { %v4613_v44 = vsel %vm360_vm5, %v4607_v32, %v4609_v41  ;;  %v4611_v45 = vpop.permute.xlu1 %4610  ;;  %v5327_v57 = vpack.c.bf16 %v4638_v43, %v4596_v42 }
 0xd63   :  { %v4639_v46 = vmul.f32 %v4625_v54, %v4613_v44  ;;  %v4612_v35 = vsel %vm360_vm5, %v4609_v41, %v4611_v45  ;;  %v4615_v47 = vsel %vm360_vm5, %v4611_v45, %v4605_v3 }
 0xd64   :  { %v4640_v50 = vmul.f32 %v4629_v37, %v4612_v35  ;;  %v4641_v52 = vmul.f32 %v4633_v38, %v4615_v47 }
 0xd65   :  { %v4647_v55 = vpop.permute.xlu0 %4646  ;;  %v5325_v56 = vpack.c.bf16 %v4639_v46, %v4597_v33 }
 0xd66   :  { %v5349_v6 = vpack.c.bf16 %v4640_v50, %v4598_v18  ;;  %v4649_v61 = vpop.permute.xlu1 %4648  ;;  %v5347_v62 = vpack.c.bf16 %v4641_v52, %v4599_v31 }
 0xd67   :  { %v4656_v63 = vsel %vm404_vm7, %v4647_v55, %v4649_v61  ;;  %5326 = vmatprep.subr.bf16.mxu0 %v5325_v56 }
 0xd68   :  { %5328 = vmatpush1.bf16.msra.mxu0 %v5327_v57  ;;  %5348 = vmatprep.subr.bf16.mxu1 %v5347_v62  ;;  %v4680_v11 = vmul.f32 %v4663_v60, %v4656_v63 }
 0xd69   :  { %v4651_v53 = vpop.permute.xlu0 %4650  ;;  %5350 = vmatpush1.bf16.msra.mxu1 %v5349_v6 }
 0xd6a   :  { %v4655_v15 = vsel %vm404_vm7, %v4649_v61, %v4651_v53  ;;  %v4653_v2 = vpop.permute.xlu1 %4652  ;;  %v5332_v16 = vpack.c.bf16 %v5513_v59, %v4680_v11 }
 0xd6b   :  { %v4681_v36 = vmul.f32 %v4667_v5, %v4655_v15  ;;  %v4654_v49 = vsel %vm404_vm7, %v4651_v53, %v4653_v2  ;;  %v4657_v10 = vsel %vm404_vm7, %v4653_v2, %v4647_v55 }
 0xd6c   :  { %v4682_v20 = vmul.f32 %v4671_v51, %v4654_v49  ;;  %v4683_v22 = vmul.f32 %v4675_v7, %v4657_v10 }
 0xd6d   :  { %v5329_v17 = vpack.c.bf16 %v5513_v59, %v4681_v36 }
 0xd6e   :  { %v5351_v25 = vpack.c.bf16 %v5513_v59, %v4683_v22  ;;  %v5354_v26 = vpack.c.bf16 %v5513_v59, %v4682_v20 }
 0xd6f   :  { %5331 = vmatprep.subr.msk.bf16.mxu0 %vm5787_vm10, %v5329_v17 }
 0xd70   :  { %5334 = vmatpush1.bf16.msk.msra.mxu0 %vm5787_vm10, %v5332_v16  ;;  %5353 = vmatprep.subr.msk.bf16.mxu1 %vm5787_vm10, %v5351_v25 }
 0xd71   :  { %5356 = vmatpush1.bf16.msk.msra.mxu1 %vm5787_vm10, %v5354_v26 }
 0xd73   :  { %4923 = vmatmul.mubr.msk.f32.vlgmr.msra.gmra.mrb[16].mxu0 %vm480_vm11, %v4347_v9 }
 0xd74   :  { %4924 = vmatmul.mubr.msk.f32.vlgmr.msra.gmra.mrb[16].mxu1 %vm480_vm11, %v4347_v9 }
 0xe46   :  { %v4797_v27 = vpop.f32.mrb[16].mxu0 }
 0xe47   :  { %vm4873_vm12 = vcmp.ge.f32.partialorder %v4797_v27, 0.0  ;;  %v4877_v59 = vmul.f32 0.01, %v4797_v27  ;;  %v4799_v13 = vpop.f32.mrb[17].mxu0  ;;  %v4868_v28 = vpop.f32.mrb[16].mxu1 }
 0xe48   :  { %vm4874_vm13 = vcmp.ge.f32.partialorder %v4799_v13, 0.0  ;;  %v4878_v14 = vmul.f32 0.01, %v4799_v13  ;;  %vm4875_vm14 = vcmp.ge.f32.partialorder %v4868_v28, 0.0  ;;  %v4879_v29 = vmul.f32 0.01, %v4868_v28 }
 0xe49   :  { %v4881_v0 = vsel %vm4873_vm12, %v4797_v27, %v4877_v59  ;;  %v4870_v1 = vpop.f32.mrb[17].mxu1 }
 0xe4a   :  { %4885 = vst [vmem:[#allocation11] sm:$0xff] %v4881_v0  ;;  %v4882_v58 = vsel %vm4874_vm13, %v4799_v13, %v4878_v14  ;;  %v4883_v21 = vsel %vm4875_vm14, %v4868_v28, %v4879_v29  ;;  %vm4876_vm15 = vcmp.ge.f32.partialorder %v4870_v1, 0.0  ;;  %v4880_v3 = vmul.f32 0.01, %v4870_v1 }
 0xe4b   :  { %4886 = vst [vmem:[#allocation11 + $0x8] sm:$0xff] %v4882_v58  ;;  %4887 = vst [vmem:[#allocation11 + $0x10] sm:$0xff] %v4883_v21 }
 0xe4c   :  { %v4884_v23 = vsel %vm4876_vm15, %v4870_v1, %v4880_v3 }
 0xe4d   :  { %4888 = vst [vmem:[#allocation11 + $0x18] sm:$0xff] %v4884_v23 }
 0xe4e   :  { %5476 = shalt.err (!%p5473_p8)
}
 0xe4f   :  { %s5477_s23 = scalar_lea.hbm %s7341_s4, 512 }
 0xe50   :  { %p5478_p9 = scmp.ne.s32.totalorder %s7341_s4, %s5477_s23  ;;  %p5481_p10 = scmp.lt.u32.totalorder %s5477_s23, %s7341_s4 }
 0xe52   :  { %p5483_p11 = pnand %p5481_p10, %p5478_p9 }
 0xe54   :  { %5486 = shalt.err (!%p5483_p11)
}
 0xe55   :  { %4898 = dma.vmem_to_hbm [thread:$0]  %s4896_s19, 512, %s7341_s4, [#allocation5]  }
 0xe56   :  { %5493 = dma.done.wait [#allocation5], 512  }
 0xe57   :  { %5494 = vsyncadd [#allocation5], 4294966784 }
 0xe58   :  { %4902 = vsyncpa [#allocation4], 1 }
 0xe59   :  { %4903 = vsyncpa [#allocation7], 1 }
 0xe5a   :  { %4904 = vsyncpa [#allocation10], 1 }
 0xe5b   :  { %4905 = vsyncpa [#allocation5], 1 }

</bundles_post_ra>
